<compile_context>
chip_gen: v6e
topology: v6e:2x2x1
jax: 0.10.0
libtpu: 0.0.40
codegen_flags: <defaults>
</compile_context>

<pallas_src>
import jax
import jax.numpy as jnp
import numpy as np
from jax.experimental import pallas as pl
from jax.experimental.pallas import tpu as pltpu


_N_GRU_ARRAYS = 12     # unpacked arrays per GRU layer (init / reference format)


def _round_up(x, m):
    return ((x + m - 1) // m) * m


# ------------------------- Pallas kernel -------------------------

def make_seq2seq_kernel(num_layers, hidden, batch, seq_len, target_len,
                        out_pad, gate_pad):
    H, B, S, T = hidden, batch, seq_len, target_len

    def gru_nonlin(g, h):
        # g: (B, gate_pad), lane blocks [r | z | n_input | n_hidden | pad].
        rz = jax.nn.sigmoid(g[:, :2 * H])
        r = rz[:, :H]
        z = rz[:, H:2 * H]
        n = jnp.tanh(g[:, 2 * H:3 * H] + r * g[:, 3 * H:4 * H])
        return (1.0 - z) * n + z * h

    def kernel(*refs):
        x_ref, din_ref = refs[0], refs[1]   # (S*B, I) time-major, (B, out_pad)
        out_ref = refs[-1]                  # (B, T*out_pad)
        p = refs[2:-1]

        idx = 0
        enc0 = p[idx:idx + 4]; idx += 4              # Wi, Wh, bi, bh
        encL = []
        for _ in range(num_layers - 1):              # fused Wcat, bcat
            encL.append(p[idx:idx + 2]); idx += 2
        decL = []
        for _ in range(num_layers):                  # fused Wcat, bcat
            decL.append(p[idx:idx + 2]); idx += 2
        fcW_ref, fcb_ref, outW_ref, outb_ref = p[idx:idx + 4]

        # ---------- hoisted weight loads & bias broadcasts ----------
        wi0 = enc0[0][...]                                   # (I, G)
        wh0 = enc0[1][...]                                    # (H, G)
        bi0 = enc0[2][...]                                    # (1, G)
        bh0_b = jnp.broadcast_to(enc0[3][...], (B, gate_pad))
        encL_w = [w[...] for (w, b) in encL]
        encL_b = [jnp.broadcast_to(b[...], (B, gate_pad)) for (w, b) in encL]
        decL_w = [w[...] for (w, b) in decL]
        decL_b = [jnp.broadcast_to(b[...], (B, gate_pad)) for (w, b) in decL]
        fcW = fcW_ref[...]
        fcb_b = jnp.broadcast_to(fcb_ref[...], (B, fcW.shape[1]))
        outW = outW_ref[...]
        outb_b = jnp.broadcast_to(outb_ref[...], (B, out_pad))

        # ---------- encoder ----------
        # Layer-0 input projections for all S timesteps: one MXU call.
        x_tm = x_ref[...]                                     # (S*B, I)
        gi0_all = jnp.dot(x_tm, wi0,
                          preferred_element_type=jnp.float32) + bi0

        h = [jnp.zeros((B, H), jnp.float32) for _ in range(num_layers)]
        # TODO(synk): switch to lax.fori_loop(..., unroll=k) if S/T grow large.
        for t in range(S):                                    # small static unroll
            # layer 0: only the h-dependent matmul is on the serial path
            g0 = (gi0_all[t * B:(t + 1) * B, :]
                  + jnp.dot(h[0], wh0, preferred_element_type=jnp.float32)
                  + bh0_b)
            h[0] = gru_nonlin(g0, h[0])
            # layers >= 1: single fused [h_below, h] matmul per step
            for l in range(1, num_layers):
                g = (jnp.dot(jnp.concatenate([h[l - 1], h[l]], axis=1),
                             encL_w[l - 1],
                             preferred_element_type=jnp.float32)
                     + encL_b[l - 1])
                h[l] = gru_nonlin(g, h[l])

        # ---------- decoder (autoregressive) ----------
        dh = list(h)                                          # decoder hidden
        dec_in = din_ref[...]                                 # (B, out_pad) lane-dense
        ys = []
        for _ in range(T):                                    # small static unroll
            inp = dec_in
            for l in range(num_layers):
                g = (jnp.dot(jnp.concatenate([inp, dh[l]], axis=1),
                             decL_w[l],
                             preferred_element_type=jnp.float32)
                     + decL_b[l])
                dh[l] = gru_nonlin(g, dh[l])
                inp = dh[l]
            fc = jnp.maximum(
                jnp.dot(inp, fcW, preferred_element_type=jnp.float32) + fcb_b,
                0.0)                                          # (B, fc_pad)
            y = (jnp.dot(fc, outW, preferred_element_type=jnp.float32)
                 + outb_b)                                    # (B, out_pad), lane-dense
            ys.append(y)
            dec_in = y                                        # feedback, no slicing

        # Lane-concatenated store: each y occupies its own full-lane vregs.
        out_ref[...] = jnp.concatenate(ys, axis=1)            # (B, T*out_pad)

    return kernel


# ------------------------- host-side wrapper -------------------------

def seq2seq_forward(x, packed_params, *, hidden, num_layers, target_len,
                    output_size, out_pad, gate_pad):
    B, S, I = x.shape
    # Time-major, flattened: row t*B + b holds x[b, t, :] (no in-kernel reshape).
    x_tm = jnp.transpose(x, (1, 0, 2)).reshape(S * B, I)
    # Lane-dense decoder seed: x[:, -1, :] zero-padded to out_pad lanes.
    dec_in0 = jnp.zeros((B, out_pad), jnp.float32).at[:, :I].set(x[:, -1, :])

    kernel = make_seq2seq_kernel(num_layers, hidden, B, S, target_len,
                                 out_pad, gate_pad)
    flat = [x_tm, dec_in0] + list(packed_params)
    vmem = pl.BlockSpec(memory_space=pltpu.MemorySpace.VMEM)
    out = pl.pallas_call(
        kernel,
        out_shape=jax.ShapeDtypeStruct((B, target_len * out_pad), jnp.float32),
        in_specs=[vmem] * len(flat),
        out_specs=vmem,
        compiler_params=pltpu.CompilerParams(vmem_limit_bytes=4 * 1024 * 1024),
    )(*flat)
    return out.reshape(B, target_len, out_pad)[:, :, :output_size]


# ------------------------- parameter init (PyTorch-like, unpacked) -------------------------

def init_params(key, input_size, hidden, num_layers, fc_units, output_size):
    keys = iter(jax.random.split(key, 256))

    def uni(shape, k):
        return jax.random.uniform(next(keys), shape, jnp.float32, -k, k)

    k_gru = 1.0 / np.sqrt(hidden)

    def gru_layer(in_dim):
        out = []
        for _ in range(3):                      # Wir, Wiz, Win  (in, H)
            out.append(uni((in_dim, hidden), k_gru))
        for _ in range(3):                      # Whr, Whz, Whn  (H, H)
            out.append(uni((hidden, hidden), k_gru))
        for _ in range(6):                      # bir, biz, bin, bhr, bhz, bhn (1, H)
            out.append(uni((1, hidden), k_gru))
        return out

    params = []
    for l in range(num_layers):                 # encoder GRU
        params += gru_layer(input_size if l == 0 else hidden)
    for l in range(num_layers):                 # decoder GRU
        params += gru_layer(output_size if l == 0 else hidden)

    k_fc = 1.0 / np.sqrt(hidden)
    params.append(uni((hidden, fc_units), k_fc))        # decoder_fc weight^T
    params.append(uni((1, fc_units), k_fc))             # decoder_fc bias
    k_out = 1.0 / np.sqrt(fc_units)
    params.append(uni((fc_units, output_size), k_out))  # decoder_out weight^T
    params.append(uni((1, output_size), k_out))         # decoder_out bias
    return params


# ------------------------- host-side packing for the kernel -------------------------
# Gate lane layout (per GRU): [0:H]=r, [H:2H]=z, [2H:3H]=n_input, [3H:4H]=n_hidden.
# The n-gate input/hidden contributions stay in separate lane blocks so the
# r * (Whn h + bhn) product remains exact after fusing input+recurrent matmuls.

def pack_params(params, input_size, hidden, num_layers, fc_units, output_size,
                gate_pad, fc_pad, out_pad):
    H = hidden
    pv = list(params)
    idx = 0

    def take_gru():
        nonlocal idx
        arrs = pv[idx:idx + _N_GRU_ARRAYS]
        idx += _N_GRU_ARRAYS
        return arrs

    def pack_enc0(arrs, in_dim):
        Wir, Wiz, Win, Whr, Whz, Whn, bir, biz, bin_, bhr, bhz, bhn = arrs
        wi = jnp.zeros((in_dim, gate_pad), jnp.float32)
        wi = (wi.at[:, 0:H].set(Wir).at[:, H:2 * H].set(Wiz)
                .at[:, 2 * H:3 * H].set(Win))
        wh = jnp.zeros((H, gate_pad), jnp.float32)
        wh = (wh.at[:, 0:H].set(Whr).at[:, H:2 * H].set(Whz)
                .at[:, 3 * H:4 * H].set(Whn))
        bi = jnp.zeros((1, gate_pad), jnp.float32)
        bi = (bi.at[:, 0:H].set(bir).at[:, H:2 * H].set(biz)
                .at[:, 2 * H:3 * H].set(bin_))
        bh = jnp.zeros((1, gate_pad), jnp.float32)
        bh = (bh.at[:, 0:H].set(bhr).at[:, H:2 * H].set(bhz)
                .at[:, 3 * H:4 * H].set(bhn))
        return [wi, wh, bi, bh]

    def pack_fused(arrs, in_dim, in_pad):
        # Wcat rows: [0:in_dim] input weights (rows [in_dim:in_pad] zero),
        #            [in_pad:in_pad+H] hidden weights.
        Wir, Wiz, Win, Whr, Whz, Whn, bir, biz, bin_, bhr, bhz, bhn = arrs
        w = jnp.zeros((in_pad + H, gate_pad), jnp.float32)
        w = (w.at[:in_dim, 0:H].set(Wir)
              .at[:in_dim, H:2 * H].set(Wiz)
              .at[:in_dim, 2 * H:3 * H].set(Win)
              .at[in_pad:, 0:H].set(Whr)
              .at[in_pad:, H:2 * H].set(Whz)
              .at[in_pad:, 3 * H:4 * H].set(Whn))
        b = jnp.zeros((1, gate_pad), jnp.float32)
        b = (b.at[:, 0:H].set(bir + bhr)
              .at[:, H:2 * H].set(biz + bhz)
              .at[:, 2 * H:3 * H].set(bin_)
              .at[:, 3 * H:4 * H].set(bhn))
        return [w, b]

    packed = []
    for l in range(num_layers):                 # encoder
        arrs = take_gru()
        if l == 0:
            packed += pack_enc0(arrs, input_size)
        else:
            packed += pack_fused(arrs, H, H)
    for l in range(num_layers):                 # decoder
        arrs = take_gru()
        if l == 0:
            packed += pack_fused(arrs, output_size, out_pad)
        else:
            packed += pack_fused(arrs, H, H)

    fcW, fcb, outW, outb = pv[idx:idx + 4]
    fcW_p = jnp.zeros((H, fc_pad), jnp.float32).at[:, :fc_units].set(fcW)
    fcb_p = jnp.zeros((1, fc_pad), jnp.float32).at[:, :fc_units].set(fcb)
    # Padded output lanes are exactly zero so the lane-dense y can feed back
    # through the zero-row-padded decoder-layer-0 Wcat unchanged.
    outW_p = (jnp.zeros((fc_pad, out_pad), jnp.float32)
              .at[:fc_units, :output_size].set(outW))
    outb_p = jnp.zeros((1, out_pad), jnp.float32).at[:, :output_size].set(outb)
    packed += [fcW_p, fcb_p, outW_p, outb_p]
    return packed


# ------------------------- pure-JAX reference (unpacked params) -------------------------

def _gru_cell_ref(x, h, p):
    (Wir, Wiz, Win, Whr, Whz, Whn, bir, biz, bin_, bhr, bhz, bhn) = p
    r = jax.nn.sigmoid(jnp.dot(x, Wir) + bir + jnp.dot(h, Whr) + bhr)
    z = jax.nn.sigmoid(jnp.dot(x, Wiz) + biz + jnp.dot(h, Whz) + bhz)
    n = jnp.tanh(jnp.dot(x, Win) + bin_ + r * (jnp.dot(h, Whn) + bhn))
    return (1.0 - z) * n + z * h


def seq2seq_reference(x, params, hidden, num_layers, target_len):
    pv = list(params)
    idx = 0
    enc, dec = [], []
    for _ in range(num_layers):
        enc.append(tuple(pv[idx:idx + _N_GRU_ARRAYS])); idx += _N_GRU_ARRAYS
    for _ in range(num_layers):
        dec.append(tuple(pv[idx:idx + _N_GRU_ARRAYS])); idx += _N_GRU_ARRAYS
    fcW, fcb, outW, outb = pv[idx:idx + 4]

    B, S, _ = x.shape
    h = [jnp.zeros((B, hidden), jnp.float32) for _ in range(num_layers)]
    for t in range(S):
        inp = x[:, t, :]
        for l in range(num_layers):
            h[l] = _gru_cell_ref(inp, h[l], enc[l])
            inp = h[l]
    dh = list(h)
    dec_in = x[:, -1, :]
    outs = []
    for _ in range(target_len):
        inp = dec_in
        for l in range(num_layers):
            dh[l] = _gru_cell_ref(inp, dh[l], dec[l])
            inp = dh[l]
        y = jnp.maximum(jnp.dot(inp, fcW) + fcb, 0.0)
        y = jnp.dot(y, outW) + outb
        outs.append(y)
        dec_in = y
    return jnp.stack(outs, axis=1)


# ------------------------- main -------------------------

if __name__ == "__main__":
    input_size = 4
    hidden = 32
    num_layers = 2
    fc_units = 16
    output_size = 4        # must equal input_size (decoder is fed x[:, -1, :])
    target_len = 5
    batch = 2
    seq = 8
    assert output_size == input_size

    gate_pad = _round_up(4 * hidden, 128)   # [r|z|n_i|n_h] -> 128 lanes for H=32
    fc_pad = _round_up(fc_units, 128)       # 16 -> 128 lanes
    out_pad = _round_up(output_size, 128)   # lane-dense output / feedback

    key = jax.random.PRNGKey(0)
    kx, kp = jax.random.split(key)
    x = jax.random.normal(kx, (batch, seq, input_size), jnp.float32)
    params = init_params(kp, input_size, hidden, num_layers, fc_units, output_size)
    packed = pack_params(params, input_size, hidden, num_layers, fc_units,
                         output_size, gate_pad, fc_pad, out_pad)

    out = seq2seq_forward(x, packed, hidden=hidden, num_layers=num_layers,
                          target_len=target_len, output_size=output_size,
                          out_pad=out_pad, gate_pad=gate_pad)
    out = jax.block_until_ready(out)

    ref = seq2seq_reference(x, params, hidden, num_layers, target_len)
    assert out.shape == (batch, target_len, output_size)
    assert np.allclose(np.asarray(out), np.asarray(ref), atol=1e-4, rtol=1e-4)
    print("KERNEL_OK")
</pallas_src>

<mosaic_0001>
module attributes {stable_mosaic.version = 11 : i64} {
  func.func @kernel(%arg0: memref<16x4xf32, #tpu.memory_space<vmem>>, %arg1: memref<2x128xf32, #tpu.memory_space<vmem>>, %arg2: memref<4x128xf32, #tpu.memory_space<vmem>>, %arg3: memref<32x128xf32, #tpu.memory_space<vmem>>, %arg4: memref<1x128xf32, #tpu.memory_space<vmem>>, %arg5: memref<1x128xf32, #tpu.memory_space<vmem>>, %arg6: memref<64x128xf32, #tpu.memory_space<vmem>>, %arg7: memref<1x128xf32, #tpu.memory_space<vmem>>, %arg8: memref<160x128xf32, #tpu.memory_space<vmem>>, %arg9: memref<1x128xf32, #tpu.memory_space<vmem>>, %arg10: memref<64x128xf32, #tpu.memory_space<vmem>>, %arg11: memref<1x128xf32, #tpu.memory_space<vmem>>, %arg12: memref<32x128xf32, #tpu.memory_space<vmem>>, %arg13: memref<1x128xf32, #tpu.memory_space<vmem>>, %arg14: memref<128x128xf32, #tpu.memory_space<vmem>>, %arg15: memref<1x128xf32, #tpu.memory_space<vmem>>, %arg16: memref<2x640xf32, #tpu.memory_space<vmem>>) attributes {dimension_semantics = [], scalar_prefetch = 0 : i64, scratch_operands = 0 : i64, tpu.core_type = #tpu.core_type<tc>} {
    %c0 = arith.constant 0 : index
    %c0_0 = arith.constant 0 : index
    %0 = vector.load %arg2[%c0, %c0_0] : memref<4x128xf32, #tpu.memory_space<vmem>>, vector<4x128xf32>
    %c0_1 = arith.constant 0 : index
    %c0_2 = arith.constant 0 : index
    %1 = vector.load %arg3[%c0_1, %c0_2] : memref<32x128xf32, #tpu.memory_space<vmem>>, vector<32x128xf32>
    %c0_3 = arith.constant 0 : index
    %c0_4 = arith.constant 0 : index
    %2 = vector.load %arg4[%c0_3, %c0_4] : memref<1x128xf32, #tpu.memory_space<vmem>>, vector<1x128xf32>
    %c0_5 = arith.constant 0 : index
    %c0_6 = arith.constant 0 : index
    %3 = vector.load %arg5[%c0_5, %c0_6] : memref<1x128xf32, #tpu.memory_space<vmem>>, vector<1x128xf32>
    %4 = vector.shape_cast %3 : vector<1x128xf32> to vector<1x128xf32>
    %5 = vector.broadcast %4 : vector<1x128xf32> to vector<2x128xf32>
    %c0_7 = arith.constant 0 : index
    %c0_8 = arith.constant 0 : index
    %6 = vector.load %arg6[%c0_7, %c0_8] : memref<64x128xf32, #tpu.memory_space<vmem>>, vector<64x128xf32>
    %c0_9 = arith.constant 0 : index
    %c0_10 = arith.constant 0 : index
    %7 = vector.load %arg7[%c0_9, %c0_10] : memref<1x128xf32, #tpu.memory_space<vmem>>, vector<1x128xf32>
    %8 = vector.shape_cast %7 : vector<1x128xf32> to vector<1x128xf32>
    %9 = vector.broadcast %8 : vector<1x128xf32> to vector<2x128xf32>
    %c0_11 = arith.constant 0 : index
    %c0_12 = arith.constant 0 : index
    %10 = vector.load %arg8[%c0_11, %c0_12] : memref<160x128xf32, #tpu.memory_space<vmem>>, vector<160x128xf32>
    %c0_13 = arith.constant 0 : index
    %c0_14 = arith.constant 0 : index
    %11 = vector.load %arg10[%c0_13, %c0_14] : memref<64x128xf32, #tpu.memory_space<vmem>>, vector<64x128xf32>
    %c0_15 = arith.constant 0 : index
    %c0_16 = arith.constant 0 : index
    %12 = vector.load %arg9[%c0_15, %c0_16] : memref<1x128xf32, #tpu.memory_space<vmem>>, vector<1x128xf32>
    %13 = vector.shape_cast %12 : vector<1x128xf32> to vector<1x128xf32>
    %14 = vector.broadcast %13 : vector<1x128xf32> to vector<2x128xf32>
    %c0_17 = arith.constant 0 : index
    %c0_18 = arith.constant 0 : index
    %15 = vector.load %arg11[%c0_17, %c0_18] : memref<1x128xf32, #tpu.memory_space<vmem>>, vector<1x128xf32>
    %16 = vector.shape_cast %15 : vector<1x128xf32> to vector<1x128xf32>
    %17 = vector.broadcast %16 : vector<1x128xf32> to vector<2x128xf32>
    %c0_19 = arith.constant 0 : index
    %c0_20 = arith.constant 0 : index
    %18 = vector.load %arg12[%c0_19, %c0_20] : memref<32x128xf32, #tpu.memory_space<vmem>>, vector<32x128xf32>
    %c0_21 = arith.constant 0 : index
    %c0_22 = arith.constant 0 : index
    %19 = vector.load %arg13[%c0_21, %c0_22] : memref<1x128xf32, #tpu.memory_space<vmem>>, vector<1x128xf32>
    %20 = vector.shape_cast %19 : vector<1x128xf32> to vector<1x128xf32>
    %21 = vector.broadcast %20 : vector<1x128xf32> to vector<2x128xf32>
    %c0_23 = arith.constant 0 : index
    %c0_24 = arith.constant 0 : index
    %22 = vector.load %arg14[%c0_23, %c0_24] : memref<128x128xf32, #tpu.memory_space<vmem>>, vector<128x128xf32>
    %c0_25 = arith.constant 0 : index
    %c0_26 = arith.constant 0 : index
    %23 = vector.load %arg15[%c0_25, %c0_26] : memref<1x128xf32, #tpu.memory_space<vmem>>, vector<1x128xf32>
    %24 = vector.shape_cast %23 : vector<1x128xf32> to vector<1x128xf32>
    %25 = vector.broadcast %24 : vector<1x128xf32> to vector<2x128xf32>
    %c0_27 = arith.constant 0 : index
    %c0_28 = arith.constant 0 : index
    %26 = vector.load %arg0[%c0_27, %c0_28] : memref<16x4xf32, #tpu.memory_space<vmem>>, vector<16x4xf32>
    %cst = arith.constant dense<0.000000e+00> : vector<16x128xf32>
    %27 = tpu.matmul %26, %0, %cst {dimension_numbers = #tpu.dot_dimension_numbers<[1], [0], [0], [1], [0, 0, 1, 1], [], []>} : vector<16x4xf32>, vector<4x128xf32>, vector<16x128xf32> -> vector<16x128xf32>
    %28 = vector.broadcast %2 : vector<1x128xf32> to vector<16x128xf32>
    %29 = arith.addf %27, %28 : vector<16x128xf32>
    %cst_29 = arith.constant 0.000000e+00 : f32
    %30 = vector.broadcast %cst_29 : f32 to vector<2x32xf32>
    %cst_30 = arith.constant 0.000000e+00 : f32
    %31 = vector.broadcast %cst_30 : f32 to vector<2x32xf32>
    %32 = vector.extract_strided_slice %29 {offsets = [0, 0], sizes = [2, 128], strides = [1, 1]} : vector<16x128xf32> to vector<2x128xf32>
    %cst_31 = arith.constant dense<0.000000e+00> : vector<2x128xf32>
    %33 = tpu.matmul %30, %1, %cst_31 {dimension_numbers = #tpu.dot_dimension_numbers<[1], [0], [0], [1], [0, 0, 1, 1], [], []>} : vector<2x32xf32>, vector<32x128xf32>, vector<2x128xf32> -> vector<2x128xf32>
    %34 = arith.addf %32, %33 : vector<2x128xf32>
    %35 = arith.addf %34, %5 : vector<2x128xf32>
    %36 = vector.extract_strided_slice %35 {offsets = [0, 0], sizes = [2, 64], strides = [1, 1]} : vector<2x128xf32> to vector<2x64xf32>
    %37 = arith.negf %36 : vector<2x64xf32>
    %38 = math.exp %37 : vector<2x64xf32>
    %cst_32 = arith.constant 1.000000e+00 : f32
    %39 = vector.broadcast %cst_32 : f32 to vector<2x64xf32>
    %40 = arith.addf %39, %38 : vector<2x64xf32>
    %41 = arith.divf %39, %40 : vector<2x64xf32>
    %42 = vector.extract_strided_slice %41 {offsets = [0, 0], sizes = [2, 32], strides = [1, 1]} : vector<2x64xf32> to vector<2x32xf32>
    %43 = vector.extract_strided_slice %41 {offsets = [0, 32], sizes = [2, 32], strides = [1, 1]} : vector<2x64xf32> to vector<2x32xf32>
    %44 = vector.extract_strided_slice %35 {offsets = [0, 64], sizes = [2, 32], strides = [1, 1]} : vector<2x128xf32> to vector<2x32xf32>
    %45 = vector.extract_strided_slice %35 {offsets = [0, 96], sizes = [2, 32], strides = [1, 1]} : vector<2x128xf32> to vector<2x32xf32>
    %46 = arith.mulf %42, %45 : vector<2x32xf32>
    %47 = arith.addf %44, %46 : vector<2x32xf32>
    %48 = math.tanh %47 : vector<2x32xf32>
    %cst_33 = arith.constant 1.000000e+00 : f32
    %49 = vector.broadcast %cst_33 : f32 to vector<2x32xf32>
    %50 = arith.subf %49, %43 : vector<2x32xf32>
    %51 = arith.mulf %50, %48 : vector<2x32xf32>
    %52 = arith.mulf %43, %30 : vector<2x32xf32>
    %53 = arith.addf %51, %52 : vector<2x32xf32>
    %54 = tpu.concatenate %53, %31 in 1 : vector<2x32xf32>, vector<2x32xf32> -> vector<2x64xf32>
    %cst_34 = arith.constant dense<0.000000e+00> : vector<2x128xf32>
    %55 = tpu.matmul %54, %6, %cst_34 {dimension_numbers = #tpu.dot_dimension_numbers<[1], [0], [0], [1], [0, 0, 1, 1], [], []>} : vector<2x64xf32>, vector<64x128xf32>, vector<2x128xf32> -> vector<2x128xf32>
    %56 = arith.addf %55, %9 : vector<2x128xf32>
    %57 = vector.extract_strided_slice %56 {offsets = [0, 0], sizes = [2, 64], strides = [1, 1]} : vector<2x128xf32> to vector<2x64xf32>
    %58 = arith.negf %57 : vector<2x64xf32>
    %59 = math.exp %58 : vector<2x64xf32>
    %cst_35 = arith.constant 1.000000e+00 : f32
    %60 = vector.broadcast %cst_35 : f32 to vector<2x64xf32>
    %61 = arith.addf %60, %59 : vector<2x64xf32>
    %62 = arith.divf %60, %61 : vector<2x64xf32>
    %63 = vector.extract_strided_slice %62 {offsets = [0, 0], sizes = [2, 32], strides = [1, 1]} : vector<2x64xf32> to vector<2x32xf32>
    %64 = vector.extract_strided_slice %62 {offsets = [0, 32], sizes = [2, 32], strides = [1, 1]} : vector<2x64xf32> to vector<2x32xf32>
    %65 = vector.extract_strided_slice %56 {offsets = [0, 64], sizes = [2, 32], strides = [1, 1]} : vector<2x128xf32> to vector<2x32xf32>
    %66 = vector.extract_strided_slice %56 {offsets = [0, 96], sizes = [2, 32], strides = [1, 1]} : vector<2x128xf32> to vector<2x32xf32>
    %67 = arith.mulf %63, %66 : vector<2x32xf32>
    %68 = arith.addf %65, %67 : vector<2x32xf32>
    %69 = math.tanh %68 : vector<2x32xf32>
    %cst_36 = arith.constant 1.000000e+00 : f32
    %70 = vector.broadcast %cst_36 : f32 to vector<2x32xf32>
    %71 = arith.subf %70, %64 : vector<2x32xf32>
    %72 = arith.mulf %71, %69 : vector<2x32xf32>
    %73 = arith.mulf %64, %31 : vector<2x32xf32>
    %74 = arith.addf %72, %73 : vector<2x32xf32>
    %75 = vector.extract_strided_slice %29 {offsets = [2, 0], sizes = [2, 128], strides = [1, 1]} : vector<16x128xf32> to vector<2x128xf32>
    %cst_37 = arith.constant dense<0.000000e+00> : vector<2x128xf32>
    %76 = tpu.matmul %53, %1, %cst_37 {dimension_numbers = #tpu.dot_dimension_numbers<[1], [0], [0], [1], [0, 0, 1, 1], [], []>} : vector<2x32xf32>, vector<32x128xf32>, vector<2x128xf32> -> vector<2x128xf32>
    %77 = arith.addf %75, %76 : vector<2x128xf32>
    %78 = arith.addf %77, %5 : vector<2x128xf32>
    %79 = vector.extract_strided_slice %78 {offsets = [0, 0], sizes = [2, 64], strides = [1, 1]} : vector<2x128xf32> to vector<2x64xf32>
    %80 = arith.negf %79 : vector<2x64xf32>
    %81 = math.exp %80 : vector<2x64xf32>
    %cst_38 = arith.constant 1.000000e+00 : f32
    %82 = vector.broadcast %cst_38 : f32 to vector<2x64xf32>
    %83 = arith.addf %82, %81 : vector<2x64xf32>
    %84 = arith.divf %82, %83 : vector<2x64xf32>
    %85 = vector.extract_strided_slice %84 {offsets = [0, 0], sizes = [2, 32], strides = [1, 1]} : vector<2x64xf32> to vector<2x32xf32>
    %86 = vector.extract_strided_slice %84 {offsets = [0, 32], sizes = [2, 32], strides = [1, 1]} : vector<2x64xf32> to vector<2x32xf32>
    %87 = vector.extract_strided_slice %78 {offsets = [0, 64], sizes = [2, 32], strides = [1, 1]} : vector<2x128xf32> to vector<2x32xf32>
    %88 = vector.extract_strided_slice %78 {offsets = [0, 96], sizes = [2, 32], strides = [1, 1]} : vector<2x128xf32> to vector<2x32xf32>
    %89 = arith.mulf %85, %88 : vector<2x32xf32>
    %90 = arith.addf %87, %89 : vector<2x32xf32>
    %91 = math.tanh %90 : vector<2x32xf32>
    %cst_39 = arith.constant 1.000000e+00 : f32
    %92 = vector.broadcast %cst_39 : f32 to vector<2x32xf32>
    %93 = arith.subf %92, %86 : vector<2x32xf32>
    %94 = arith.mulf %93, %91 : vector<2x32xf32>
    %95 = arith.mulf %86, %53 : vector<2x32xf32>
    %96 = arith.addf %94, %95 : vector<2x32xf32>
    %97 = tpu.concatenate %96, %74 in 1 : vector<2x32xf32>, vector<2x32xf32> -> vector<2x64xf32>
    %cst_40 = arith.constant dense<0.000000e+00> : vector<2x128xf32>
    %98 = tpu.matmul %97, %6, %cst_40 {dimension_numbers = #tpu.dot_dimension_numbers<[1], [0], [0], [1], [0, 0, 1, 1], [], []>} : vector<2x64xf32>, vector<64x128xf32>, vector<2x128xf32> -> vector<2x128xf32>
    %99 = arith.addf %98, %9 : vector<2x128xf32>
    %100 = vector.extract_strided_slice %99 {offsets = [0, 0], sizes = [2, 64], strides = [1, 1]} : vector<2x128xf32> to vector<2x64xf32>
    %101 = arith.negf %100 : vector<2x64xf32>
    %102 = math.exp %101 : vector<2x64xf32>
    %cst_41 = arith.constant 1.000000e+00 : f32
    %103 = vector.broadcast %cst_41 : f32 to vector<2x64xf32>
    %104 = arith.addf %103, %102 : vector<2x64xf32>
    %105 = arith.divf %103, %104 : vector<2x64xf32>
    %106 = vector.extract_strided_slice %105 {offsets = [0, 0], sizes = [2, 32], strides = [1, 1]} : vector<2x64xf32> to vector<2x32xf32>
    %107 = vector.extract_strided_slice %105 {offsets = [0, 32], sizes = [2, 32], strides = [1, 1]} : vector<2x64xf32> to vector<2x32xf32>
    %108 = vector.extract_strided_slice %99 {offsets = [0, 64], sizes = [2, 32], strides = [1, 1]} : vector<2x128xf32> to vector<2x32xf32>
    %109 = vector.extract_strided_slice %99 {offsets = [0, 96], sizes = [2, 32], strides = [1, 1]} : vector<2x128xf32> to vector<2x32xf32>
    %110 = arith.mulf %106, %109 : vector<2x32xf32>
    %111 = arith.addf %108, %110 : vector<2x32xf32>
    %112 = math.tanh %111 : vector<2x32xf32>
    %cst_42 = arith.constant 1.000000e+00 : f32
    %113 = vector.broadcast %cst_42 : f32 to vector<2x32xf32>
    %114 = arith.subf %113, %107 : vector<2x32xf32>
    %115 = arith.mulf %114, %112 : vector<2x32xf32>
    %116 = arith.mulf %107, %74 : vector<2x32xf32>
    %117 = arith.addf %115, %116 : vector<2x32xf32>
    %118 = vector.extract_strided_slice %29 {offsets = [4, 0], sizes = [2, 128], strides = [1, 1]} : vector<16x128xf32> to vector<2x128xf32>
    %cst_43 = arith.constant dense<0.000000e+00> : vector<2x128xf32>
    %119 = tpu.matmul %96, %1, %cst_43 {dimension_numbers = #tpu.dot_dimension_numbers<[1], [0], [0], [1], [0, 0, 1, 1], [], []>} : vector<2x32xf32>, vector<32x128xf32>, vector<2x128xf32> -> vector<2x128xf32>
    %120 = arith.addf %118, %119 : vector<2x128xf32>
    %121 = arith.addf %120, %5 : vector<2x128xf32>
    %122 = vector.extract_strided_slice %121 {offsets = [0, 0], sizes = [2, 64], strides = [1, 1]} : vector<2x128xf32> to vector<2x64xf32>
    %123 = arith.negf %122 : vector<2x64xf32>
    %124 = math.exp %123 : vector<2x64xf32>
    %cst_44 = arith.constant 1.000000e+00 : f32
    %125 = vector.broadcast %cst_44 : f32 to vector<2x64xf32>
    %126 = arith.addf %125, %124 : vector<2x64xf32>
    %127 = arith.divf %125, %126 : vector<2x64xf32>
    %128 = vector.extract_strided_slice %127 {offsets = [0, 0], sizes = [2, 32], strides = [1, 1]} : vector<2x64xf32> to vector<2x32xf32>
    %129 = vector.extract_strided_slice %127 {offsets = [0, 32], sizes = [2, 32], strides = [1, 1]} : vector<2x64xf32> to vector<2x32xf32>
    %130 = vector.extract_strided_slice %121 {offsets = [0, 64], sizes = [2, 32], strides = [1, 1]} : vector<2x128xf32> to vector<2x32xf32>
    %131 = vector.extract_strided_slice %121 {offsets = [0, 96], sizes = [2, 32], strides = [1, 1]} : vector<2x128xf32> to vector<2x32xf32>
    %132 = arith.mulf %128, %131 : vector<2x32xf32>
    %133 = arith.addf %130, %132 : vector<2x32xf32>
    %134 = math.tanh %133 : vector<2x32xf32>
    %cst_45 = arith.constant 1.000000e+00 : f32
    %135 = vector.broadcast %cst_45 : f32 to vector<2x32xf32>
    %136 = arith.subf %135, %129 : vector<2x32xf32>
    %137 = arith.mulf %136, %134 : vector<2x32xf32>
    %138 = arith.mulf %129, %96 : vector<2x32xf32>
    %139 = arith.addf %137, %138 : vector<2x32xf32>
    %140 = tpu.concatenate %139, %117 in 1 : vector<2x32xf32>, vector<2x32xf32> -> vector<2x64xf32>
    %cst_46 = arith.constant dense<0.000000e+00> : vector<2x128xf32>
    %141 = tpu.matmul %140, %6, %cst_46 {dimension_numbers = #tpu.dot_dimension_numbers<[1], [0], [0], [1], [0, 0, 1, 1], [], []>} : vector<2x64xf32>, vector<64x128xf32>, vector<2x128xf32> -> vector<2x128xf32>
    %142 = arith.addf %141, %9 : vector<2x128xf32>
    %143 = vector.extract_strided_slice %142 {offsets = [0, 0], sizes = [2, 64], strides = [1, 1]} : vector<2x128xf32> to vector<2x64xf32>
    %144 = arith.negf %143 : vector<2x64xf32>
    %145 = math.exp %144 : vector<2x64xf32>
    %cst_47 = arith.constant 1.000000e+00 : f32
    %146 = vector.broadcast %cst_47 : f32 to vector<2x64xf32>
    %147 = arith.addf %146, %145 : vector<2x64xf32>
    %148 = arith.divf %146, %147 : vector<2x64xf32>
    %149 = vector.extract_strided_slice %148 {offsets = [0, 0], sizes = [2, 32], strides = [1, 1]} : vector<2x64xf32> to vector<2x32xf32>
    %150 = vector.extract_strided_slice %148 {offsets = [0, 32], sizes = [2, 32], strides = [1, 1]} : vector<2x64xf32> to vector<2x32xf32>
    %151 = vector.extract_strided_slice %142 {offsets = [0, 64], sizes = [2, 32], strides = [1, 1]} : vector<2x128xf32> to vector<2x32xf32>
    %152 = vector.extract_strided_slice %142 {offsets = [0, 96], sizes = [2, 32], strides = [1, 1]} : vector<2x128xf32> to vector<2x32xf32>
    %153 = arith.mulf %149, %152 : vector<2x32xf32>
    %154 = arith.addf %151, %153 : vector<2x32xf32>
    %155 = math.tanh %154 : vector<2x32xf32>
    %cst_48 = arith.constant 1.000000e+00 : f32
    %156 = vector.broadcast %cst_48 : f32 to vector<2x32xf32>
    %157 = arith.subf %156, %150 : vector<2x32xf32>
    %158 = arith.mulf %157, %155 : vector<2x32xf32>
    %159 = arith.mulf %150, %117 : vector<2x32xf32>
    %160 = arith.addf %158, %159 : vector<2x32xf32>
    %161 = vector.extract_strided_slice %29 {offsets = [6, 0], sizes = [2, 128], strides = [1, 1]} : vector<16x128xf32> to vector<2x128xf32>
    %cst_49 = arith.constant dense<0.000000e+00> : vector<2x128xf32>
    %162 = tpu.matmul %139, %1, %cst_49 {dimension_numbers = #tpu.dot_dimension_numbers<[1], [0], [0], [1], [0, 0, 1, 1], [], []>} : vector<2x32xf32>, vector<32x128xf32>, vector<2x128xf32> -> vector<2x128xf32>
    %163 = arith.addf %161, %162 : vector<2x128xf32>
    %164 = arith.addf %163, %5 : vector<2x128xf32>
    %165 = vector.extract_strided_slice %164 {offsets = [0, 0], sizes = [2, 64], strides = [1, 1]} : vector<2x128xf32> to vector<2x64xf32>
    %166 = arith.negf %165 : vector<2x64xf32>
    %167 = math.exp %166 : vector<2x64xf32>
    %cst_50 = arith.constant 1.000000e+00 : f32
    %168 = vector.broadcast %cst_50 : f32 to vector<2x64xf32>
    %169 = arith.addf %168, %167 : vector<2x64xf32>
    %170 = arith.divf %168, %169 : vector<2x64xf32>
    %171 = vector.extract_strided_slice %170 {offsets = [0, 0], sizes = [2, 32], strides = [1, 1]} : vector<2x64xf32> to vector<2x32xf32>
    %172 = vector.extract_strided_slice %170 {offsets = [0, 32], sizes = [2, 32], strides = [1, 1]} : vector<2x64xf32> to vector<2x32xf32>
    %173 = vector.extract_strided_slice %164 {offsets = [0, 64], sizes = [2, 32], strides = [1, 1]} : vector<2x128xf32> to vector<2x32xf32>
    %174 = vector.extract_strided_slice %164 {offsets = [0, 96], sizes = [2, 32], strides = [1, 1]} : vector<2x128xf32> to vector<2x32xf32>
    %175 = arith.mulf %171, %174 : vector<2x32xf32>
    %176 = arith.addf %173, %175 : vector<2x32xf32>
    %177 = math.tanh %176 : vector<2x32xf32>
    %cst_51 = arith.constant 1.000000e+00 : f32
    %178 = vector.broadcast %cst_51 : f32 to vector<2x32xf32>
    %179 = arith.subf %178, %172 : vector<2x32xf32>
    %180 = arith.mulf %179, %177 : vector<2x32xf32>
    %181 = arith.mulf %172, %139 : vector<2x32xf32>
    %182 = arith.addf %180, %181 : vector<2x32xf32>
    %183 = tpu.concatenate %182, %160 in 1 : vector<2x32xf32>, vector<2x32xf32> -> vector<2x64xf32>
    %cst_52 = arith.constant dense<0.000000e+00> : vector<2x128xf32>
    %184 = tpu.matmul %183, %6, %cst_52 {dimension_numbers = #tpu.dot_dimension_numbers<[1], [0], [0], [1], [0, 0, 1, 1], [], []>} : vector<2x64xf32>, vector<64x128xf32>, vector<2x128xf32> -> vector<2x128xf32>
    %185 = arith.addf %184, %9 : vector<2x128xf32>
    %186 = vector.extract_strided_slice %185 {offsets = [0, 0], sizes = [2, 64], strides = [1, 1]} : vector<2x128xf32> to vector<2x64xf32>
    %187 = arith.negf %186 : vector<2x64xf32>
    %188 = math.exp %187 : vector<2x64xf32>
    %cst_53 = arith.constant 1.000000e+00 : f32
    %189 = vector.broadcast %cst_53 : f32 to vector<2x64xf32>
    %190 = arith.addf %189, %188 : vector<2x64xf32>
    %191 = arith.divf %189, %190 : vector<2x64xf32>
    %192 = vector.extract_strided_slice %191 {offsets = [0, 0], sizes = [2, 32], strides = [1, 1]} : vector<2x64xf32> to vector<2x32xf32>
    %193 = vector.extract_strided_slice %191 {offsets = [0, 32], sizes = [2, 32], strides = [1, 1]} : vector<2x64xf32> to vector<2x32xf32>
    %194 = vector.extract_strided_slice %185 {offsets = [0, 64], sizes = [2, 32], strides = [1, 1]} : vector<2x128xf32> to vector<2x32xf32>
    %195 = vector.extract_strided_slice %185 {offsets = [0, 96], sizes = [2, 32], strides = [1, 1]} : vector<2x128xf32> to vector<2x32xf32>
    %196 = arith.mulf %192, %195 : vector<2x32xf32>
    %197 = arith.addf %194, %196 : vector<2x32xf32>
    %198 = math.tanh %197 : vector<2x32xf32>
    %cst_54 = arith.constant 1.000000e+00 : f32
    %199 = vector.broadcast %cst_54 : f32 to vector<2x32xf32>
    %200 = arith.subf %199, %193 : vector<2x32xf32>
    %201 = arith.mulf %200, %198 : vector<2x32xf32>
    %202 = arith.mulf %193, %160 : vector<2x32xf32>
    %203 = arith.addf %201, %202 : vector<2x32xf32>
    %204 = vector.extract_strided_slice %29 {offsets = [8, 0], sizes = [2, 128], strides = [1, 1]} : vector<16x128xf32> to vector<2x128xf32>
    %cst_55 = arith.constant dense<0.000000e+00> : vector<2x128xf32>
    %205 = tpu.matmul %182, %1, %cst_55 {dimension_numbers = #tpu.dot_dimension_numbers<[1], [0], [0], [1], [0, 0, 1, 1], [], []>} : vector<2x32xf32>, vector<32x128xf32>, vector<2x128xf32> -> vector<2x128xf32>
    %206 = arith.addf %204, %205 : vector<2x128xf32>
    %207 = arith.addf %206, %5 : vector<2x128xf32>
    %208 = vector.extract_strided_slice %207 {offsets = [0, 0], sizes = [2, 64], strides = [1, 1]} : vector<2x128xf32> to vector<2x64xf32>
    %209 = arith.negf %208 : vector<2x64xf32>
    %210 = math.exp %209 : vector<2x64xf32>
    %cst_56 = arith.constant 1.000000e+00 : f32
    %211 = vector.broadcast %cst_56 : f32 to vector<2x64xf32>
    %212 = arith.addf %211, %210 : vector<2x64xf32>
    %213 = arith.divf %211, %212 : vector<2x64xf32>
    %214 = vector.extract_strided_slice %213 {offsets = [0, 0], sizes = [2, 32], strides = [1, 1]} : vector<2x64xf32> to vector<2x32xf32>
    %215 = vector.extract_strided_slice %213 {offsets = [0, 32], sizes = [2, 32], strides = [1, 1]} : vector<2x64xf32> to vector<2x32xf32>
    %216 = vector.extract_strided_slice %207 {offsets = [0, 64], sizes = [2, 32], strides = [1, 1]} : vector<2x128xf32> to vector<2x32xf32>
    %217 = vector.extract_strided_slice %207 {offsets = [0, 96], sizes = [2, 32], strides = [1, 1]} : vector<2x128xf32> to vector<2x32xf32>
    %218 = arith.mulf %214, %217 : vector<2x32xf32>
    %219 = arith.addf %216, %218 : vector<2x32xf32>
    %220 = math.tanh %219 : vector<2x32xf32>
    %cst_57 = arith.constant 1.000000e+00 : f32
    %221 = vector.broadcast %cst_57 : f32 to vector<2x32xf32>
    %222 = arith.subf %221, %215 : vector<2x32xf32>
    %223 = arith.mulf %222, %220 : vector<2x32xf32>
    %224 = arith.mulf %215, %182 : vector<2x32xf32>
    %225 = arith.addf %223, %224 : vector<2x32xf32>
    %226 = tpu.concatenate %225, %203 in 1 : vector<2x32xf32>, vector<2x32xf32> -> vector<2x64xf32>
    %cst_58 = arith.constant dense<0.000000e+00> : vector<2x128xf32>
    %227 = tpu.matmul %226, %6, %cst_58 {dimension_numbers = #tpu.dot_dimension_numbers<[1], [0], [0], [1], [0, 0, 1, 1], [], []>} : vector<2x64xf32>, vector<64x128xf32>, vector<2x128xf32> -> vector<2x128xf32>
    %228 = arith.addf %227, %9 : vector<2x128xf32>
    %229 = vector.extract_strided_slice %228 {offsets = [0, 0], sizes = [2, 64], strides = [1, 1]} : vector<2x128xf32> to vector<2x64xf32>
    %230 = arith.negf %229 : vector<2x64xf32>
    %231 = math.exp %230 : vector<2x64xf32>
    %cst_59 = arith.constant 1.000000e+00 : f32
    %232 = vector.broadcast %cst_59 : f32 to vector<2x64xf32>
    %233 = arith.addf %232, %231 : vector<2x64xf32>
    %234 = arith.divf %232, %233 : vector<2x64xf32>
    %235 = vector.extract_strided_slice %234 {offsets = [0, 0], sizes = [2, 32], strides = [1, 1]} : vector<2x64xf32> to vector<2x32xf32>
    %236 = vector.extract_strided_slice %234 {offsets = [0, 32], sizes = [2, 32], strides = [1, 1]} : vector<2x64xf32> to vector<2x32xf32>
    %237 = vector.extract_strided_slice %228 {offsets = [0, 64], sizes = [2, 32], strides = [1, 1]} : vector<2x128xf32> to vector<2x32xf32>
    %238 = vector.extract_strided_slice %228 {offsets = [0, 96], sizes = [2, 32], strides = [1, 1]} : vector<2x128xf32> to vector<2x32xf32>
    %239 = arith.mulf %235, %238 : vector<2x32xf32>
    %240 = arith.addf %237, %239 : vector<2x32xf32>
    %241 = math.tanh %240 : vector<2x32xf32>
    %cst_60 = arith.constant 1.000000e+00 : f32
    %242 = vector.broadcast %cst_60 : f32 to vector<2x32xf32>
    %243 = arith.subf %242, %236 : vector<2x32xf32>
    %244 = arith.mulf %243, %241 : vector<2x32xf32>
    %245 = arith.mulf %236, %203 : vector<2x32xf32>
    %246 = arith.addf %244, %245 : vector<2x32xf32>
    %247 = vector.extract_strided_slice %29 {offsets = [10, 0], sizes = [2, 128], strides = [1, 1]} : vector<16x128xf32> to vector<2x128xf32>
    %cst_61 = arith.constant dense<0.000000e+00> : vector<2x128xf32>
    %248 = tpu.matmul %225, %1, %cst_61 {dimension_numbers = #tpu.dot_dimension_numbers<[1], [0], [0], [1], [0, 0, 1, 1], [], []>} : vector<2x32xf32>, vector<32x128xf32>, vector<2x128xf32> -> vector<2x128xf32>
    %249 = arith.addf %247, %248 : vector<2x128xf32>
    %250 = arith.addf %249, %5 : vector<2x128xf32>
    %251 = vector.extract_strided_slice %250 {offsets = [0, 0], sizes = [2, 64], strides = [1, 1]} : vector<2x128xf32> to vector<2x64xf32>
    %252 = arith.negf %251 : vector<2x64xf32>
    %253 = math.exp %252 : vector<2x64xf32>
    %cst_62 = arith.constant 1.000000e+00 : f32
    %254 = vector.broadcast %cst_62 : f32 to vector<2x64xf32>
    %255 = arith.addf %254, %253 : vector<2x64xf32>
    %256 = arith.divf %254, %255 : vector<2x64xf32>
    %257 = vector.extract_strided_slice %256 {offsets = [0, 0], sizes = [2, 32], strides = [1, 1]} : vector<2x64xf32> to vector<2x32xf32>
    %258 = vector.extract_strided_slice %256 {offsets = [0, 32], sizes = [2, 32], strides = [1, 1]} : vector<2x64xf32> to vector<2x32xf32>
    %259 = vector.extract_strided_slice %250 {offsets = [0, 64], sizes = [2, 32], strides = [1, 1]} : vector<2x128xf32> to vector<2x32xf32>
    %260 = vector.extract_strided_slice %250 {offsets = [0, 96], sizes = [2, 32], strides = [1, 1]} : vector<2x128xf32> to vector<2x32xf32>
    %261 = arith.mulf %257, %260 : vector<2x32xf32>
    %262 = arith.addf %259, %261 : vector<2x32xf32>
    %263 = math.tanh %262 : vector<2x32xf32>
    %cst_63 = arith.constant 1.000000e+00 : f32
    %264 = vector.broadcast %cst_63 : f32 to vector<2x32xf32>
    %265 = arith.subf %264, %258 : vector<2x32xf32>
    %266 = arith.mulf %265, %263 : vector<2x32xf32>
    %267 = arith.mulf %258, %225 : vector<2x32xf32>
    %268 = arith.addf %266, %267 : vector<2x32xf32>
    %269 = tpu.concatenate %268, %246 in 1 : vector<2x32xf32>, vector<2x32xf32> -> vector<2x64xf32>
    %cst_64 = arith.constant dense<0.000000e+00> : vector<2x128xf32>
    %270 = tpu.matmul %269, %6, %cst_64 {dimension_numbers = #tpu.dot_dimension_numbers<[1], [0], [0], [1], [0, 0, 1, 1], [], []>} : vector<2x64xf32>, vector<64x128xf32>, vector<2x128xf32> -> vector<2x128xf32>
    %271 = arith.addf %270, %9 : vector<2x128xf32>
    %272 = vector.extract_strided_slice %271 {offsets = [0, 0], sizes = [2, 64], strides = [1, 1]} : vector<2x128xf32> to vector<2x64xf32>
    %273 = arith.negf %272 : vector<2x64xf32>
    %274 = math.exp %273 : vector<2x64xf32>
    %cst_65 = arith.constant 1.000000e+00 : f32
    %275 = vector.broadcast %cst_65 : f32 to vector<2x64xf32>
    %276 = arith.addf %275, %274 : vector<2x64xf32>
    %277 = arith.divf %275, %276 : vector<2x64xf32>
    %278 = vector.extract_strided_slice %277 {offsets = [0, 0], sizes = [2, 32], strides = [1, 1]} : vector<2x64xf32> to vector<2x32xf32>
    %279 = vector.extract_strided_slice %277 {offsets = [0, 32], sizes = [2, 32], strides = [1, 1]} : vector<2x64xf32> to vector<2x32xf32>
    %280 = vector.extract_strided_slice %271 {offsets = [0, 64], sizes = [2, 32], strides = [1, 1]} : vector<2x128xf32> to vector<2x32xf32>
    %281 = vector.extract_strided_slice %271 {offsets = [0, 96], sizes = [2, 32], strides = [1, 1]} : vector<2x128xf32> to vector<2x32xf32>
    %282 = arith.mulf %278, %281 : vector<2x32xf32>
    %283 = arith.addf %280, %282 : vector<2x32xf32>
    %284 = math.tanh %283 : vector<2x32xf32>
    %cst_66 = arith.constant 1.000000e+00 : f32
    %285 = vector.broadcast %cst_66 : f32 to vector<2x32xf32>
    %286 = arith.subf %285, %279 : vector<2x32xf32>
    %287 = arith.mulf %286, %284 : vector<2x32xf32>
    %288 = arith.mulf %279, %246 : vector<2x32xf32>
    %289 = arith.addf %287, %288 : vector<2x32xf32>
    %290 = vector.extract_strided_slice %29 {offsets = [12, 0], sizes = [2, 128], strides = [1, 1]} : vector<16x128xf32> to vector<2x128xf32>
    %cst_67 = arith.constant dense<0.000000e+00> : vector<2x128xf32>
    %291 = tpu.matmul %268, %1, %cst_67 {dimension_numbers = #tpu.dot_dimension_numbers<[1], [0], [0], [1], [0, 0, 1, 1], [], []>} : vector<2x32xf32>, vector<32x128xf32>, vector<2x128xf32> -> vector<2x128xf32>
    %292 = arith.addf %290, %291 : vector<2x128xf32>
    %293 = arith.addf %292, %5 : vector<2x128xf32>
    %294 = vector.extract_strided_slice %293 {offsets = [0, 0], sizes = [2, 64], strides = [1, 1]} : vector<2x128xf32> to vector<2x64xf32>
    %295 = arith.negf %294 : vector<2x64xf32>
    %296 = math.exp %295 : vector<2x64xf32>
    %cst_68 = arith.constant 1.000000e+00 : f32
    %297 = vector.broadcast %cst_68 : f32 to vector<2x64xf32>
    %298 = arith.addf %297, %296 : vector<2x64xf32>
    %299 = arith.divf %297, %298 : vector<2x64xf32>
    %300 = vector.extract_strided_slice %299 {offsets = [0, 0], sizes = [2, 32], strides = [1, 1]} : vector<2x64xf32> to vector<2x32xf32>
    %301 = vector.extract_strided_slice %299 {offsets = [0, 32], sizes = [2, 32], strides = [1, 1]} : vector<2x64xf32> to vector<2x32xf32>
    %302 = vector.extract_strided_slice %293 {offsets = [0, 64], sizes = [2, 32], strides = [1, 1]} : vector<2x128xf32> to vector<2x32xf32>
    %303 = vector.extract_strided_slice %293 {offsets = [0, 96], sizes = [2, 32], strides = [1, 1]} : vector<2x128xf32> to vector<2x32xf32>
    %304 = arith.mulf %300, %303 : vector<2x32xf32>
    %305 = arith.addf %302, %304 : vector<2x32xf32>
    %306 = math.tanh %305 : vector<2x32xf32>
    %cst_69 = arith.constant 1.000000e+00 : f32
    %307 = vector.broadcast %cst_69 : f32 to vector<2x32xf32>
    %308 = arith.subf %307, %301 : vector<2x32xf32>
    %309 = arith.mulf %308, %306 : vector<2x32xf32>
    %310 = arith.mulf %301, %268 : vector<2x32xf32>
    %311 = arith.addf %309, %310 : vector<2x32xf32>
    %312 = tpu.concatenate %311, %289 in 1 : vector<2x32xf32>, vector<2x32xf32> -> vector<2x64xf32>
    %cst_70 = arith.constant dense<0.000000e+00> : vector<2x128xf32>
    %313 = tpu.matmul %312, %6, %cst_70 {dimension_numbers = #tpu.dot_dimension_numbers<[1], [0], [0], [1], [0, 0, 1, 1], [], []>} : vector<2x64xf32>, vector<64x128xf32>, vector<2x128xf32> -> vector<2x128xf32>
    %314 = arith.addf %313, %9 : vector<2x128xf32>
    %315 = vector.extract_strided_slice %314 {offsets = [0, 0], sizes = [2, 64], strides = [1, 1]} : vector<2x128xf32> to vector<2x64xf32>
    %316 = arith.negf %315 : vector<2x64xf32>
    %317 = math.exp %316 : vector<2x64xf32>
    %cst_71 = arith.constant 1.000000e+00 : f32
    %318 = vector.broadcast %cst_71 : f32 to vector<2x64xf32>
    %319 = arith.addf %318, %317 : vector<2x64xf32>
    %320 = arith.divf %318, %319 : vector<2x64xf32>
    %321 = vector.extract_strided_slice %320 {offsets = [0, 0], sizes = [2, 32], strides = [1, 1]} : vector<2x64xf32> to vector<2x32xf32>
    %322 = vector.extract_strided_slice %320 {offsets = [0, 32], sizes = [2, 32], strides = [1, 1]} : vector<2x64xf32> to vector<2x32xf32>
    %323 = vector.extract_strided_slice %314 {offsets = [0, 64], sizes = [2, 32], strides = [1, 1]} : vector<2x128xf32> to vector<2x32xf32>
    %324 = vector.extract_strided_slice %314 {offsets = [0, 96], sizes = [2, 32], strides = [1, 1]} : vector<2x128xf32> to vector<2x32xf32>
    %325 = arith.mulf %321, %324 : vector<2x32xf32>
    %326 = arith.addf %323, %325 : vector<2x32xf32>
    %327 = math.tanh %326 : vector<2x32xf32>
    %cst_72 = arith.constant 1.000000e+00 : f32
    %328 = vector.broadcast %cst_72 : f32 to vector<2x32xf32>
    %329 = arith.subf %328, %322 : vector<2x32xf32>
    %330 = arith.mulf %329, %327 : vector<2x32xf32>
    %331 = arith.mulf %322, %289 : vector<2x32xf32>
    %332 = arith.addf %330, %331 : vector<2x32xf32>
    %333 = vector.extract_strided_slice %29 {offsets = [14, 0], sizes = [2, 128], strides = [1, 1]} : vector<16x128xf32> to vector<2x128xf32>
    %cst_73 = arith.constant dense<0.000000e+00> : vector<2x128xf32>
    %334 = tpu.matmul %311, %1, %cst_73 {dimension_numbers = #tpu.dot_dimension_numbers<[1], [0], [0], [1], [0, 0, 1, 1], [], []>} : vector<2x32xf32>, vector<32x128xf32>, vector<2x128xf32> -> vector<2x128xf32>
    %335 = arith.addf %333, %334 : vector<2x128xf32>
    %336 = arith.addf %335, %5 : vector<2x128xf32>
    %337 = vector.extract_strided_slice %336 {offsets = [0, 0], sizes = [2, 64], strides = [1, 1]} : vector<2x128xf32> to vector<2x64xf32>
    %338 = arith.negf %337 : vector<2x64xf32>
    %339 = math.exp %338 : vector<2x64xf32>
    %cst_74 = arith.constant 1.000000e+00 : f32
    %340 = vector.broadcast %cst_74 : f32 to vector<2x64xf32>
    %341 = arith.addf %340, %339 : vector<2x64xf32>
    %342 = arith.divf %340, %341 : vector<2x64xf32>
    %343 = vector.extract_strided_slice %342 {offsets = [0, 0], sizes = [2, 32], strides = [1, 1]} : vector<2x64xf32> to vector<2x32xf32>
    %344 = vector.extract_strided_slice %342 {offsets = [0, 32], sizes = [2, 32], strides = [1, 1]} : vector<2x64xf32> to vector<2x32xf32>
    %345 = vector.extract_strided_slice %336 {offsets = [0, 64], sizes = [2, 32], strides = [1, 1]} : vector<2x128xf32> to vector<2x32xf32>
    %346 = vector.extract_strided_slice %336 {offsets = [0, 96], sizes = [2, 32], strides = [1, 1]} : vector<2x128xf32> to vector<2x32xf32>
    %347 = arith.mulf %343, %346 : vector<2x32xf32>
    %348 = arith.addf %345, %347 : vector<2x32xf32>
    %349 = math.tanh %348 : vector<2x32xf32>
    %cst_75 = arith.constant 1.000000e+00 : f32
    %350 = vector.broadcast %cst_75 : f32 to vector<2x32xf32>
    %351 = arith.subf %350, %344 : vector<2x32xf32>
    %352 = arith.mulf %351, %349 : vector<2x32xf32>
    %353 = arith.mulf %344, %311 : vector<2x32xf32>
    %354 = arith.addf %352, %353 : vector<2x32xf32>
    %355 = tpu.concatenate %354, %332 in 1 : vector<2x32xf32>, vector<2x32xf32> -> vector<2x64xf32>
    %cst_76 = arith.constant dense<0.000000e+00> : vector<2x128xf32>
    %356 = tpu.matmul %355, %6, %cst_76 {dimension_numbers = #tpu.dot_dimension_numbers<[1], [0], [0], [1], [0, 0, 1, 1], [], []>} : vector<2x64xf32>, vector<64x128xf32>, vector<2x128xf32> -> vector<2x128xf32>
    %357 = arith.addf %356, %9 : vector<2x128xf32>
    %358 = vector.extract_strided_slice %357 {offsets = [0, 0], sizes = [2, 64], strides = [1, 1]} : vector<2x128xf32> to vector<2x64xf32>
    %359 = arith.negf %358 : vector<2x64xf32>
    %360 = math.exp %359 : vector<2x64xf32>
    %cst_77 = arith.constant 1.000000e+00 : f32
    %361 = vector.broadcast %cst_77 : f32 to vector<2x64xf32>
    %362 = arith.addf %361, %360 : vector<2x64xf32>
    %363 = arith.divf %361, %362 : vector<2x64xf32>
    %364 = vector.extract_strided_slice %363 {offsets = [0, 0], sizes = [2, 32], strides = [1, 1]} : vector<2x64xf32> to vector<2x32xf32>
    %365 = vector.extract_strided_slice %363 {offsets = [0, 32], sizes = [2, 32], strides = [1, 1]} : vector<2x64xf32> to vector<2x32xf32>
    %366 = vector.extract_strided_slice %357 {offsets = [0, 64], sizes = [2, 32], strides = [1, 1]} : vector<2x128xf32> to vector<2x32xf32>
    %367 = vector.extract_strided_slice %357 {offsets = [0, 96], sizes = [2, 32], strides = [1, 1]} : vector<2x128xf32> to vector<2x32xf32>
    %368 = arith.mulf %364, %367 : vector<2x32xf32>
    %369 = arith.addf %366, %368 : vector<2x32xf32>
    %370 = math.tanh %369 : vector<2x32xf32>
    %cst_78 = arith.constant 1.000000e+00 : f32
    %371 = vector.broadcast %cst_78 : f32 to vector<2x32xf32>
    %372 = arith.subf %371, %365 : vector<2x32xf32>
    %373 = arith.mulf %372, %370 : vector<2x32xf32>
    %374 = arith.mulf %365, %332 : vector<2x32xf32>
    %375 = arith.addf %373, %374 : vector<2x32xf32>
    %c0_79 = arith.constant 0 : index
    %c0_80 = arith.constant 0 : index
    %376 = vector.load %arg1[%c0_79, %c0_80] : memref<2x128xf32, #tpu.memory_space<vmem>>, vector<2x128xf32>
    %377 = tpu.concatenate %376, %354 in 1 : vector<2x128xf32>, vector<2x32xf32> -> vector<2x160xf32>
    %cst_81 = arith.constant dense<0.000000e+00> : vector<2x128xf32>
    %378 = tpu.matmul %377, %10, %cst_81 {dimension_numbers = #tpu.dot_dimension_numbers<[1], [0], [0], [1], [0, 0, 1, 1], [], []>} : vector<2x160xf32>, vector<160x128xf32>, vector<2x128xf32> -> vector<2x128xf32>
    %379 = arith.addf %378, %14 : vector<2x128xf32>
    %380 = vector.extract_strided_slice %379 {offsets = [0, 0], sizes = [2, 64], strides = [1, 1]} : vector<2x128xf32> to vector<2x64xf32>
    %381 = arith.negf %380 : vector<2x64xf32>
    %382 = math.exp %381 : vector<2x64xf32>
    %cst_82 = arith.constant 1.000000e+00 : f32
    %383 = vector.broadcast %cst_82 : f32 to vector<2x64xf32>
    %384 = arith.addf %383, %382 : vector<2x64xf32>
    %385 = arith.divf %383, %384 : vector<2x64xf32>
    %386 = vector.extract_strided_slice %385 {offsets = [0, 0], sizes = [2, 32], strides = [1, 1]} : vector<2x64xf32> to vector<2x32xf32>
    %387 = vector.extract_strided_slice %385 {offsets = [0, 32], sizes = [2, 32], strides = [1, 1]} : vector<2x64xf32> to vector<2x32xf32>
    %388 = vector.extract_strided_slice %379 {offsets = [0, 64], sizes = [2, 32], strides = [1, 1]} : vector<2x128xf32> to vector<2x32xf32>
    %389 = vector.extract_strided_slice %379 {offsets = [0, 96], sizes = [2, 32], strides = [1, 1]} : vector<2x128xf32> to vector<2x32xf32>
    %390 = arith.mulf %386, %389 : vector<2x32xf32>
    %391 = arith.addf %388, %390 : vector<2x32xf32>
    %392 = math.tanh %391 : vector<2x32xf32>
    %cst_83 = arith.constant 1.000000e+00 : f32
    %393 = vector.broadcast %cst_83 : f32 to vector<2x32xf32>
    %394 = arith.subf %393, %387 : vector<2x32xf32>
    %395 = arith.mulf %394, %392 : vector<2x32xf32>
    %396 = arith.mulf %387, %354 : vector<2x32xf32>
    %397 = arith.addf %395, %396 : vector<2x32xf32>
    %398 = tpu.concatenate %397, %375 in 1 : vector<2x32xf32>, vector<2x32xf32> -> vector<2x64xf32>
    %cst_84 = arith.constant dense<0.000000e+00> : vector<2x128xf32>
    %399 = tpu.matmul %398, %11, %cst_84 {dimension_numbers = #tpu.dot_dimension_numbers<[1], [0], [0], [1], [0, 0, 1, 1], [], []>} : vector<2x64xf32>, vector<64x128xf32>, vector<2x128xf32> -> vector<2x128xf32>
    %400 = arith.addf %399, %17 : vector<2x128xf32>
    %401 = vector.extract_strided_slice %400 {offsets = [0, 0], sizes = [2, 64], strides = [1, 1]} : vector<2x128xf32> to vector<2x64xf32>
    %402 = arith.negf %401 : vector<2x64xf32>
    %403 = math.exp %402 : vector<2x64xf32>
    %cst_85 = arith.constant 1.000000e+00 : f32
    %404 = vector.broadcast %cst_85 : f32 to vector<2x64xf32>
    %405 = arith.addf %404, %403 : vector<2x64xf32>
    %406 = arith.divf %404, %405 : vector<2x64xf32>
    %407 = vector.extract_strided_slice %406 {offsets = [0, 0], sizes = [2, 32], strides = [1, 1]} : vector<2x64xf32> to vector<2x32xf32>
    %408 = vector.extract_strided_slice %406 {offsets = [0, 32], sizes = [2, 32], strides = [1, 1]} : vector<2x64xf32> to vector<2x32xf32>
    %409 = vector.extract_strided_slice %400 {offsets = [0, 64], sizes = [2, 32], strides = [1, 1]} : vector<2x128xf32> to vector<2x32xf32>
    %410 = vector.extract_strided_slice %400 {offsets = [0, 96], sizes = [2, 32], strides = [1, 1]} : vector<2x128xf32> to vector<2x32xf32>
    %411 = arith.mulf %407, %410 : vector<2x32xf32>
    %412 = arith.addf %409, %411 : vector<2x32xf32>
    %413 = math.tanh %412 : vector<2x32xf32>
    %cst_86 = arith.constant 1.000000e+00 : f32
    %414 = vector.broadcast %cst_86 : f32 to vector<2x32xf32>
    %415 = arith.subf %414, %408 : vector<2x32xf32>
    %416 = arith.mulf %415, %413 : vector<2x32xf32>
    %417 = arith.mulf %408, %375 : vector<2x32xf32>
    %418 = arith.addf %416, %417 : vector<2x32xf32>
    %cst_87 = arith.constant dense<0.000000e+00> : vector<2x128xf32>
    %419 = tpu.matmul %418, %18, %cst_87 {dimension_numbers = #tpu.dot_dimension_numbers<[1], [0], [0], [1], [0, 0, 1, 1], [], []>} : vector<2x32xf32>, vector<32x128xf32>, vector<2x128xf32> -> vector<2x128xf32>
    %420 = arith.addf %419, %21 : vector<2x128xf32>
    %cst_88 = arith.constant 0.000000e+00 : f32
    %421 = vector.broadcast %cst_88 : f32 to vector<2x128xf32>
    %422 = arith.maximumf %420, %421 : vector<2x128xf32>
    %cst_89 = arith.constant dense<0.000000e+00> : vector<2x128xf32>
    %423 = tpu.matmul %422, %22, %cst_89 {dimension_numbers = #tpu.dot_dimension_numbers<[1], [0], [0], [1], [0, 0, 1, 1], [], []>} : vector<2x128xf32>, vector<128x128xf32>, vector<2x128xf32> -> vector<2x128xf32>
    %424 = arith.addf %423, %25 : vector<2x128xf32>
    %425 = tpu.concatenate %424, %397 in 1 : vector<2x128xf32>, vector<2x32xf32> -> vector<2x160xf32>
    %cst_90 = arith.constant dense<0.000000e+00> : vector<2x128xf32>
    %426 = tpu.matmul %425, %10, %cst_90 {dimension_numbers = #tpu.dot_dimension_numbers<[1], [0], [0], [1], [0, 0, 1, 1], [], []>} : vector<2x160xf32>, vector<160x128xf32>, vector<2x128xf32> -> vector<2x128xf32>
    %427 = arith.addf %426, %14 : vector<2x128xf32>
    %428 = vector.extract_strided_slice %427 {offsets = [0, 0], sizes = [2, 64], strides = [1, 1]} : vector<2x128xf32> to vector<2x64xf32>
    %429 = arith.negf %428 : vector<2x64xf32>
    %430 = math.exp %429 : vector<2x64xf32>
    %cst_91 = arith.constant 1.000000e+00 : f32
    %431 = vector.broadcast %cst_91 : f32 to vector<2x64xf32>
    %432 = arith.addf %431, %430 : vector<2x64xf32>
    %433 = arith.divf %431, %432 : vector<2x64xf32>
    %434 = vector.extract_strided_slice %433 {offsets = [0, 0], sizes = [2, 32], strides = [1, 1]} : vector<2x64xf32> to vector<2x32xf32>
    %435 = vector.extract_strided_slice %433 {offsets = [0, 32], sizes = [2, 32], strides = [1, 1]} : vector<2x64xf32> to vector<2x32xf32>
    %436 = vector.extract_strided_slice %427 {offsets = [0, 64], sizes = [2, 32], strides = [1, 1]} : vector<2x128xf32> to vector<2x32xf32>
    %437 = vector.extract_strided_slice %427 {offsets = [0, 96], sizes = [2, 32], strides = [1, 1]} : vector<2x128xf32> to vector<2x32xf32>
    %438 = arith.mulf %434, %437 : vector<2x32xf32>
    %439 = arith.addf %436, %438 : vector<2x32xf32>
    %440 = math.tanh %439 : vector<2x32xf32>
    %cst_92 = arith.constant 1.000000e+00 : f32
    %441 = vector.broadcast %cst_92 : f32 to vector<2x32xf32>
    %442 = arith.subf %441, %435 : vector<2x32xf32>
    %443 = arith.mulf %442, %440 : vector<2x32xf32>
    %444 = arith.mulf %435, %397 : vector<2x32xf32>
    %445 = arith.addf %443, %444 : vector<2x32xf32>
    %446 = tpu.concatenate %445, %418 in 1 : vector<2x32xf32>, vector<2x32xf32> -> vector<2x64xf32>
    %cst_93 = arith.constant dense<0.000000e+00> : vector<2x128xf32>
    %447 = tpu.matmul %446, %11, %cst_93 {dimension_numbers = #tpu.dot_dimension_numbers<[1], [0], [0], [1], [0, 0, 1, 1], [], []>} : vector<2x64xf32>, vector<64x128xf32>, vector<2x128xf32> -> vector<2x128xf32>
    %448 = arith.addf %447, %17 : vector<2x128xf32>
    %449 = vector.extract_strided_slice %448 {offsets = [0, 0], sizes = [2, 64], strides = [1, 1]} : vector<2x128xf32> to vector<2x64xf32>
    %450 = arith.negf %449 : vector<2x64xf32>
    %451 = math.exp %450 : vector<2x64xf32>
    %cst_94 = arith.constant 1.000000e+00 : f32
    %452 = vector.broadcast %cst_94 : f32 to vector<2x64xf32>
    %453 = arith.addf %452, %451 : vector<2x64xf32>
    %454 = arith.divf %452, %453 : vector<2x64xf32>
    %455 = vector.extract_strided_slice %454 {offsets = [0, 0], sizes = [2, 32], strides = [1, 1]} : vector<2x64xf32> to vector<2x32xf32>
    %456 = vector.extract_strided_slice %454 {offsets = [0, 32], sizes = [2, 32], strides = [1, 1]} : vector<2x64xf32> to vector<2x32xf32>
    %457 = vector.extract_strided_slice %448 {offsets = [0, 64], sizes = [2, 32], strides = [1, 1]} : vector<2x128xf32> to vector<2x32xf32>
    %458 = vector.extract_strided_slice %448 {offsets = [0, 96], sizes = [2, 32], strides = [1, 1]} : vector<2x128xf32> to vector<2x32xf32>
    %459 = arith.mulf %455, %458 : vector<2x32xf32>
    %460 = arith.addf %457, %459 : vector<2x32xf32>
    %461 = math.tanh %460 : vector<2x32xf32>
    %cst_95 = arith.constant 1.000000e+00 : f32
    %462 = vector.broadcast %cst_95 : f32 to vector<2x32xf32>
    %463 = arith.subf %462, %456 : vector<2x32xf32>
    %464 = arith.mulf %463, %461 : vector<2x32xf32>
    %465 = arith.mulf %456, %418 : vector<2x32xf32>
    %466 = arith.addf %464, %465 : vector<2x32xf32>
    %cst_96 = arith.constant dense<0.000000e+00> : vector<2x128xf32>
    %467 = tpu.matmul %466, %18, %cst_96 {dimension_numbers = #tpu.dot_dimension_numbers<[1], [0], [0], [1], [0, 0, 1, 1], [], []>} : vector<2x32xf32>, vector<32x128xf32>, vector<2x128xf32> -> vector<2x128xf32>
    %468 = arith.addf %467, %21 : vector<2x128xf32>
    %cst_97 = arith.constant 0.000000e+00 : f32
    %469 = vector.broadcast %cst_97 : f32 to vector<2x128xf32>
    %470 = arith.maximumf %468, %469 : vector<2x128xf32>
    %cst_98 = arith.constant dense<0.000000e+00> : vector<2x128xf32>
    %471 = tpu.matmul %470, %22, %cst_98 {dimension_numbers = #tpu.dot_dimension_numbers<[1], [0], [0], [1], [0, 0, 1, 1], [], []>} : vector<2x128xf32>, vector<128x128xf32>, vector<2x128xf32> -> vector<2x128xf32>
    %472 = arith.addf %471, %25 : vector<2x128xf32>
    %473 = tpu.concatenate %472, %445 in 1 : vector<2x128xf32>, vector<2x32xf32> -> vector<2x160xf32>
    %cst_99 = arith.constant dense<0.000000e+00> : vector<2x128xf32>
    %474 = tpu.matmul %473, %10, %cst_99 {dimension_numbers = #tpu.dot_dimension_numbers<[1], [0], [0], [1], [0, 0, 1, 1], [], []>} : vector<2x160xf32>, vector<160x128xf32>, vector<2x128xf32> -> vector<2x128xf32>
    %475 = arith.addf %474, %14 : vector<2x128xf32>
    %476 = vector.extract_strided_slice %475 {offsets = [0, 0], sizes = [2, 64], strides = [1, 1]} : vector<2x128xf32> to vector<2x64xf32>
    %477 = arith.negf %476 : vector<2x64xf32>
    %478 = math.exp %477 : vector<2x64xf32>
    %cst_100 = arith.constant 1.000000e+00 : f32
    %479 = vector.broadcast %cst_100 : f32 to vector<2x64xf32>
    %480 = arith.addf %479, %478 : vector<2x64xf32>
    %481 = arith.divf %479, %480 : vector<2x64xf32>
    %482 = vector.extract_strided_slice %481 {offsets = [0, 0], sizes = [2, 32], strides = [1, 1]} : vector<2x64xf32> to vector<2x32xf32>
    %483 = vector.extract_strided_slice %481 {offsets = [0, 32], sizes = [2, 32], strides = [1, 1]} : vector<2x64xf32> to vector<2x32xf32>
    %484 = vector.extract_strided_slice %475 {offsets = [0, 64], sizes = [2, 32], strides = [1, 1]} : vector<2x128xf32> to vector<2x32xf32>
    %485 = vector.extract_strided_slice %475 {offsets = [0, 96], sizes = [2, 32], strides = [1, 1]} : vector<2x128xf32> to vector<2x32xf32>
    %486 = arith.mulf %482, %485 : vector<2x32xf32>
    %487 = arith.addf %484, %486 : vector<2x32xf32>
    %488 = math.tanh %487 : vector<2x32xf32>
    %cst_101 = arith.constant 1.000000e+00 : f32
    %489 = vector.broadcast %cst_101 : f32 to vector<2x32xf32>
    %490 = arith.subf %489, %483 : vector<2x32xf32>
    %491 = arith.mulf %490, %488 : vector<2x32xf32>
    %492 = arith.mulf %483, %445 : vector<2x32xf32>
    %493 = arith.addf %491, %492 : vector<2x32xf32>
    %494 = tpu.concatenate %493, %466 in 1 : vector<2x32xf32>, vector<2x32xf32> -> vector<2x64xf32>
    %cst_102 = arith.constant dense<0.000000e+00> : vector<2x128xf32>
    %495 = tpu.matmul %494, %11, %cst_102 {dimension_numbers = #tpu.dot_dimension_numbers<[1], [0], [0], [1], [0, 0, 1, 1], [], []>} : vector<2x64xf32>, vector<64x128xf32>, vector<2x128xf32> -> vector<2x128xf32>
    %496 = arith.addf %495, %17 : vector<2x128xf32>
    %497 = vector.extract_strided_slice %496 {offsets = [0, 0], sizes = [2, 64], strides = [1, 1]} : vector<2x128xf32> to vector<2x64xf32>
    %498 = arith.negf %497 : vector<2x64xf32>
    %499 = math.exp %498 : vector<2x64xf32>
    %cst_103 = arith.constant 1.000000e+00 : f32
    %500 = vector.broadcast %cst_103 : f32 to vector<2x64xf32>
    %501 = arith.addf %500, %499 : vector<2x64xf32>
    %502 = arith.divf %500, %501 : vector<2x64xf32>
    %503 = vector.extract_strided_slice %502 {offsets = [0, 0], sizes = [2, 32], strides = [1, 1]} : vector<2x64xf32> to vector<2x32xf32>
    %504 = vector.extract_strided_slice %502 {offsets = [0, 32], sizes = [2, 32], strides = [1, 1]} : vector<2x64xf32> to vector<2x32xf32>
    %505 = vector.extract_strided_slice %496 {offsets = [0, 64], sizes = [2, 32], strides = [1, 1]} : vector<2x128xf32> to vector<2x32xf32>
    %506 = vector.extract_strided_slice %496 {offsets = [0, 96], sizes = [2, 32], strides = [1, 1]} : vector<2x128xf32> to vector<2x32xf32>
    %507 = arith.mulf %503, %506 : vector<2x32xf32>
    %508 = arith.addf %505, %507 : vector<2x32xf32>
    %509 = math.tanh %508 : vector<2x32xf32>
    %cst_104 = arith.constant 1.000000e+00 : f32
    %510 = vector.broadcast %cst_104 : f32 to vector<2x32xf32>
    %511 = arith.subf %510, %504 : vector<2x32xf32>
    %512 = arith.mulf %511, %509 : vector<2x32xf32>
    %513 = arith.mulf %504, %466 : vector<2x32xf32>
    %514 = arith.addf %512, %513 : vector<2x32xf32>
    %cst_105 = arith.constant dense<0.000000e+00> : vector<2x128xf32>
    %515 = tpu.matmul %514, %18, %cst_105 {dimension_numbers = #tpu.dot_dimension_numbers<[1], [0], [0], [1], [0, 0, 1, 1], [], []>} : vector<2x32xf32>, vector<32x128xf32>, vector<2x128xf32> -> vector<2x128xf32>
    %516 = arith.addf %515, %21 : vector<2x128xf32>
    %cst_106 = arith.constant 0.000000e+00 : f32
    %517 = vector.broadcast %cst_106 : f32 to vector<2x128xf32>
    %518 = arith.maximumf %516, %517 : vector<2x128xf32>
    %cst_107 = arith.constant dense<0.000000e+00> : vector<2x128xf32>
    %519 = tpu.matmul %518, %22, %cst_107 {dimension_numbers = #tpu.dot_dimension_numbers<[1], [0], [0], [1], [0, 0, 1, 1], [], []>} : vector<2x128xf32>, vector<128x128xf32>, vector<2x128xf32> -> vector<2x128xf32>
    %520 = arith.addf %519, %25 : vector<2x128xf32>
    %521 = tpu.concatenate %520, %493 in 1 : vector<2x128xf32>, vector<2x32xf32> -> vector<2x160xf32>
    %cst_108 = arith.constant dense<0.000000e+00> : vector<2x128xf32>
    %522 = tpu.matmul %521, %10, %cst_108 {dimension_numbers = #tpu.dot_dimension_numbers<[1], [0], [0], [1], [0, 0, 1, 1], [], []>} : vector<2x160xf32>, vector<160x128xf32>, vector<2x128xf32> -> vector<2x128xf32>
    %523 = arith.addf %522, %14 : vector<2x128xf32>
    %524 = vector.extract_strided_slice %523 {offsets = [0, 0], sizes = [2, 64], strides = [1, 1]} : vector<2x128xf32> to vector<2x64xf32>
    %525 = arith.negf %524 : vector<2x64xf32>
    %526 = math.exp %525 : vector<2x64xf32>
    %cst_109 = arith.constant 1.000000e+00 : f32
    %527 = vector.broadcast %cst_109 : f32 to vector<2x64xf32>
    %528 = arith.addf %527, %526 : vector<2x64xf32>
    %529 = arith.divf %527, %528 : vector<2x64xf32>
    %530 = vector.extract_strided_slice %529 {offsets = [0, 0], sizes = [2, 32], strides = [1, 1]} : vector<2x64xf32> to vector<2x32xf32>
    %531 = vector.extract_strided_slice %529 {offsets = [0, 32], sizes = [2, 32], strides = [1, 1]} : vector<2x64xf32> to vector<2x32xf32>
    %532 = vector.extract_strided_slice %523 {offsets = [0, 64], sizes = [2, 32], strides = [1, 1]} : vector<2x128xf32> to vector<2x32xf32>
    %533 = vector.extract_strided_slice %523 {offsets = [0, 96], sizes = [2, 32], strides = [1, 1]} : vector<2x128xf32> to vector<2x32xf32>
    %534 = arith.mulf %530, %533 : vector<2x32xf32>
    %535 = arith.addf %532, %534 : vector<2x32xf32>
    %536 = math.tanh %535 : vector<2x32xf32>
    %cst_110 = arith.constant 1.000000e+00 : f32
    %537 = vector.broadcast %cst_110 : f32 to vector<2x32xf32>
    %538 = arith.subf %537, %531 : vector<2x32xf32>
    %539 = arith.mulf %538, %536 : vector<2x32xf32>
    %540 = arith.mulf %531, %493 : vector<2x32xf32>
    %541 = arith.addf %539, %540 : vector<2x32xf32>
    %542 = tpu.concatenate %541, %514 in 1 : vector<2x32xf32>, vector<2x32xf32> -> vector<2x64xf32>
    %cst_111 = arith.constant dense<0.000000e+00> : vector<2x128xf32>
    %543 = tpu.matmul %542, %11, %cst_111 {dimension_numbers = #tpu.dot_dimension_numbers<[1], [0], [0], [1], [0, 0, 1, 1], [], []>} : vector<2x64xf32>, vector<64x128xf32>, vector<2x128xf32> -> vector<2x128xf32>
    %544 = arith.addf %543, %17 : vector<2x128xf32>
    %545 = vector.extract_strided_slice %544 {offsets = [0, 0], sizes = [2, 64], strides = [1, 1]} : vector<2x128xf32> to vector<2x64xf32>
    %546 = arith.negf %545 : vector<2x64xf32>
    %547 = math.exp %546 : vector<2x64xf32>
    %cst_112 = arith.constant 1.000000e+00 : f32
    %548 = vector.broadcast %cst_112 : f32 to vector<2x64xf32>
    %549 = arith.addf %548, %547 : vector<2x64xf32>
    %550 = arith.divf %548, %549 : vector<2x64xf32>
    %551 = vector.extract_strided_slice %550 {offsets = [0, 0], sizes = [2, 32], strides = [1, 1]} : vector<2x64xf32> to vector<2x32xf32>
    %552 = vector.extract_strided_slice %550 {offsets = [0, 32], sizes = [2, 32], strides = [1, 1]} : vector<2x64xf32> to vector<2x32xf32>
    %553 = vector.extract_strided_slice %544 {offsets = [0, 64], sizes = [2, 32], strides = [1, 1]} : vector<2x128xf32> to vector<2x32xf32>
    %554 = vector.extract_strided_slice %544 {offsets = [0, 96], sizes = [2, 32], strides = [1, 1]} : vector<2x128xf32> to vector<2x32xf32>
    %555 = arith.mulf %551, %554 : vector<2x32xf32>
    %556 = arith.addf %553, %555 : vector<2x32xf32>
    %557 = math.tanh %556 : vector<2x32xf32>
    %cst_113 = arith.constant 1.000000e+00 : f32
    %558 = vector.broadcast %cst_113 : f32 to vector<2x32xf32>
    %559 = arith.subf %558, %552 : vector<2x32xf32>
    %560 = arith.mulf %559, %557 : vector<2x32xf32>
    %561 = arith.mulf %552, %514 : vector<2x32xf32>
    %562 = arith.addf %560, %561 : vector<2x32xf32>
    %cst_114 = arith.constant dense<0.000000e+00> : vector<2x128xf32>
    %563 = tpu.matmul %562, %18, %cst_114 {dimension_numbers = #tpu.dot_dimension_numbers<[1], [0], [0], [1], [0, 0, 1, 1], [], []>} : vector<2x32xf32>, vector<32x128xf32>, vector<2x128xf32> -> vector<2x128xf32>
    %564 = arith.addf %563, %21 : vector<2x128xf32>
    %cst_115 = arith.constant 0.000000e+00 : f32
    %565 = vector.broadcast %cst_115 : f32 to vector<2x128xf32>
    %566 = arith.maximumf %564, %565 : vector<2x128xf32>
    %cst_116 = arith.constant dense<0.000000e+00> : vector<2x128xf32>
    %567 = tpu.matmul %566, %22, %cst_116 {dimension_numbers = #tpu.dot_dimension_numbers<[1], [0], [0], [1], [0, 0, 1, 1], [], []>} : vector<2x128xf32>, vector<128x128xf32>, vector<2x128xf32> -> vector<2x128xf32>
    %568 = arith.addf %567, %25 : vector<2x128xf32>
    %569 = tpu.concatenate %568, %541 in 1 : vector<2x128xf32>, vector<2x32xf32> -> vector<2x160xf32>
    %cst_117 = arith.constant dense<0.000000e+00> : vector<2x128xf32>
    %570 = tpu.matmul %569, %10, %cst_117 {dimension_numbers = #tpu.dot_dimension_numbers<[1], [0], [0], [1], [0, 0, 1, 1], [], []>} : vector<2x160xf32>, vector<160x128xf32>, vector<2x128xf32> -> vector<2x128xf32>
    %571 = arith.addf %570, %14 : vector<2x128xf32>
    %572 = vector.extract_strided_slice %571 {offsets = [0, 0], sizes = [2, 64], strides = [1, 1]} : vector<2x128xf32> to vector<2x64xf32>
    %573 = arith.negf %572 : vector<2x64xf32>
    %574 = math.exp %573 : vector<2x64xf32>
    %cst_118 = arith.constant 1.000000e+00 : f32
    %575 = vector.broadcast %cst_118 : f32 to vector<2x64xf32>
    %576 = arith.addf %575, %574 : vector<2x64xf32>
    %577 = arith.divf %575, %576 : vector<2x64xf32>
    %578 = vector.extract_strided_slice %577 {offsets = [0, 0], sizes = [2, 32], strides = [1, 1]} : vector<2x64xf32> to vector<2x32xf32>
    %579 = vector.extract_strided_slice %577 {offsets = [0, 32], sizes = [2, 32], strides = [1, 1]} : vector<2x64xf32> to vector<2x32xf32>
    %580 = vector.extract_strided_slice %571 {offsets = [0, 64], sizes = [2, 32], strides = [1, 1]} : vector<2x128xf32> to vector<2x32xf32>
    %581 = vector.extract_strided_slice %571 {offsets = [0, 96], sizes = [2, 32], strides = [1, 1]} : vector<2x128xf32> to vector<2x32xf32>
    %582 = arith.mulf %578, %581 : vector<2x32xf32>
    %583 = arith.addf %580, %582 : vector<2x32xf32>
    %584 = math.tanh %583 : vector<2x32xf32>
    %cst_119 = arith.constant 1.000000e+00 : f32
    %585 = vector.broadcast %cst_119 : f32 to vector<2x32xf32>
    %586 = arith.subf %585, %579 : vector<2x32xf32>
    %587 = arith.mulf %586, %584 : vector<2x32xf32>
    %588 = arith.mulf %579, %541 : vector<2x32xf32>
    %589 = arith.addf %587, %588 : vector<2x32xf32>
    %590 = tpu.concatenate %589, %562 in 1 : vector<2x32xf32>, vector<2x32xf32> -> vector<2x64xf32>
    %cst_120 = arith.constant dense<0.000000e+00> : vector<2x128xf32>
    %591 = tpu.matmul %590, %11, %cst_120 {dimension_numbers = #tpu.dot_dimension_numbers<[1], [0], [0], [1], [0, 0, 1, 1], [], []>} : vector<2x64xf32>, vector<64x128xf32>, vector<2x128xf32> -> vector<2x128xf32>
    %592 = arith.addf %591, %17 : vector<2x128xf32>
    %593 = vector.extract_strided_slice %592 {offsets = [0, 0], sizes = [2, 64], strides = [1, 1]} : vector<2x128xf32> to vector<2x64xf32>
    %594 = arith.negf %593 : vector<2x64xf32>
    %595 = math.exp %594 : vector<2x64xf32>
    %cst_121 = arith.constant 1.000000e+00 : f32
    %596 = vector.broadcast %cst_121 : f32 to vector<2x64xf32>
    %597 = arith.addf %596, %595 : vector<2x64xf32>
    %598 = arith.divf %596, %597 : vector<2x64xf32>
    %599 = vector.extract_strided_slice %598 {offsets = [0, 0], sizes = [2, 32], strides = [1, 1]} : vector<2x64xf32> to vector<2x32xf32>
    %600 = vector.extract_strided_slice %598 {offsets = [0, 32], sizes = [2, 32], strides = [1, 1]} : vector<2x64xf32> to vector<2x32xf32>
    %601 = vector.extract_strided_slice %592 {offsets = [0, 64], sizes = [2, 32], strides = [1, 1]} : vector<2x128xf32> to vector<2x32xf32>
    %602 = vector.extract_strided_slice %592 {offsets = [0, 96], sizes = [2, 32], strides = [1, 1]} : vector<2x128xf32> to vector<2x32xf32>
    %603 = arith.mulf %599, %602 : vector<2x32xf32>
    %604 = arith.addf %601, %603 : vector<2x32xf32>
    %605 = math.tanh %604 : vector<2x32xf32>
    %cst_122 = arith.constant 1.000000e+00 : f32
    %606 = vector.broadcast %cst_122 : f32 to vector<2x32xf32>
    %607 = arith.subf %606, %600 : vector<2x32xf32>
    %608 = arith.mulf %607, %605 : vector<2x32xf32>
    %609 = arith.mulf %600, %562 : vector<2x32xf32>
    %610 = arith.addf %608, %609 : vector<2x32xf32>
    %cst_123 = arith.constant dense<0.000000e+00> : vector<2x128xf32>
    %611 = tpu.matmul %610, %18, %cst_123 {dimension_numbers = #tpu.dot_dimension_numbers<[1], [0], [0], [1], [0, 0, 1, 1], [], []>} : vector<2x32xf32>, vector<32x128xf32>, vector<2x128xf32> -> vector<2x128xf32>
    %612 = arith.addf %611, %21 : vector<2x128xf32>
    %cst_124 = arith.constant 0.000000e+00 : f32
    %613 = vector.broadcast %cst_124 : f32 to vector<2x128xf32>
    %614 = arith.maximumf %612, %613 : vector<2x128xf32>
    %cst_125 = arith.constant dense<0.000000e+00> : vector<2x128xf32>
    %615 = tpu.matmul %614, %22, %cst_125 {dimension_numbers = #tpu.dot_dimension_numbers<[1], [0], [0], [1], [0, 0, 1, 1], [], []>} : vector<2x128xf32>, vector<128x128xf32>, vector<2x128xf32> -> vector<2x128xf32>
    %616 = arith.addf %615, %25 : vector<2x128xf32>
    %617 = tpu.concatenate %424, %472, %520, %568, %616 in 1 : vector<2x128xf32>, vector<2x128xf32>, vector<2x128xf32>, vector<2x128xf32>, vector<2x128xf32> -> vector<2x640xf32>
    %c0_126 = arith.constant 0 : index
    %c0_127 = arith.constant 0 : index
    %618 = vector.load %arg16[%c0_126, %c0_127] : memref<2x640xf32, #tpu.memory_space<vmem>>, vector<2x640xf32>
    tpu.vector_store %arg16[%c0_126, %c0_127], %617 {strides = array<i32>} : memref<2x640xf32, #tpu.memory_space<vmem>>, vector<2x640xf32>,
    return
  }
}

</mosaic_0001>

<bundles_post_ra>
// kernel: tpu_custom_call.1
= control target key start
LH: loop header
LB: loop body
LE: loop exit
PB: predicated region body
PF: predicated region fallthrough
CT: control target
= control target key end

     0   :  { %s6523_s0 = inlined_call_operand.vmem [shape: f32[16,4], index: 0, kind: input, shape index: {}]   ;;  %s6524_s1 = inlined_call_operand.vmem [shape: f32[2,128], index: 1, kind: input, shape index: {}]   ;;  %s6525_s2 = inlined_call_operand.vmem [shape: f32[4,128], index: 2, kind: input, shape index: {}]   ;;  %s6526_s3 = inlined_call_operand.hbm [shape: f32[32,128], index: 3, kind: input, shape index: {}]   ;;  %s6527_s4 = inlined_call_operand.vmem [shape: f32[1,128], index: 4, kind: input, shape index: {}]   ;;  %s6528_s5 = inlined_call_operand.vmem [shape: f32[1,128], index: 5, kind: input, shape index: {}]   ;;  %s6529_s6 = inlined_call_operand.hbm [shape: f32[64,128], index: 6, kind: input, shape index: {}]   ;;  %s6530_s7 = inlined_call_operand.vmem [shape: f32[1,128], index: 7, kind: input, shape index: {}]   ;;  %s6531_s8 = inlined_call_operand.hbm [shape: f32[160,128], index: 8, kind: input, shape index: {}]   ;;  %s6532_s9 = inlined_call_operand.hbm [shape: f32[1,128], index: 9, kind: input, shape index: {}]   ;;  %s6533_s10 = inlined_call_operand.hbm [shape: f32[64,128], index: 10, kind: input, shape index: {}]   ;;  %s6534_s11 = inlined_call_operand.hbm [shape: f32[1,128], index: 11, kind: input, shape index: {}]   ;;  %s6535_s12 = inlined_call_operand.vmem [shape: f32[32,128], index: 12, kind: input, shape index: {}]   ;;  %s6536_s13 = inlined_call_operand.vmem [shape: f32[1,128], index: 13, kind: input, shape index: {}]   ;;  %s6537_s14 = inlined_call_operand.hbm [shape: f32[128,128], index: 14, kind: input, shape index: {}]   ;;  %s6538_s15 = inlined_call_operand.vmem [shape: f32[1,128], index: 15, kind: input, shape index: {}]   ;;  %s6539_s16 = inlined_call_operand.hbm [shape: f32[2,640], index: 16, kind: output, shape index: {}]  }
   0x1   :  { %6555 = sst [smem:[#allocation27_spill]] %s6523_s0 }
   0x2   :  { %21 = vsyncpa [#allocation3], 0 }
   0x3   :  { %22 = vsyncpa [#allocation6], 0 }
   0x4   :  { %23 = vsyncpa [#allocation9], 0 }
   0x5   :  { %24 = vsyncpa [#allocation12], 0 }
   0x6   :  { %25 = vsyncpa [#allocation4], 0  ;;  %s5133_s21 = smov [#allocation5]   ;;  %s5134_s23 = smov [#allocation8]  }
   0x7   :  { %s53_s22 = sshll.u32 %s5133_s21, 4  ;;  %s80_s24 = sshll.u32 %s5134_s23, 4  ;;  %s54_s22 = int_to_ptr.vmem [resolvable:$true] %s53_s22  ;;  %s81_s24 = int_to_ptr.vmem [resolvable:$true] %s80_s24 }
   0x8   :  { %s4971_s25 = scalar_lea.vmem %s54_s22, 1024  ;;  %p4976_p1 = scmp.lt.s32.totalorder %s54_s22, %s54_s22 }
   0x9   :  { %p4972_p0 = scmp.ne.s32.totalorder %s54_s22, %s4971_s25  ;;  %p4977_p2 = scmp.lt.s32.totalorder %s4971_s25, %s4971_s25 }
   0xb   :  { %p4978_p3 = por %p4977_p2, %p4976_p1 }
   0xd   :  { %p4979_p4 = pnand %p4978_p3, %p4972_p0 }
   0xf   :  { %4982 = shalt.err (!%p4979_p4)
}
  0x10   :  { %s5135_s26 = smov 128   ;;  %s5136_s27 = smov 8  }
  0x11   :  { %59 = dma.hbm_to_vmem [thread:$0]  %s6529_s6, 1024, %s54_s22, [#allocation6], %s5135_s26, %s5135_s26, %s5136_s27  }
  0x12   :  { %s4991_s30 = scalar_lea.vmem %s81_s24, 16  ;;  %s4995_s0 = scalar_lea.vmem %s81_s24, 32 }
  0x13   :  { %p4992_p5 = scmp.ne.s32.totalorder %s81_s24, %s4991_s30  ;;  %p4996_p6 = scmp.lt.s32.totalorder %s81_s24, %s81_s24 }
  0x14   :  { %p4997_p7 = scmp.lt.s32.totalorder %s4995_s0, %s4991_s30 }
  0x16   :  { %p4998_p8 = por %p4997_p7, %p4996_p6 }
  0x18   :  { %p4999_p9 = pnand %p4998_p8, %p4992_p5 }
  0x1a   :  { %5002 = shalt.err (!%p4999_p9)
}
  0x1b   :  { %83 = dma.hbm_to_vmem [thread:$0]  %s6532_s9, 16, %s81_s24, [#allocation9]  }
  0x1c   :  { %s5137_s19 = smov [#allocation11]   ;;  %s5138_s21 = smov [#allocation2]  }
  0x1d   :  { %s102_s20 = sshll.u32 %s5137_s19, 4  ;;  %s37_s23 = sshll.u32 %s5138_s21, 4  ;;  %s103_s20 = int_to_ptr.vmem [resolvable:$true] %s102_s20  ;;  %s38_s23 = int_to_ptr.vmem [resolvable:$true] %s37_s23 }
  0x1e   :  { %s5011_s25 = scalar_lea.vmem %s103_s20, 16  ;;  %s5015_s6 = scalar_lea.vmem %s103_s20, 32 }
  0x1f   :  { %p5012_p10 = scmp.ne.s32.totalorder %s103_s20, %s5011_s25  ;;  %p5016_p11 = scmp.lt.s32.totalorder %s103_s20, %s103_s20 }
  0x20   :  { %p5017_p12 = scmp.lt.s32.totalorder %s5015_s6, %s5011_s25 }
  0x22   :  { %p5018_p13 = por %p5017_p12, %p5016_p11 }
  0x24   :  { %p5019_p0 = pnand %p5018_p13, %p5012_p10 }
  0x26   :  { %5022 = shalt.err (!%p5019_p0)
}
  0x27   :  { %105 = dma.hbm_to_vmem [thread:$0]  %s6534_s11, 16, %s103_s20, [#allocation12]  }
  0x28   :  { %s5031_s29 = scalar_lea.vmem %s38_s23, 512  ;;  %p5036_p2 = scmp.lt.s32.totalorder %s38_s23, %s38_s23 }
  0x29   :  { %p5032_p1 = scmp.ne.s32.totalorder %s38_s23, %s5031_s29  ;;  %p5037_p3 = scmp.lt.s32.totalorder %s5031_s29, %s5031_s29 }
  0x2b   :  { %p5038_p4 = por %p5037_p3, %p5036_p2 }
  0x2d   :  { %p5039_p5 = pnand %p5038_p4, %p5032_p1 }
  0x2f   :  { %5042 = shalt.err (!%p5039_p5)
}
  0x30   :  { %43 = dma.hbm_to_vmem [thread:$0]  %s6526_s3, 512, %s38_s23, [#allocation3], %s5135_s26, %s5135_s26, %s5136_s27  }
  0x31   :  { %s5139_s30 = smov [#allocation7]   ;;  %s5140_s17 = smov [#allocation10]  }
  0x32   :  { %s67_s0 = sshll.u32 %s5139_s30, 4  ;;  %s89_s18 = sshll.u32 %s5140_s17, 4  ;;  %s68_s0 = int_to_ptr.vmem [resolvable:$true] %s67_s0  ;;  %s90_s18 = int_to_ptr.vmem [resolvable:$true] %s89_s18 }
  0x33   :  { %s5051_s11 = scalar_lea.vmem %s68_s0, 2560  ;;  %p5056_p7 = scmp.lt.s32.totalorder %s68_s0, %s68_s0 }
  0x34   :  { %p5052_p6 = scmp.ne.s32.totalorder %s68_s0, %s5051_s11  ;;  %p5057_p8 = scmp.lt.s32.totalorder %s5051_s11, %s5051_s11 }
  0x36   :  { %p5058_p9 = por %p5057_p8, %p5056_p7 }
  0x38   :  { %p5059_p10 = pnand %p5058_p9, %p5052_p6 }
  0x3a   :  { %5062 = shalt.err (!%p5059_p10)
}
  0x3b   :  { %73 = dma.hbm_to_vmem [thread:$0]  %s6531_s8, 2560, %s68_s0, [#allocation6], %s5135_s26, %s5135_s26, %s5136_s27  }
  0x3c   :  { %s5071_s3 = scalar_lea.vmem %s90_s18, 1024  ;;  %p5076_p12 = scmp.lt.s32.totalorder %s90_s18, %s90_s18 }
  0x3d   :  { %p5072_p11 = scmp.ne.s32.totalorder %s90_s18, %s5071_s3  ;;  %p5077_p13 = scmp.lt.s32.totalorder %s5071_s3, %s5071_s3 }
  0x3f   :  { %p5078_p0 = por %p5077_p13, %p5076_p12 }
  0x41   :  { %p5079_p1 = pnand %p5078_p0, %p5072_p11 }
  0x43   :  { %5082 = shalt.err (!%p5079_p1)
}
  0x44   :  { %95 = dma.hbm_to_vmem [thread:$0]  %s6533_s10, 1024, %s90_s18, [#allocation9], %s5135_s26, %s5135_s26, %s5136_s27  }
  0x45   :  { %s5141_s25 = smov [#allocation13]  }
  0x46   :  { %s115_s6 = sshll.u32 %s5141_s25, 4  ;;  %s116_s6 = int_to_ptr.vmem [resolvable:$true] %s115_s6 }
  0x47   :  { %s5091_s22 = scalar_lea.vmem %s116_s6, 2048  ;;  %p5096_p3 = scmp.lt.s32.totalorder %s116_s6, %s116_s6 }
  0x48   :  { %p5092_p2 = scmp.ne.s32.totalorder %s116_s6, %s5091_s22  ;;  %p5097_p4 = scmp.lt.s32.totalorder %s5091_s22, %s5091_s22 }
  0x4a   :  { %p5098_p5 = por %p5097_p4, %p5096_p3 }
  0x4c   :  { %p5099_p6 = pnand %p5098_p5, %p5092_p2 }
  0x4e   :  { %5102 = shalt.err (!%p5099_p6)
}
  0x4f   :  { %121 = dma.hbm_to_vmem [thread:$0]  %s6537_s14, 2048, %s116_s6, [#allocation12], %s5135_s26, %s5135_s26, %s5136_s27  }
  0x50   :  { %5123 = dma.done.wait [#allocation3], 512  }
  0x51   :  { %5124 = vsyncadd [#allocation3], 4294966784 }
  0x52   :  { %5125 = dma.done.wait [#allocation6], 3584  }
  0x53   :  { %5126 = vsyncadd [#allocation6], 4294963712 }
  0x54   :  { %5127 = dma.done.wait [#allocation9], 1040  }
  0x55   :  { %5128 = vsyncadd [#allocation9], 4294966256 }
  0x56   :  { %5129 = dma.done.wait [#allocation12], 2064  }
  0x57   :  { %5130 = vsyncadd [#allocation12], 4294965232  ;;  %v6546_v0 = vmov 0.0   ;;  %vm5143_vm0 = vmmov 0   ;;  %vm264_vm1 = vcmask 1043456   ;;  %vm257_vm2 = vcmask 31744  }
  0x58   :  { %4160 = vmatprep.subr.mxu1 %v6546_v0  ;;  %4168 = vmatprep.mubr.msk.f32.mxu1 %vm5143_vm0, %v6546_v0  ;;  %v145_v1 = vld [vmem:[%s6525_s2] sm:$0xf]  ;;  %v5276_v2 = vld [vmem:[#allocation2 + $0x18] sm:$0xff]  ;;  %s6556_s27 = sld [smem:[#allocation27_spill]]  ;;  %v5285_v5 = vld [vmem:[#allocation2 + $0x10] sm:$0xff]  ;;  %s5144_s18 = smov 32  }
  0x59   :  { %4155 = vmatprep.subr.msk.mxu0 %vm264_vm1, %v145_v1  ;;  %4161 = vmatpush3.msra.mxu1 %v5276_v2  ;;  %v5288_v6 = vld [vmem:[#allocation2 + $0x8] sm:$0xff]  ;;  %v5293_v7 = vld [vmem:[#allocation2] sm:$0xff]  ;;  %v5328_v26 = vld [vmem:[#allocation5 + $0x38] sm:$0xff]  ;;  %s5146_s11 = smov 96   ;;  %vm343_vm3 = vcmask 261120   ;;  %vm449_vm4 = vcmask 523264  }
  0x5a   :  { %4156 = vmatpush3.msk.msra.mxu0 %vm264_vm1, %v145_v1  ;;  %4162 = vmatprep.subr.mxu1 %v6546_v0  ;;  %v3824_v8 = vld [vmem:[%s6527_s4] ss:$0 sm:$0xff]  ;;  %s5145_s4 = smov 64   ;;  %v5330_v27 = vld [vmem:[#allocation5 + $0x30] sm:$0xff]  ;;  %v5334_v28 = vld [vmem:[#allocation5 + $0x28] sm:$0xff] }
  0x5b   :  { %4163 = vmatpush3.msra.mxu1 %v5285_v5  ;;  %4171 = vmatprep.subr.mxu0 %v6546_v0  ;;  %v5322_v13 = vld [vmem:[%s6528_s5] ss:$0 sm:$0xff]  ;;  %v5342_v30 = vld [vmem:[#allocation5 + $0x18] sm:$0xff]  ;;  %v5346_v32 = vld [vmem:[#allocation5 + $0x10] sm:$0xff] }
  0x5c   :  { %4164 = vmatprep.subr.mxu1 %v6546_v0  ;;  %v5338_v29 = vld [vmem:[#allocation5 + $0x20] sm:$0xff]  ;;  %v5351_v33 = vld [vmem:[#allocation5 + $0x8] sm:$0xff] }
  0x5d   :  { %4165 = vmatpush3.msra.mxu1 %v5288_v6  ;;  %v5357_v34 = vld [vmem:[#allocation5] sm:$0xff] }
  0x5e   :  { %v249_v3 = vld [vmem:[%s6556_s27] sm:$0xff]  ;;  %v250_v4 = vld [vmem:[%s6556_s27 + $0x8] sm:$0xff]  ;;  %4166 = vmatprep.subr.mxu1 %v6546_v0 }
  0x5f   :  { %4157 = vmatprep.mubr.msk.f32.mxu0 %vm257_vm2, %v249_v3  ;;  %4167 = vmatpush3.msra.mxu1 %v5293_v7  ;;  %v5399_v42 = vld [vmem:[%s6530_s7] ss:$0 sm:$0xff] }
  0x60   :  { %4158 = vmatmul.mubr.msk.f32.vlgmr.msra.gmra.mxu0 %vm257_vm2, %v250_v4  ;;  %4169 = vmatmul.mubr.f32.vlgmr.msra.gmra.mxu1 %v6546_v0 }
  0x61   :  { %4187 = vmatprep.mubr.msk.f32.mxu0 %vm5143_vm0, %v6546_v0  ;;  %4190 = vmatprep.subr.mxu1 %v6546_v0 }
  0x62   :  { %4191 = vmatpush3.msra.mxu1 %v5276_v2  ;;  %4198 = vmatprep.mubr.msk.f32.mxu1 %vm5143_vm0, %v6546_v0 }
  0x63   :  { %4192 = vmatprep.subr.mxu1 %v6546_v0  ;;  %4172 = vmatpush3.msra.mxu0 %v5328_v26 }
  0x64   :  { %4193 = vmatpush3.msra.mxu1 %v5285_v5  ;;  %4173 = vmatprep.subr.mxu0 %v6546_v0 }
  0x65   :  { %4194 = vmatprep.subr.mxu1 %v6546_v0  ;;  %4174 = vmatpush3.msra.mxu0 %v5330_v27 }
  0x66   :  { %4195 = vmatpush3.msra.mxu1 %v5288_v6  ;;  %4175 = vmatprep.subr.mxu0 %v6546_v0 }
  0x67   :  { %4196 = vmatprep.subr.mxu1 %v6546_v0  ;;  %4176 = vmatpush3.msra.mxu0 %v5334_v28 }
  0x68   :  { %4197 = vmatpush3.msra.mxu1 %v5293_v7  ;;  %4177 = vmatprep.subr.mxu0 %v6546_v0 }
  0x69   :  { %4250 = vmatprep.subr.mxu1 %v6546_v0  ;;  %4178 = vmatpush3.msra.mxu0 %v5338_v29 }
  0x6a   :  { %4179 = vmatprep.subr.mxu0 %v6546_v0 }
  0x6b   :  { %4180 = vmatpush3.msra.mxu0 %v5342_v30 }
  0x6c   :  { %4181 = vmatprep.subr.mxu0 %v6546_v0 }
  0x6d   :  { %4182 = vmatpush3.msra.mxu0 %v5346_v32 }
  0x6e   :  { %4183 = vmatprep.subr.mxu0 %v6546_v0 }
  0x6f   :  { %4184 = vmatpush3.msra.mxu0 %v5351_v33 }
  0x70   :  { %4185 = vmatprep.subr.mxu0 %v6546_v0 }
  0x71   :  { %4186 = vmatpush3.msra.mxu0 %v5357_v34 }
  0x72   :  { %4201 = vmatprep.subr.mxu0 %v6546_v0 }
 0x120   :  { %v4159_v9 = vpop.f32.mrf.mxu0  ;;  %v413_v14 = vpop.f32.mrf.mxu1 }
 0x121   :  { %v5315_v10 = vadd.f32 %v4159_v9, %v3824_v8 }
 0x122   :  { %v334_v11 = vpop.f32.mrf.mxu0  ;;  %v4170_v16 = vpop.f32.mrf.mxu1 }
 0x123   :  { %v5317_v12 = vadd.f32 %v3824_v8, %v334_v11 }
 0x125   :  { %v417_v15 = vadd.f32 %v413_v14, %v5317_v12 }
 0x127   :  { %v418_v17 = vadd.f32 %v5322_v13, %v417_v15 }
 0x129   :  { %426 = vrot.lane.b32.xlu0 %v418_v17, %s5144_s18  ;;  %v3828_v18 = vmul.f32 -1.442695, %v418_v17 }
 0x12b   :  { %4741 = vpow2.f32 %v3828_v18 }
 0x138   :  { %v4742_v19 = vpop.eup %4741 }
 0x139   :  { %v422_v20 = vadd.f32 1.0, %v4742_v19 }
 0x13b   :  { %4743 = vrcp.f32 %v422_v20 }
 0x148   :  { %v4744_v21 = vpop.eup %4743 }
 0x149   :  { %v436_v35 = vsub.f32 1.0, %v4744_v21  ;;  %v442_v37 = vmul.f32 0.0, %v4744_v21 }
 0x19b   :  { %v427_v22 = vpop.permute.xlu0 %426 }
 0x19c   :  { %v429_v23 = vmul.f32 %v4744_v21, %v427_v22 }
 0x19e   :  { %431 = vrot.lane.b32.xlu0 %v429_v23, %s5145_s4 }
 0x210   :  { %v432_v24 = vpop.permute.xlu0 %431 }
 0x211   :  { %v434_v25 = vadd.f32 %v432_v24, %v418_v17 }
 0x213   :  { %4745 = vtanh.f32 %v434_v25 }
 0x220   :  { %v4746_v31 = vpop.eup %4745 }
 0x221   :  { %438 = vrot.lane.b32.xlu1 %v4746_v31, %s5146_s11 }
 0x293   :  { %v439_v36 = vpop.permute.xlu1 %438 }
 0x294   :  { %v441_v38 = vmul.f32 %v439_v36, %v436_v35 }
 0x296   :  { %v5361_v39 = vadd.f32 %v442_v37, %v441_v38 }
 0x298   :  { %445 = vrot.lane.b32.xlu1 %v5361_v39, %s5146_s11  ;;  %v648_v11 = vrot.slane %v5361_v39, 6 }
 0x30a   :  { %v446_v40 = vpop.permute.xlu1 %445 }
 0x30b   :  { %v448_v41 = vsel %vm343_vm3, %v446_v40, 0.0  ;;  %4199 = vmatmul.mubr.msk.f32.vlgmr.msra.gmra.mxu1 %vm343_vm3, %v446_v40 }
 0x30c   :  { %4188 = vmatmul.mubr.msk.f32.vlgmr.msra.gmra.mxu0 %vm449_vm4, %v448_v41  ;;  %4251 = vmatpush3.msra.mxu1 %v5276_v2 }
 0x30d   :  { %4202 = vmatpush3.msra.mxu0 %v5328_v26  ;;  %4217 = vmatprep.mubr.msk.f32.mxu0 %vm5143_vm0, %v6546_v0 }
 0x30e   :  { %4203 = vmatprep.subr.mxu0 %v6546_v0  ;;  %4252 = vmatprep.subr.mxu1 %v6546_v0 }
 0x30f   :  { %4204 = vmatpush3.msra.mxu0 %v5330_v27  ;;  %4253 = vmatpush3.msra.mxu1 %v5285_v5 }
 0x310   :  { %4205 = vmatprep.subr.mxu0 %v6546_v0  ;;  %4254 = vmatprep.subr.mxu1 %v6546_v0 }
 0x311   :  { %4206 = vmatpush3.msra.mxu0 %v5334_v28  ;;  %4255 = vmatpush3.msra.mxu1 %v5288_v6 }
 0x312   :  { %4207 = vmatprep.subr.mxu0 %v6546_v0  ;;  %4256 = vmatprep.subr.mxu1 %v6546_v0 }
 0x313   :  { %4208 = vmatpush3.msra.mxu0 %v5338_v29  ;;  %4257 = vmatpush3.msra.mxu1 %v5293_v7 }
 0x314   :  { %4209 = vmatprep.subr.mxu0 %v6546_v0  ;;  %4258 = vmatprep.mubr.msk.f32.mxu1 %vm5143_vm0, %v6546_v0 }
 0x315   :  { %4210 = vmatpush3.msra.mxu0 %v5342_v30  ;;  %4261 = vmatprep.subr.mxu1 %v6546_v0 }
 0x316   :  { %4211 = vmatprep.subr.mxu0 %v6546_v0 }
 0x317   :  { %4212 = vmatpush3.msra.mxu0 %v5346_v32 }
 0x318   :  { %4213 = vmatprep.subr.mxu0 %v6546_v0 }
 0x319   :  { %4214 = vmatpush3.msra.mxu0 %v5351_v33 }
 0x31a   :  { %4215 = vmatprep.subr.mxu0 %v6546_v0 }
 0x31b   :  { %4216 = vmatpush3.msra.mxu0 %v5357_v34 }
 0x31c   :  { %4220 = vmatprep.subr.mxu0 %v6546_v0 }
 0x3cb   :  { %v616_v43 = vpop.f32.mrf.mxu1 }
 0x3cc   :  { %v621_v44 = vrot.slane %v616_v43, 6  ;;  %v519_v45 = vpop.f32.mrf.mxu0 }
 0x3cd   :  { %v520_v46 = vadd.f32 %v5399_v42, %v519_v45  ;;  %v4200_v47 = vpop.f32.mrf.mxu1 }
 0x3ce   :  { %v623_v48 = vadd.f32 %v621_v44, %v5317_v12  ;;  %v4189_v49 = vpop.f32.mrf.mxu0 }
 0x3cf   :  { %530 = vrot.lane.b32.xlu1 %v520_v46, %s5144_s18  ;;  %v3830_v51 = vmul.f32 -1.442695, %v520_v46 }
 0x3d0   :  { %v624_v50 = vadd.f32 %v5322_v13, %v623_v48 }
 0x3d1   :  { %4747 = vpow2.f32 %v3830_v51 }
 0x3d2   :  { %632 = vrot.lane.b32.xlu0 %v624_v50, %s5144_s18  ;;  %v3832_v52 = vmul.f32 -1.442695, %v624_v50 }
 0x3d4   :  { %4749 = vpow2.f32 %v3832_v52 }
 0x3de   :  { %v4748_v53 = vpop.eup %4747 }
 0x3df   :  { %v526_v55 = vadd.f32 1.0, %v4748_v53 }
 0x3e1   :  { %v4750_v54 = vpop.eup %4749  ;;  %4751 = vrcp.f32 %v526_v55 }
 0x3e2   :  { %v628_v56 = vadd.f32 1.0, %v4750_v54 }
 0x3e4   :  { %4753 = vrcp.f32 %v628_v56 }
 0x3ee   :  { %v4752_v57 = vpop.eup %4751 }
 0x3ef   :  { %v540_v21 = vsub.f32 1.0, %v4752_v57  ;;  %v546_v23 = vmul.f32 0.0, %v4752_v57 }
 0x3f1   :  { %v4754_v60 = vpop.eup %4753 }
 0x3f2   :  { %v642_v14 = vsub.f32 1.0, %v4754_v60  ;;  %v650_v17 = vmul.f32 %v4754_v60, %v648_v11 }
 0x441   :  { %v531_v58 = vpop.permute.xlu1 %530 }
 0x442   :  { %v533_v59 = vmul.f32 %v4752_v57, %v531_v58 }
 0x444   :  { %v633_v61 = vpop.permute.xlu0 %632  ;;  %535 = vrot.lane.b32.xlu1 %v533_v59, %s5145_s4 }
 0x445   :  { %v635_v62 = vmul.f32 %v4754_v60, %v633_v61 }
 0x447   :  { %637 = vrot.lane.b32.xlu0 %v635_v62, %s5145_s4 }
 0x4b6   :  { %v536_v63 = vpop.permute.xlu1 %535 }
 0x4b7   :  { %v538_v1 = vadd.f32 %v536_v63, %v520_v46 }
 0x4b9   :  { %4755 = vtanh.f32 %v538_v1  ;;  %v638_v3 = vpop.permute.xlu0 %637 }
 0x4ba   :  { %v640_v4 = vadd.f32 %v638_v3, %v624_v50 }
 0x4bc   :  { %4757 = vtanh.f32 %v640_v4 }
 0x4c6   :  { %v4756_v8 = vpop.eup %4755 }
 0x4c7   :  { %542 = vrot.lane.b32.xlu1 %v4756_v8, %s5146_s11 }
 0x4c9   :  { %v4758_v9 = vpop.eup %4757 }
 0x4ca   :  { %644 = vrot.lane.b32.xlu0 %v4758_v9, %s5146_s11 }
 0x539   :  { %v543_v20 = vpop.permute.xlu1 %542 }
 0x53a   :  { %v545_v22 = vmul.f32 %v543_v20, %v540_v21 }
 0x53c   :  { %v645_v15 = vpop.permute.xlu0 %644  ;;  %v5417_v24 = vadd.f32 %v546_v23, %v545_v22 }
 0x53d   :  { %v647_v16 = vmul.f32 %v645_v15, %v642_v14 }
 0x53e   :  { %v657_v25 = vrot.slane %v5417_v24, 6 }
 0x53f   :  { %v5411_v18 = vadd.f32 %v650_v17, %v647_v16 }
 0x541   :  { %653 = vrot.lane.b32.xlu0 %v5411_v18, %s5146_s11  ;;  %v759_v19 = vrot.slane %v5411_v18, 2  ;;  %v862_v60 = vrot.slane %v5411_v18, 6 }
 0x543   :  { %760 = vrot.lane.b32.xlu1 %v759_v19, %s5146_s11 }
 0x5b3   :  { %v654_v31 = vpop.permute.xlu0 %653 }
 0x5b4   :  { %v659_v35 = vsel %vm343_vm3, %v654_v31, %v657_v25 }
 0x5b5   :  { %v661_v36 = vrot.slane %v659_v35, 2  ;;  %v761_v37 = vpop.permute.xlu1 %760 }
 0x5b7   :  { %4218 = vmatmul.mubr.msk.f32.vlgmr.msra.gmra.mxu0 %vm449_vm4, %v661_v36 }
 0x5b8   :  { %4221 = vmatpush3.msra.mxu0 %v5276_v2  ;;  %4228 = vmatprep.mubr.msk.f32.mxu0 %vm5143_vm0, %v6546_v0 }
 0x5b9   :  { %4222 = vmatprep.subr.mxu0 %v6546_v0 }
 0x5ba   :  { %4223 = vmatpush3.msra.mxu0 %v5285_v5 }
 0x5bb   :  { %4224 = vmatprep.subr.mxu0 %v6546_v0 }
 0x5bc   :  { %4225 = vmatpush3.msra.mxu0 %v5288_v6 }
 0x5bd   :  { %4226 = vmatprep.subr.mxu0 %v6546_v0 }
 0x5be   :  { %4227 = vmatpush3.msra.mxu0 %v5293_v7 }
 0x5bf   :  { %4229 = vmatmul.mubr.msk.f32.vlgmr.msra.gmra.mxu0 %vm343_vm3, %v761_v37  ;;  %4231 = vmatprep.subr.mxu0 %v6546_v0 }
 0x5c0   :  { %4232 = vmatpush3.msra.mxu0 %v5328_v26  ;;  %4247 = vmatprep.mubr.msk.f32.mxu0 %vm5143_vm0, %v6546_v0 }
 0x5c1   :  { %4233 = vmatprep.subr.mxu0 %v6546_v0 }
 0x5c2   :  { %4234 = vmatpush3.msra.mxu0 %v5330_v27 }
 0x5c3   :  { %4235 = vmatprep.subr.mxu0 %v6546_v0 }
 0x5c4   :  { %4236 = vmatpush3.msra.mxu0 %v5334_v28 }
 0x5c5   :  { %4237 = vmatprep.subr.mxu0 %v6546_v0 }
 0x5c6   :  { %4238 = vmatpush3.msra.mxu0 %v5338_v29 }
 0x5c7   :  { %4239 = vmatprep.subr.mxu0 %v6546_v0 }
 0x5c8   :  { %4240 = vmatpush3.msra.mxu0 %v5342_v30 }
 0x5c9   :  { %4241 = vmatprep.subr.mxu0 %v6546_v0 }
 0x5ca   :  { %4242 = vmatpush3.msra.mxu0 %v5346_v32 }
 0x5cb   :  { %4243 = vmatprep.subr.mxu0 %v6546_v0 }
 0x5cc   :  { %4244 = vmatpush3.msra.mxu0 %v5351_v33 }
 0x5cd   :  { %4245 = vmatprep.subr.mxu0 %v6546_v0 }
 0x5ce   :  { %4246 = vmatpush3.msra.mxu0 %v5357_v34 }
 0x5cf   :  { %4280 = vmatprep.subr.mxu0 %v6546_v0 }
 0x677   :  { %v730_v38 = vpop.f32.mrf.mxu0 }
 0x678   :  { %v731_v55 = vadd.f32 %v5399_v42, %v730_v38 }
 0x679   :  { %v4219_v39 = vpop.f32.mrf.mxu0 }
 0x67a   :  { %v3834_v56 = vmul.f32 -1.442695, %v731_v55 }
 0x67f   :  { %v830_v40 = vpop.f32.mrf.mxu0 }
 0x680   :  { %v835_v41 = vrot.slane %v830_v40, 4 }
 0x681   :  { %v4230_v43 = vpop.f32.mrf.mxu0 }
 0x682   :  { %v837_v44 = vadd.f32 %v835_v41, %v5317_v12 }
 0x684   :  { %v838_v45 = vadd.f32 %v5322_v13, %v837_v44 }
 0x686   :  { %846 = vrot.lane.b32.xlu0 %v838_v45, %s5144_s18  ;;  %v3836_v46 = vmul.f32 -1.442695, %v838_v45 }
 0x688   :  { %4759 = vpow2.f32 %v3836_v46 }
 0x695   :  { %v4760_v47 = vpop.eup %4759 }
 0x696   :  { %v842_v48 = vadd.f32 1.0, %v4760_v47 }
 0x698   :  { %4761 = vrcp.f32 %v842_v48 }
 0x6a5   :  { %v4762_v49 = vpop.eup %4761 }
 0x6a6   :  { %v856_v59 = vsub.f32 1.0, %v4762_v49  ;;  %v864_v62 = vmul.f32 %v4762_v49, %v862_v60 }
 0x6f8   :  { %v847_v50 = vpop.permute.xlu0 %846 }
 0x6f9   :  { %v849_v51 = vmul.f32 %v4762_v49, %v847_v50 }
 0x6fb   :  { %851 = vrot.lane.b32.xlu1 %v849_v51, %s5145_s4 }
 0x76d   :  { %v852_v52 = vpop.permute.xlu1 %851 }
 0x76e   :  { %v854_v53 = vadd.f32 %v852_v52, %v838_v45 }
 0x770   :  { %4763 = vtanh.f32 %v854_v53 }
 0x771   :  { %4765 = vpow2.f32 %v3834_v56 }
 0x77d   :  { %v4764_v54 = vpop.eup %4763 }
 0x77e   :  { %858 = vrot.lane.b32.xlu0 %v4764_v54, %s5146_s11  ;;  %v4766_v57 = vpop.eup %4765 }
 0x77f   :  { %v737_v58 = vadd.f32 1.0, %v4766_v57 }
 0x781   :  { %4767 = vrcp.f32 %v737_v58 }
 0x782   :  { %741 = vrot.lane.b32.xlu0 %v731_v55, %s5144_s18 }
 0x78e   :  { %v4768_v3 = vpop.eup %4767 }
 0x78f   :  { %v751_v38 = vsub.f32 1.0, %v4768_v3  ;;  %v757_v39 = vmul.f32 %v4768_v3, %v5417_v24 }
 0x7f0   :  { %v859_v61 = vpop.permute.xlu0 %858 }
 0x7f1   :  { %v861_v63 = vmul.f32 %v859_v61, %v856_v59 }
 0x7f3   :  { %v5459_v1 = vadd.f32 %v864_v62, %v861_v63 }
 0x7f4   :  { %v742_v4 = vpop.permute.xlu0 %741 }
 0x7f5   :  { %v744_v8 = vmul.f32 %v4768_v3, %v742_v4  ;;  %v973_v9 = vrot.slane %v5459_v1, 4  ;;  %v1076_v49 = vrot.slane %v5459_v1, 6 }
 0x7f7   :  { %974 = vrot.lane.b32.xlu1 %v973_v9, %s5146_s11  ;;  %746 = vrot.lane.b32.xlu0 %v744_v8, %s5145_s4 }
 0x869   :  { %v975_v11 = vpop.permute.xlu1 %974  ;;  %v747_v14 = vpop.permute.xlu0 %746 }
 0x86a   :  { %v749_v15 = vadd.f32 %v747_v14, %v731_v55  ;;  %4259 = vmatmul.mubr.msk.f32.vlgmr.msra.gmra.mxu1 %vm343_vm3, %v975_v11 }
 0x86b   :  { %4262 = vmatpush3.msra.mxu1 %v5328_v26  ;;  %4277 = vmatprep.mubr.msk.f32.mxu1 %vm5143_vm0, %v6546_v0 }
 0x86c   :  { %4769 = vtanh.f32 %v749_v15  ;;  %4263 = vmatprep.subr.mxu1 %v6546_v0 }
 0x86d   :  { %4264 = vmatpush3.msra.mxu1 %v5330_v27 }
 0x86e   :  { %4265 = vmatprep.subr.mxu1 %v6546_v0 }
 0x86f   :  { %4266 = vmatpush3.msra.mxu1 %v5334_v28 }
 0x870   :  { %4267 = vmatprep.subr.mxu1 %v6546_v0 }
 0x871   :  { %4268 = vmatpush3.msra.mxu1 %v5338_v29 }
 0x872   :  { %4269 = vmatprep.subr.mxu1 %v6546_v0 }
 0x873   :  { %4270 = vmatpush3.msra.mxu1 %v5342_v30 }
 0x874   :  { %4271 = vmatprep.subr.mxu1 %v6546_v0 }
 0x875   :  { %4272 = vmatpush3.msra.mxu1 %v5346_v32 }
 0x876   :  { %4273 = vmatprep.subr.mxu1 %v6546_v0 }
 0x877   :  { %4274 = vmatpush3.msra.mxu1 %v5351_v33 }
 0x878   :  { %4275 = vmatprep.subr.mxu1 %v6546_v0 }
 0x879   :  { %v4770_v16 = vpop.eup %4769  ;;  %4276 = vmatpush3.msra.mxu1 %v5357_v34 }
 0x87a   :  { %753 = vrot.lane.b32.xlu0 %v4770_v16, %s5146_s11  ;;  %4310 = vmatprep.subr.mxu1 %v6546_v0 }
 0x8ec   :  { %v754_v37 = vpop.permute.xlu0 %753 }
 0x92a   :  { %v1044_v17 = vpop.f32.mrf.mxu1 }
 0x92b   :  { %v1049_v18 = vrot.slane %v1044_v17, 2 }
 0x92c   :  { %v4260_v19 = vpop.f32.mrf.mxu1 }
 0x92d   :  { %v1051_v20 = vadd.f32 %v1049_v18, %v5317_v12  ;;  %v756_v12 = vmul.f32 %v754_v37, %v751_v38 }
 0x92f   :  { %v1052_v21 = vadd.f32 %v5322_v13, %v1051_v20  ;;  %v5491_v40 = vadd.f32 %v757_v39, %v756_v12 }
 0x931   :  { %1060 = vrot.lane.b32.xlu1 %v1052_v21, %s5144_s18  ;;  %v3840_v22 = vmul.f32 -1.442695, %v1052_v21  ;;  %v871_v44 = vrot.slane %v5491_v40, 4 }
 0x933   :  { %4771 = vpow2.f32 %v3840_v22 }
 0x940   :  { %v4772_v23 = vpop.eup %4771 }
 0x941   :  { %v1056_v25 = vadd.f32 1.0, %v4772_v23 }
 0x943   :  { %4773 = vrcp.f32 %v1056_v25 }
 0x950   :  { %v4774_v31 = vpop.eup %4773 }
 0x951   :  { %v1070_v48 = vsub.f32 1.0, %v4774_v31  ;;  %v1078_v51 = vmul.f32 %v4774_v31, %v1076_v49 }
 0x9a3   :  { %v1061_v35 = vpop.permute.xlu1 %1060 }
 0x9a4   :  { %v1063_v36 = vmul.f32 %v4774_v31, %v1061_v35 }
 0x9a6   :  { %1065 = vrot.lane.b32.xlu1 %v1063_v36, %s5145_s4 }
 0x9aa   :  { %867 = vrot.lane.b32.xlu1 %v5459_v1, %s5146_s11 }
 0xa18   :  { %v1066_v41 = vpop.permute.xlu1 %1065 }
 0xa19   :  { %v1068_v43 = vadd.f32 %v1066_v41, %v1052_v21 }
 0xa1b   :  { %4775 = vtanh.f32 %v1068_v43 }
 0xa1c   :  { %v868_v45 = vpop.permute.xlu1 %867 }
 0xa1d   :  { %v873_v46 = vsel %vm343_vm3, %v868_v45, %v871_v44 }
 0xa1e   :  { %v875_v47 = vrot.slane %v873_v46, 4 }
 0xa20   :  { %4248 = vmatmul.mubr.msk.f32.vlgmr.msra.gmra.mxu0 %vm449_vm4, %v875_v47 }
 0xa21   :  { %4281 = vmatpush3.msra.mxu0 %v5276_v2  ;;  %4288 = vmatprep.mubr.msk.f32.mxu0 %vm5143_vm0, %v6546_v0 }
 0xa22   :  { %4282 = vmatprep.subr.mxu0 %v6546_v0 }
 0xa23   :  { %4283 = vmatpush3.msra.mxu0 %v5285_v5 }
 0xa24   :  { %4284 = vmatprep.subr.mxu0 %v6546_v0 }
 0xa25   :  { %4285 = vmatpush3.msra.mxu0 %v5288_v6 }
 0xa26   :  { %4286 = vmatprep.subr.mxu0 %v6546_v0 }
 0xa27   :  { %4287 = vmatpush3.msra.mxu0 %v5293_v7 }
 0xa28   :  { %v4776_v24 = vpop.eup %4775  ;;  %4291 = vmatprep.subr.mxu0 %v6546_v0 }
 0xa29   :  { %1072 = vrot.lane.b32.xlu0 %v4776_v24, %s5146_s11 }
 0xa9b   :  { %v1073_v50 = vpop.permute.xlu0 %1072 }
 0xa9c   :  { %v1075_v52 = vmul.f32 %v1073_v50, %v1070_v48 }
 0xa9e   :  { %v5508_v53 = vadd.f32 %v1078_v51, %v1075_v52 }
 0xaa0   :  { %v1187_v54 = vrot.slane %v5508_v53, 6 }
 0xaa2   :  { %1188 = vrot.lane.b32.xlu1 %v1187_v54, %s5146_s11 }
 0xae0   :  { %v944_v55 = vpop.f32.mrf.mxu0 }
 0xae1   :  { %v945_v56 = vadd.f32 %v5399_v42, %v944_v55 }
 0xae2   :  { %v4249_v57 = vpop.f32.mrf.mxu0 }
 0xae3   :  { %955 = vrot.lane.b32.xlu0 %v945_v56, %s5144_s18  ;;  %v3838_v59 = vmul.f32 -1.442695, %v945_v56 }
 0xae5   :  { %4777 = vpow2.f32 %v3838_v59 }
 0xaf2   :  { %v4778_v60 = vpop.eup %4777 }
 0xaf3   :  { %v951_v61 = vadd.f32 1.0, %v4778_v60 }
 0xaf5   :  { %4779 = vrcp.f32 %v951_v61 }
 0xb02   :  { %v4780_v62 = vpop.eup %4779 }
 0xb03   :  { %v965_v21 = vsub.f32 1.0, %v4780_v62  ;;  %v971_v25 = vmul.f32 %v4780_v62, %v5491_v40 }
 0xb14   :  { %v1189_v58 = vpop.permute.xlu1 %1188 }
 0xb15   :  { %4289 = vmatmul.mubr.msk.f32.vlgmr.msra.gmra.mxu0 %vm343_vm3, %v1189_v58 }
 0xb16   :  { %4292 = vmatpush3.msra.mxu0 %v5328_v26  ;;  %4307 = vmatprep.mubr.msk.f32.mxu0 %vm5143_vm0, %v6546_v0 }
 0xb17   :  { %4293 = vmatprep.subr.mxu0 %v6546_v0 }
 0xb18   :  { %4294 = vmatpush3.msra.mxu0 %v5330_v27 }
 0xb19   :  { %4295 = vmatprep.subr.mxu0 %v6546_v0 }
 0xb1a   :  { %4296 = vmatpush3.msra.mxu0 %v5334_v28 }
 0xb1b   :  { %4297 = vmatprep.subr.mxu0 %v6546_v0 }
 0xb1c   :  { %4298 = vmatpush3.msra.mxu0 %v5338_v29 }
 0xb1d   :  { %4299 = vmatprep.subr.mxu0 %v6546_v0 }
 0xb1e   :  { %4300 = vmatpush3.msra.mxu0 %v5342_v30 }
 0xb1f   :  { %4301 = vmatprep.subr.mxu0 %v6546_v0 }
 0xb20   :  { %4302 = vmatpush3.msra.mxu0 %v5346_v32 }
 0xb21   :  { %4303 = vmatprep.subr.mxu0 %v6546_v0 }
 0xb22   :  { %4304 = vmatpush3.msra.mxu0 %v5351_v33 }
 0xb23   :  { %4305 = vmatprep.subr.mxu0 %v6546_v0 }
 0xb24   :  { %4306 = vmatpush3.msra.mxu0 %v5357_v34 }
 0xb25   :  { %4340 = vmatprep.subr.mxu0 %v6546_v0 }
 0xb55   :  { %v956_v63 = vpop.permute.xlu0 %955 }
 0xb56   :  { %v958_v1 = vmul.f32 %v4780_v62, %v956_v63 }
 0xb58   :  { %960 = vrot.lane.b32.xlu1 %v958_v1, %s5145_s4 }
 0xbca   :  { %v961_v3 = vpop.permute.xlu1 %960 }
 0xbcb   :  { %v963_v4 = vadd.f32 %v961_v3, %v945_v56 }
 0xbcd   :  { %4781 = vtanh.f32 %v963_v4 }
 0xbd5   :  { %v1258_v8 = vpop.f32.mrf.mxu0 }
 0xbd6   :  { %v1262_v9 = vadd.f32 %v1258_v8, %v5315_v10 }
 0xbd7   :  { %v4290_v11 = vpop.f32.mrf.mxu0 }
 0xbd8   :  { %v1263_v14 = vadd.f32 %v5322_v13, %v1262_v9 }
 0xbda   :  { %v4782_v15 = vpop.eup %4781  ;;  %1271 = vrot.lane.b32.xlu0 %v1263_v14, %s5144_s18  ;;  %v3844_v16 = vmul.f32 -1.442695, %v1263_v14 }
 0xbdb   :  { %967 = vrot.lane.b32.xlu1 %v4782_v15, %s5146_s11 }
 0xbdc   :  { %4783 = vpow2.f32 %v3844_v16 }
 0xbde   :  { %1081 = vrot.lane.b32.xlu0 %v5508_v53, %s5146_s11 }
 0xbe9   :  { %v4784_v17 = vpop.eup %4783 }
 0xbea   :  { %v1267_v18 = vadd.f32 1.0, %v4784_v17 }
 0xbec   :  { %4785 = vrcp.f32 %v1267_v18 }
 0xbf9   :  { %v4786_v19 = vpop.eup %4785 }
 0xbfa   :  { %v1281_v46 = vsub.f32 1.0, %v4786_v19  ;;  %v1288_v24 = vmul.f32 %v4786_v19, %v1187_v54 }
 0xc4c   :  { %v1272_v20 = vpop.permute.xlu0 %1271 }
 0xc4d   :  { %v1274_v22 = vmul.f32 %v4786_v19, %v1272_v20  ;;  %v968_v23 = vpop.permute.xlu1 %967 }
 0xc4e   :  { %v970_v31 = vmul.f32 %v968_v23, %v965_v21 }
 0xc4f   :  { %1276 = vrot.lane.b32.xlu1 %v1274_v22, %s5145_s4 }
 0xc50   :  { %v5544_v35 = vadd.f32 %v971_v25, %v970_v31  ;;  %v1082_v37 = vpop.permute.xlu0 %1081 }
 0xc52   :  { %v1085_v36 = vrot.slane %v5544_v35, 2 }
 0xc54   :  { %v1087_v38 = vsel %vm343_vm3, %v1082_v37, %v1085_v36 }
 0xc55   :  { %v1089_v12 = vrot.slane %v1087_v38, 6 }
 0xc57   :  { %4278 = vmatmul.mubr.msk.f32.vlgmr.msra.gmra.mxu1 %vm449_vm4, %v1089_v12 }
 0xc58   :  { %4311 = vmatpush3.msra.mxu1 %v5276_v2  ;;  %4318 = vmatprep.mubr.msk.f32.mxu1 %vm5143_vm0, %v6546_v0 }
 0xc59   :  { %4312 = vmatprep.subr.mxu1 %v6546_v0 }
 0xc5a   :  { %4313 = vmatpush3.msra.mxu1 %v5285_v5 }
 0xc5b   :  { %4314 = vmatprep.subr.mxu1 %v6546_v0 }
 0xc5c   :  { %4315 = vmatpush3.msra.mxu1 %v5288_v6 }
 0xc5d   :  { %4316 = vmatprep.subr.mxu1 %v6546_v0 }
 0xc5e   :  { %4317 = vmatpush3.msra.mxu1 %v5293_v7 }
 0xc5f   :  { %4321 = vmatprep.subr.mxu1 %v6546_v0 }
 0xcc1   :  { %v1277_v39 = vpop.permute.xlu1 %1276 }
 0xcc2   :  { %v1279_v40 = vadd.f32 %v1277_v39, %v1263_v14 }
 0xcc4   :  { %4787 = vtanh.f32 %v1279_v40 }
 0xcd1   :  { %v4788_v41 = vpop.eup %4787 }
 0xcd2   :  { %1283 = vrot.lane.b32.xlu0 %v4788_v41, %s5146_s11 }
 0xd17   :  { %v1158_v43 = vpop.f32.mrf.mxu1 }
 0xd18   :  { %v1159_v44 = vadd.f32 %v5399_v42, %v1158_v43 }
 0xd19   :  { %v4279_v45 = vpop.f32.mrf.mxu1 }
 0xd1a   :  { %1169 = vrot.lane.b32.xlu0 %v1159_v44, %s5144_s18  ;;  %v3842_v50 = vmul.f32 -1.442695, %v1159_v44 }
 0xd1c   :  { %4789 = vpow2.f32 %v3842_v50  ;;  %v4898_v50 = vld [vmem:[#allocation2 + $0x10] sm:$0xff] }
 0xd29   :  { %v4790_v51 = vpop.eup %4789 }
 0xd2a   :  { %v1165_v52 = vadd.f32 1.0, %v4790_v51  ;;  %v4899_v51 = vld [vmem:[#allocation2 + $0x8] sm:$0xff] }
 0xd2c   :  { %4791 = vrcp.f32 %v1165_v52  ;;  %v4900_v52 = vld [vmem:[#allocation2] sm:$0xff] }
 0xd39   :  { %v4792_v55 = vpop.eup %4791 }
 0xd3a   :  { %v1179_v3 = vsub.f32 1.0, %v4792_v55  ;;  %v1185_v8 = vmul.f32 %v4792_v55, %v5544_v35 }
 0xd44   :  { %v1284_v47 = vpop.permute.xlu0 %1283 }
 0xd45   :  { %v1286_v48 = vmul.f32 %v1284_v47, %v1281_v46 }
 0xd47   :  { %v5564_v49 = vadd.f32 %v1288_v24, %v1286_v48 }
 0xd49   :  { %1291 = vrot.lane.b32.xlu1 %v5564_v49, %s5146_s11  ;;  %v1493_v35 = vrot.slane %v5564_v49, 6 }
 0xd8c   :  { %v1170_v56 = vpop.permute.xlu0 %1169 }
 0xd8d   :  { %v1172_v57 = vmul.f32 %v4792_v55, %v1170_v56 }
 0xd8f   :  { %1174 = vrot.lane.b32.xlu1 %v1172_v57, %s5145_s4 }
 0xdbb   :  { %v1292_v58 = vpop.permute.xlu1 %1291 }
 0xdbc   :  { %4319 = vmatmul.mubr.msk.f32.vlgmr.msra.gmra.mxu1 %vm343_vm3, %v1292_v58 }
 0xdbd   :  { %4322 = vmatpush3.msra.mxu1 %v5328_v26  ;;  %4337 = vmatprep.mubr.msk.f32.mxu1 %vm5143_vm0, %v6546_v0 }
 0xdbe   :  { %4323 = vmatprep.subr.mxu1 %v6546_v0 }
 0xdbf   :  { %4324 = vmatpush3.msra.mxu1 %v5330_v27 }
 0xdc0   :  { %4325 = vmatprep.subr.mxu1 %v6546_v0 }
 0xdc1   :  { %4326 = vmatpush3.msra.mxu1 %v5334_v28 }
 0xdc2   :  { %4327 = vmatprep.subr.mxu1 %v6546_v0 }
 0xdc3   :  { %4328 = vmatpush3.msra.mxu1 %v5338_v29 }
 0xdc4   :  { %4329 = vmatprep.subr.mxu1 %v6546_v0 }
 0xdc5   :  { %4330 = vmatpush3.msra.mxu1 %v5342_v30 }
 0xdc6   :  { %4331 = vmatprep.subr.mxu1 %v6546_v0 }
 0xdc7   :  { %4332 = vmatpush3.msra.mxu1 %v5346_v32 }
 0xdc8   :  { %4333 = vmatprep.subr.mxu1 %v6546_v0 }
 0xdc9   :  { %4334 = vmatpush3.msra.mxu1 %v5351_v33 }
 0xdca   :  { %4335 = vmatprep.subr.mxu1 %v6546_v0 }
 0xdcb   :  { %4336 = vmatpush3.msra.mxu1 %v5357_v34 }
 0xdcc   :  { %4370 = vmatprep.subr.mxu1 %v6546_v0 }
 0xe01   :  { %v1175_v53 = vpop.permute.xlu1 %1174 }
 0xe02   :  { %v1177_v54 = vadd.f32 %v1175_v53, %v1159_v44 }
 0xe04   :  { %4793 = vtanh.f32 %v1177_v54 }
 0xe11   :  { %v4794_v59 = vpop.eup %4793 }
 0xe12   :  { %1181 = vrot.lane.b32.xlu0 %v4794_v59, %s5146_s11 }
 0xe7c   :  { %v1461_v60 = vpop.f32.mrf.mxu1 }
 0xe7d   :  { %v1466_v61 = vrot.slane %v1461_v60, 6 }
 0xe7e   :  { %v4320_v62 = vpop.f32.mrf.mxu1 }
 0xe7f   :  { %v1468_v63 = vadd.f32 %v1466_v61, %v5315_v10 }
 0xe81   :  { %v1469_v1 = vadd.f32 %v5322_v13, %v1468_v63 }
 0xe83   :  { %1477 = vrot.lane.b32.xlu1 %v1469_v1, %s5144_s18  ;;  %v3848_v15 = vmul.f32 -1.442695, %v1469_v1 }
 0xe84   :  { %v1182_v4 = vpop.permute.xlu0 %1181 }
 0xe85   :  { %v1184_v9 = vmul.f32 %v1182_v4, %v1179_v3  ;;  %4795 = vpow2.f32 %v3848_v15 }
 0xe87   :  { %v5593_v11 = vadd.f32 %v1185_v8, %v1184_v9 }
 0xe89   :  { %v1294_v14 = vsel %vm343_vm3, %v1292_v58, %v5593_v11 }
 0xe8a   :  { %4308 = vmatmul.mubr.msk.f32.vlgmr.msra.gmra.mxu0 %vm449_vm4, %v1294_v14 }
 0xe8b   :  { %4341 = vmatpush3.msra.mxu0 %v5276_v2  ;;  %4348 = vmatprep.mubr.msk.f32.mxu0 %vm5143_vm0, %v6546_v0 }
 0xe8c   :  { %4342 = vmatprep.subr.mxu0 %v6546_v0 }
 0xe8d   :  { %4343 = vmatpush3.msra.mxu0 %v5285_v5 }
 0xe8e   :  { %4344 = vmatprep.subr.mxu0 %v6546_v0 }
 0xe8f   :  { %4345 = vmatpush3.msra.mxu0 %v5288_v6 }
 0xe90   :  { %4346 = vmatprep.subr.mxu0 %v6546_v0 }
 0xe91   :  { %4347 = vmatpush3.msra.mxu0 %v5293_v7 }
 0xe92   :  { %4351 = vmatprep.subr.mxu0 %v6546_v0  ;;  %v4796_v2 = vpop.eup %4795 }
 0xe93   :  { %v1473_v16 = vadd.f32 1.0, %v4796_v2 }
 0xe95   :  { %4797 = vrcp.f32 %v1473_v16 }
 0xea2   :  { %v4798_v17 = vpop.eup %4797 }
 0xea3   :  { %v1487_v36 = vsub.f32 1.0, %v4798_v17  ;;  %v1495_v38 = vmul.f32 %v4798_v17, %v1493_v35  ;;  %v4901_v35 = vld [vmem:[#allocation5 + $0x38] sm:$0xff] }
 0xef5   :  { %v1478_v18 = vpop.permute.xlu1 %1477 }
 0xef6   :  { %v1480_v19 = vmul.f32 %v4798_v17, %v1478_v18 }
 0xef8   :  { %1482 = vrot.lane.b32.xlu0 %v1480_v19, %s5145_s4 }
 0xf4a   :  { %v1364_v5 = vpop.f32.mrf.mxu0 }
 0xf4b   :  { %v1365_v7 = vadd.f32 %v5399_v42, %v1364_v5 }
 0xf4c   :  { %v4309_v20 = vpop.f32.mrf.mxu0 }
 0xf4d   :  { %v3846_v23 = vmul.f32 -1.442695, %v1365_v7 }
 0xf6a   :  { %v1483_v21 = vpop.permute.xlu0 %1482 }
 0xf6b   :  { %v1485_v6 = vadd.f32 %v1483_v21, %v1469_v1 }
 0xf6d   :  { %4799 = vtanh.f32 %v1485_v6 }
 0xf6e   :  { %4801 = vpow2.f32 %v3846_v23 }
 0xf7a   :  { %v4800_v22 = vpop.eup %4799 }
 0xf7b   :  { %1489 = vrot.lane.b32.xlu1 %v4800_v22, %s5146_s11  ;;  %v4802_v25 = vpop.eup %4801 }
 0xf7c   :  { %v1371_v31 = vadd.f32 1.0, %v4802_v25 }
 0xf7e   :  { %4803 = vrcp.f32 %v1371_v31 }
 0xf7f   :  { %1375 = vrot.lane.b32.xlu1 %v1365_v7, %s5144_s18 }
 0xf8b   :  { %v4804_v43 = vpop.eup %4803 }
 0xfed   :  { %v1490_v37 = vpop.permute.xlu1 %1489 }
 0xfee   :  { %v1492_v12 = vmul.f32 %v1490_v37, %v1487_v36  ;;  %v4902_v36 = vld [vmem:[#allocation5 + $0x30] sm:$0xff]  ;;  %v4903_v37 = vld [vmem:[#allocation5 + $0x28] sm:$0xff] }
 0xff0   :  { %v5613_v39 = vadd.f32 %v1495_v38, %v1492_v12  ;;  %v4904_v38 = vld [vmem:[#allocation5 + $0x20] sm:$0xff]  ;;  %v4905_v12 = vld [vmem:[#allocation5 + $0x18] sm:$0xff] }
 0xff1   :  { %v1376_v41 = vpop.permute.xlu1 %1375 }
 0xff2   :  { %v1604_v40 = vrot.slane %v5613_v39, 2  ;;  %v1378_v44 = vmul.f32 %v4804_v43, %v1376_v41  ;;  %v1707_v19 = vrot.slane %v5613_v39, 6  ;;  %v4908_v41 = vld [vmem:[#allocation5] sm:$0xff] }
 0xff4   :  { %1605 = vrot.lane.b32.xlu0 %v1604_v40, %s5146_s11  ;;  %v4907_v40 = vld [vmem:[#allocation5 + $0x8] sm:$0xff] }
 0xff8   :  { %1380 = vrot.lane.b32.xlu0 %v1378_v44, %s5145_s4 }
 0xffc   :  { %1498 = vrot.lane.b32.xlu0 %v5613_v39, %s5146_s11  ;;  %v4906_v39 = vld [vmem:[#allocation5 + $0x10] sm:$0xff] }
0x1066   :  { %v1606_v45 = vpop.permute.xlu0 %1605 }
0x1067   :  { %4349 = vmatmul.mubr.msk.f32.vlgmr.msra.gmra.mxu0 %vm343_vm3, %v1606_v45 }
0x1068   :  { %4352 = vmatpush3.msra.mxu0 %v5328_v26  ;;  %4367 = vmatprep.mubr.msk.f32.mxu0 %vm5143_vm0, %v6546_v0 }
0x1069   :  { %4353 = vmatprep.subr.mxu0 %v6546_v0 }
0x106a   :  { %v1381_v46 = vpop.permute.xlu0 %1380  ;;  %4354 = vmatpush3.msra.mxu0 %v5330_v27  ;;  %v1385_v27 = vsub.f32 1.0, %v4804_v43 }
0x106b   :  { %v1383_v47 = vadd.f32 %v1381_v46, %v1365_v7  ;;  %4355 = vmatprep.subr.mxu0 %v6546_v0 }
0x106c   :  { %4356 = vmatpush3.msra.mxu0 %v5334_v28 }
0x106d   :  { %4805 = vtanh.f32 %v1383_v47  ;;  %4357 = vmatprep.subr.mxu0 %v6546_v0 }
0x106e   :  { %4358 = vmatpush3.msra.mxu0 %v5338_v29  ;;  %v1391_v29 = vmul.f32 %v4804_v43, %v5593_v11  ;;  %v1499_v48 = vpop.permute.xlu0 %1498 }
0x106f   :  { %4359 = vmatprep.subr.mxu0 %v6546_v0 }
0x1070   :  { %4360 = vmatpush3.msra.mxu0 %v5342_v30 }
0x1071   :  { %4361 = vmatprep.subr.mxu0 %v6546_v0 }
0x1072   :  { %4362 = vmatpush3.msra.mxu0 %v5346_v32 }
0x1073   :  { %4363 = vmatprep.subr.mxu0 %v6546_v0 }
0x1074   :  { %4364 = vmatpush3.msra.mxu0 %v5351_v33 }
0x1075   :  { %4365 = vmatprep.subr.mxu0 %v6546_v0 }
0x1076   :  { %4366 = vmatpush3.msra.mxu0 %v5357_v34  ;;  %v4897_v34 = vld [vmem:[#allocation2 + $0x18] sm:$0xff] }
0x1077   :  { %2038 = vmatprep.subr.mxu0 %v6546_v0 }
0x107a   :  { %v4806_v26 = vpop.eup %4805 }
0x107b   :  { %1387 = vrot.lane.b32.xlu1 %v4806_v26, %s5146_s11 }
0x10ed   :  { %v1388_v28 = vpop.permute.xlu1 %1387 }
0x10ee   :  { %v1390_v30 = vmul.f32 %v1388_v28, %v1385_v27 }
0x10f0   :  { %v5641_v24 = vadd.f32 %v1391_v29, %v1390_v30 }
0x10f2   :  { %v1502_v32 = vrot.slane %v5641_v24, 6 }
0x10f4   :  { %v1504_v33 = vsel %vm343_vm3, %v1499_v48, %v1502_v32 }
0x10f5   :  { %v1506_v49 = vrot.slane %v1504_v33, 2 }
0x10f7   :  { %4338 = vmatmul.mubr.msk.f32.vlgmr.msra.gmra.mxu1 %vm449_vm4, %v1506_v49 }
0x10f8   :  { %4371 = vmatpush3.msra.mxu1 %v4897_v34  ;;  %4378 = vmatprep.mubr.msk.f32.mxu1 %vm5143_vm0, %v6546_v0 }
0x10f9   :  { %4372 = vmatprep.subr.mxu1 %v6546_v0 }
0x10fa   :  { %4373 = vmatpush3.msra.mxu1 %v4898_v50 }
0x10fb   :  { %4374 = vmatprep.subr.mxu1 %v6546_v0 }
0x10fc   :  { %4375 = vmatpush3.msra.mxu1 %v4899_v51 }
0x10fd   :  { %4376 = vmatprep.subr.mxu1 %v6546_v0 }
0x10fe   :  { %4377 = vmatpush3.msra.mxu1 %v4900_v52 }
0x10ff   :  { %4381 = vmatprep.subr.mxu1 %v6546_v0 }
0x1127   :  { %v1675_v55 = vpop.f32.mrf.mxu0 }
0x1128   :  { %v1680_v56 = vrot.slane %v1675_v55, 4 }
0x1129   :  { %v4350_v57 = vpop.f32.mrf.mxu0 }
0x112a   :  { %v1682_v58 = vadd.f32 %v1680_v56, %v5315_v10 }
0x112c   :  { %v1683_v53 = vadd.f32 %v5322_v13, %v1682_v58 }
0x112e   :  { %1691 = vrot.lane.b32.xlu1 %v1683_v53, %s5144_s18  ;;  %v3852_v54 = vmul.f32 -1.442695, %v1683_v53 }
0x1130   :  { %4807 = vpow2.f32 %v3852_v54 }
0x113d   :  { %v4808_v59 = vpop.eup %4807 }
0x113e   :  { %v1687_v60 = vadd.f32 1.0, %v4808_v59 }
0x1140   :  { %4809 = vrcp.f32 %v1687_v60 }
0x114d   :  { %v4810_v61 = vpop.eup %4809 }
0x114e   :  { %v1701_v18 = vsub.f32 1.0, %v4810_v61  ;;  %v1709_v20 = vmul.f32 %v4810_v61, %v1707_v19  ;;  %v5736_v19 = vld [vmem:[#allocation7 + $0x30] sm:$0xff] }
0x11a0   :  { %v1692_v62 = vpop.permute.xlu1 %1691 }
0x11a1   :  { %v1694_v63 = vmul.f32 %v4810_v61, %v1692_v62 }
0x11a3   :  { %1696 = vrot.lane.b32.xlu0 %v1694_v63, %s5145_s4 }
0x11b7   :  { %v1575_v1 = vpop.f32.mrf.mxu1 }
0x11b8   :  { %v1576_v3 = vadd.f32 %v5399_v42, %v1575_v1 }
0x11b9   :  { %v4339_v4 = vpop.f32.mrf.mxu1 }
0x11ba   :  { %1586 = vrot.lane.b32.xlu0 %v1576_v3, %s5144_s18  ;;  %v3850_v8 = vmul.f32 -1.442695, %v1576_v3 }
0x11bc   :  { %4811 = vpow2.f32 %v3850_v8  ;;  %v5701_v8 = vld [vmem:[#allocation7 + $0x78] sm:$0xff] }
0x11c9   :  { %v4812_v11 = vpop.eup %4811 }
0x11ca   :  { %v1582_v14 = vadd.f32 1.0, %v4812_v11  ;;  %v5711_v11 = vld [vmem:[#allocation7 + $0x60] sm:$0xff] }
0x1215   :  { %v1697_v13 = vpop.permute.xlu0 %1696 }
0x1216   :  { %v1699_v9 = vadd.f32 %v1697_v13, %v1683_v53  ;;  %v5703_v13 = vld [vmem:[#allocation7 + $0x70] sm:$0xff] }
0x1218   :  { %4813 = vtanh.f32 %v1699_v9  ;;  %v5707_v9 = vld [vmem:[#allocation7 + $0x68] sm:$0xff] }
0x1219   :  { %4815 = vrcp.f32 %v1582_v14  ;;  %v5715_v14 = vld [vmem:[#allocation7 + $0x58] sm:$0xff] }
0x1225   :  { %v4814_v15 = vpop.eup %4813 }
0x1226   :  { %1703 = vrot.lane.b32.xlu1 %v4814_v15, %s5146_s11  ;;  %v4816_v2 = vpop.eup %4815 }
0x1227   :  { %v1596_v43 = vsub.f32 1.0, %v4816_v2  ;;  %v1602_v45 = vmul.f32 %v4816_v2, %v5641_v24  ;;  %v4909_v24 = vld [vmem:[%s6528_s5] ss:$0 sm:$0xff] }
0x122c   :  { %v1587_v16 = vpop.permute.xlu0 %1586 }
0x122d   :  { %v1589_v17 = vmul.f32 %v4816_v2, %v1587_v16  ;;  %v5719_v2 = vld [vmem:[#allocation7 + $0x50] sm:$0xff]  ;;  %v5724_v16 = vld [vmem:[#allocation7 + $0x48] sm:$0xff] }
0x122f   :  { %1591 = vrot.lane.b32.xlu0 %v1589_v17, %s5145_s4  ;;  %v5728_v17 = vld [vmem:[#allocation7 + $0x40] sm:$0xff] }
0x1298   :  { %v1704_v5 = vpop.permute.xlu1 %1703 }
0x1299   :  { %v1706_v21 = vmul.f32 %v1704_v5, %v1701_v18  ;;  %v5732_v18 = vld [vmem:[#allocation7 + $0x38] sm:$0xff]  ;;  %v5740_v5 = vld [vmem:[#allocation7 + $0x28] sm:$0xff] }
0x129b   :  { %v5661_v6 = vadd.f32 %v1709_v20, %v1706_v21  ;;  %v5744_v20 = vld [vmem:[#allocation7 + $0x20] sm:$0xff]  ;;  %v5748_v21 = vld [vmem:[#allocation7 + $0x18] sm:$0xff] }
0x129d   :  { %1712 = vrot.lane.b32.xlu0 %v5661_v6, %s5146_s11  ;;  %v1818_v22 = vrot.slane %v5661_v6, 4 }
0x129f   :  { %1819 = vrot.lane.b32.xlu1 %v1818_v22, %s5146_s11  ;;  %v5752_v22 = vld [vmem:[#allocation7 + $0x10] sm:$0xff] }
0x12a1   :  { %v1592_v7 = vpop.permute.xlu0 %1591 }
0x12a2   :  { %v1594_v23 = vadd.f32 %v1592_v7, %v1576_v3  ;;  %v5756_v7 = vld [vmem:[#allocation7 + $0x8] sm:$0xff] }
0x12a4   :  { %4817 = vtanh.f32 %v1594_v23  ;;  %v5760_v23 = vld [vmem:[#allocation7] sm:$0xff] }
0x12b1   :  { %v4818_v25 = vpop.eup %4817 }
0x12b2   :  { %1598 = vrot.lane.b32.xlu1 %v4818_v25, %s5146_s11  ;;  %v5764_v25 = vld [vmem:[#allocation7 + $0x98] sm:$0xff] }
0x130f   :  { %v1713_v27 = vpop.permute.xlu0 %1712 }
0x1311   :  { %v1820_v31 = vpop.permute.xlu1 %1819 }
0x1312   :  { %4379 = vmatmul.mubr.msk.f32.vlgmr.msra.gmra.mxu1 %vm343_vm3, %v1820_v31  ;;  %v5768_v31 = vld [vmem:[#allocation7 + $0x90] sm:$0xff] }
0x1313   :  { %4382 = vmatpush3.msra.mxu1 %v4901_v35  ;;  %4397 = vmatprep.mubr.msk.f32.mxu1 %vm5143_vm0, %v6546_v0  ;;  %v5772_v35 = vld [vmem:[#allocation7 + $0x88] sm:$0xff] }
0x1314   :  { %4383 = vmatprep.subr.mxu1 %v6546_v0 }
0x1315   :  { %4384 = vmatpush3.msra.mxu1 %v4902_v36  ;;  %v5778_v36 = vld [vmem:[#allocation7 + $0x80] sm:$0xff] }
0x1316   :  { %4385 = vmatprep.subr.mxu1 %v6546_v0 }
0x1317   :  { %4386 = vmatpush3.msra.mxu1 %v4903_v37 }
0x1318   :  { %4387 = vmatprep.subr.mxu1 %v6546_v0 }
0x1319   :  { %4388 = vmatpush3.msra.mxu1 %v4904_v38  ;;  %v1921_v38 = vrot.slane %v5661_v6, 6 }
0x131a   :  { %4389 = vmatprep.subr.mxu1 %v6546_v0 }
0x131b   :  { %4390 = vmatpush3.msra.mxu1 %v4905_v12 }
0x131c   :  { %4391 = vmatprep.subr.mxu1 %v6546_v0 }
0x131d   :  { %4392 = vmatpush3.msra.mxu1 %v4906_v39 }
0x131e   :  { %4393 = vmatprep.subr.mxu1 %v6546_v0 }
0x131f   :  { %4394 = vmatpush3.msra.mxu1 %v4907_v40 }
0x1320   :  { %4395 = vmatprep.subr.mxu1 %v6546_v0 }
0x1321   :  { %4396 = vmatpush3.msra.mxu1 %v4908_v41 }
0x1322   :  { %4400 = vmatprep.subr.mxu1 %v6546_v0 }
0x1324   :  { %v1599_v44 = vpop.permute.xlu1 %1598 }
0x1325   :  { %v1601_v46 = vmul.f32 %v1599_v44, %v1596_v43 }
0x1327   :  { %v5680_v47 = vadd.f32 %v1602_v45, %v1601_v46 }
0x1329   :  { %v1716_v26 = vrot.slane %v5680_v47, 4 }
0x132b   :  { %v1718_v28 = vsel %vm343_vm3, %v1713_v27, %v1716_v26  ;;  %v2032_v27 = vld [vmem:[%s6524_s1] sm:$0x3] }
0x132c   :  { %v1720_v29 = vrot.slane %v1718_v28, 4 }
0x132e   :  { %4368 = vmatmul.mubr.msk.f32.vlgmr.msra.gmra.mxu0 %vm449_vm4, %v1720_v29 }
0x132f   :  { %2039 = vmatpush1.msra.mxu0 %v5701_v8 }
0x1330   :  { %2040 = vmatprep.subr.mxu0 %v6546_v0 }
0x1331   :  { %2041 = vmatpush1.msra.mxu0 %v5703_v13 }
0x1332   :  { %2042 = vmatprep.subr.mxu0 %v6546_v0 }
0x1333   :  { %2043 = vmatpush1.msra.mxu0 %v5707_v9 }
0x1334   :  { %2044 = vmatprep.subr.mxu0 %v6546_v0 }
0x1335   :  { %2045 = vmatpush1.msra.mxu0 %v5711_v11 }
0x1336   :  { %2046 = vmatprep.subr.mxu0 %v6546_v0 }
0x1337   :  { %2047 = vmatpush1.msra.mxu0 %v5715_v14 }
0x1338   :  { %2048 = vmatprep.subr.mxu0 %v6546_v0 }
0x1339   :  { %2049 = vmatpush1.msra.mxu0 %v5719_v2 }
0x133a   :  { %2050 = vmatprep.subr.mxu0 %v6546_v0 }
0x133b   :  { %2051 = vmatpush1.msra.mxu0 %v5724_v16 }
0x133c   :  { %2052 = vmatprep.subr.mxu0 %v6546_v0 }
0x133d   :  { %2053 = vmatpush1.msra.mxu0 %v5728_v17 }
0x133e   :  { %2054 = vmatprep.subr.mxu0 %v6546_v0 }
0x133f   :  { %2055 = vmatpush1.msra.mxu0 %v5732_v18 }
0x1340   :  { %2056 = vmatprep.subr.mxu0 %v6546_v0 }
0x1341   :  { %2057 = vmatpush1.msra.mxu0 %v5736_v19 }
0x1342   :  { %2058 = vmatprep.subr.mxu0 %v6546_v0 }
0x1343   :  { %2059 = vmatpush1.msra.mxu0 %v5740_v5 }
0x1344   :  { %2060 = vmatprep.subr.mxu0 %v6546_v0 }
0x1345   :  { %2061 = vmatpush1.msra.mxu0 %v5744_v20 }
0x1346   :  { %2062 = vmatprep.subr.mxu0 %v6546_v0 }
0x1347   :  { %2063 = vmatpush1.msra.mxu0 %v5748_v21 }
0x1348   :  { %2064 = vmatprep.subr.mxu0 %v6546_v0 }
0x1349   :  { %2065 = vmatpush1.msra.mxu0 %v5752_v22 }
0x134a   :  { %2066 = vmatprep.subr.mxu0 %v6546_v0 }
0x134b   :  { %2067 = vmatpush1.msra.mxu0 %v5756_v7 }
0x134c   :  { %2068 = vmatprep.subr.mxu0 %v6546_v0 }
0x134d   :  { %2069 = vmatpush1.msra.mxu0 %v5760_v23 }
0x134e   :  { %2094 = vmatprep.subr.mxu0 %v6546_v0 }
0x134f   :  { %2095 = vmatpush2.msra.mxu0 %v5764_v25 }
0x1350   :  { %2096 = vmatprep.subr.mxu0 %v6546_v0 }
0x1351   :  { %2097 = vmatpush2.msra.mxu0 %v5768_v31 }
0x1352   :  { %2098 = vmatprep.subr.mxu0 %v6546_v0 }
0x1353   :  { %2099 = vmatpush2.msra.mxu0 %v5772_v35 }
0x1354   :  { %2100 = vmatprep.subr.mxu0 %v6546_v0 }
0x1355   :  { %2101 = vmatpush2.msra.mxu0 %v5778_v36 }
0x1356   :  { %2385 = vmatprep.subr.mxu0 %v6546_v0 }
0x13d2   :  { %v1889_v30 = vpop.f32.mrf.mxu1 }
0x13d3   :  { %v1894_v32 = vrot.slane %v1889_v30, 2 }
0x13d4   :  { %v4380_v48 = vpop.f32.mrf.mxu1 }
0x13d5   :  { %v1896_v33 = vadd.f32 %v1894_v32, %v5315_v10  ;;  %v5847_v48 = vld [vmem:[#allocation8] ss:$0 sm:$0xff] }
0x13d6   :  { %6557 = vst [vmem:[#allocation20_spill] sm:$0xff] %v5847_v48 }
0x13d7   :  { %v1897_v49 = vadd.f32 %v4909_v24, %v1896_v33 }
0x13d9   :  { %1905 = vrot.lane.b32.xlu1 %v1897_v49, %s5144_s18  ;;  %v3856_v52 = vmul.f32 -1.442695, %v1897_v49 }
0x13db   :  { %4819 = vpow2.f32 %v3856_v52 }
0x13e8   :  { %v4820_v55 = vpop.eup %4819 }
0x13e9   :  { %v1901_v56 = vadd.f32 1.0, %v4820_v55 }
0x13eb   :  { %4821 = vrcp.f32 %v1901_v56 }
0x13ee   :  { %v1789_v34 = vpop.f32.mrf.mxu0 }
0x13ef   :  { %v1790_v50 = vadd.f32 %v5399_v42, %v1789_v34 }
0x13f0   :  { %v4369_v51 = vpop.f32.mrf.mxu0 }
0x13f1   :  { %1800 = vrot.lane.b32.xlu1 %v1790_v50, %s5144_s18  ;;  %v3854_v57 = vmul.f32 -1.442695, %v1790_v50 }
0x13f3   :  { %4823 = vpow2.f32 %v3854_v57 }
0x13f8   :  { %v5692_v10 = vpop.eup %4821 }
0x13f9   :  { %v1915_v37 = vsub.f32 1.0, %v5692_v10  ;;  %v1923_v39 = vmul.f32 %v5692_v10, %v1921_v38  ;;  %v5863_v38 = vld [vmem:[#allocation10 + $0x28] sm:$0xff] }
0x1400   :  { %v4824_v54 = vpop.eup %4823 }
0x1401   :  { %v1796_v59 = vadd.f32 1.0, %v4824_v54 }
0x1403   :  { %4825 = vrcp.f32 %v1796_v59 }
0x1410   :  { %v5696_v42 = vpop.eup %4825 }
0x1411   :  { %v1810_v45 = vsub.f32 1.0, %v5696_v42  ;;  %v1816_v6 = vmul.f32 %v5696_v42, %v5680_v47 }
0x144b   :  { %v1906_v58 = vpop.permute.xlu1 %1905 }
0x144c   :  { %v1908_v53 = vmul.f32 %v5692_v10, %v1906_v58 }
0x144e   :  { %1910 = vrot.lane.b32.xlu0 %v1908_v53, %s5145_s4 }
0x1463   :  { %v1801_v60 = vpop.permute.xlu1 %1800 }
0x1464   :  { %v1803_v61 = vmul.f32 %v5696_v42, %v1801_v60 }
0x1466   :  { %1805 = vrot.lane.b32.xlu1 %v1803_v61, %s5145_s4 }
0x14c0   :  { %v1911_v62 = vpop.permute.xlu0 %1910 }
0x14c1   :  { %v1913_v63 = vadd.f32 %v1911_v62, %v1897_v49 }
0x14c3   :  { %4827 = vtanh.f32 %v1913_v63 }
0x14d0   :  { %v4828_v1 = vpop.eup %4827 }
0x14d1   :  { %1917 = vrot.lane.b32.xlu0 %v4828_v1, %s5146_s11 }
0x14d8   :  { %v1806_v3 = vpop.permute.xlu1 %1805 }
0x14d9   :  { %v1808_v4 = vadd.f32 %v1806_v3, %v1790_v50  ;;  %v4910_v50 = vld [vmem:[%s6530_s7] ss:$0 sm:$0xff] }
0x14db   :  { %4829 = vtanh.f32 %v1808_v4 }
0x14e8   :  { %v4830_v15 = vpop.eup %4829 }
0x14e9   :  { %1812 = vrot.lane.b32.xlu1 %v4830_v15, %s5146_s11  ;;  %v5857_v15 = vld [vmem:[#allocation10 + $0x38] sm:$0xff] }
0x1543   :  { %v1918_v12 = vpop.permute.xlu0 %1917 }
0x1544   :  { %v1920_v40 = vmul.f32 %v1918_v12, %v1915_v37  ;;  %v5859_v37 = vld [vmem:[#allocation10 + $0x30] sm:$0xff] }
0x1546   :  { %v5785_v41 = vadd.f32 %v1923_v39, %v1920_v40  ;;  %v5867_v39 = vld [vmem:[#allocation10 + $0x20] sm:$0xff]  ;;  %v5872_v40 = vld [vmem:[#allocation10 + $0x18] sm:$0xff] }
0x1548   :  { %v2033_v43 = vrot.slane %v5785_v41, 6 }
0x154a   :  { %2034 = vrot.lane.b32.xlu0 %v2033_v43, %s5146_s11 }
0x154e   :  { %1926 = vrot.lane.b32.xlu0 %v5785_v41, %s5146_s11  ;;  %v5903_v41 = vld [vmem:[#allocation11] ss:$0 sm:$0xff] }
0x154f   :  { %6558 = vst [vmem:[#allocation21_spill] sm:$0xff] %v5903_v41 }
0x155b   :  { %v1813_v44 = vpop.permute.xlu1 %1812 }
0x155c   :  { %v1815_v46 = vmul.f32 %v1813_v44, %v1810_v45  ;;  %v5876_v44 = vld [vmem:[#allocation10 + $0x10] sm:$0xff] }
0x155e   :  { %v5796_v26 = vadd.f32 %v1816_v6, %v1815_v46  ;;  %v5880_v46 = vld [vmem:[#allocation10 + $0x8] sm:$0xff]  ;;  %v5887_v6 = vld [vmem:[#allocation10] sm:$0xff] }
0x1560   :  { %v1930_v29 = vrot.slane %v5796_v26, 2 }
0x15bc   :  { %v2035_v28 = vpop.permute.xlu0 %2034 }
0x15bd   :  { %3859 = vmatprep.mubr.msk.f32.mxu0 %vm343_vm3, %v2035_v28 }
0x15be   :  { %2103 = vmatmul.mubr.f32.vlgmr.msra.gmra.mxu0 %v2032_v27 }
0x15bf   :  { %2386 = vmatpush1.msra.mxu0 %v5701_v8 }
0x15c0   :  { %v1927_v30 = vpop.permute.xlu0 %1926  ;;  %2387 = vmatprep.subr.mxu0 %v6546_v0 }
0x15c1   :  { %v1932_v32 = vsel %vm343_vm3, %v1927_v30, %v1930_v29  ;;  %2388 = vmatpush1.msra.mxu0 %v5703_v13 }
0x15c2   :  { %v1934_v47 = vrot.slane %v1932_v32, 6  ;;  %2389 = vmatprep.subr.mxu0 %v6546_v0 }
0x15c3   :  { %2390 = vmatpush1.msra.mxu0 %v5707_v9 }
0x15c4   :  { %4398 = vmatmul.mubr.msk.f32.vlgmr.msra.gmra.mxu1 %vm449_vm4, %v1934_v47  ;;  %2391 = vmatprep.subr.mxu0 %v6546_v0 }
0x15c5   :  { %4416 = vmatprep.mubr.msk.f32.mxu1 %vm5143_vm0, %v6546_v0  ;;  %2392 = vmatpush1.msra.mxu0 %v5711_v11 }
0x15c6   :  { %2393 = vmatprep.subr.mxu0 %v6546_v0  ;;  %4401 = vmatpush3.msra.mxu1 %v5857_v15 }
0x15c7   :  { %2394 = vmatpush1.msra.mxu0 %v5715_v14  ;;  %4402 = vmatprep.subr.mxu1 %v6546_v0 }
0x15c8   :  { %2395 = vmatprep.subr.mxu0 %v6546_v0  ;;  %4403 = vmatpush3.msra.mxu1 %v5859_v37 }
0x15c9   :  { %2396 = vmatpush1.msra.mxu0 %v5719_v2  ;;  %4404 = vmatprep.subr.mxu1 %v6546_v0 }
0x15ca   :  { %2397 = vmatprep.subr.mxu0 %v6546_v0  ;;  %4405 = vmatpush3.msra.mxu1 %v5863_v38 }
0x15cb   :  { %2398 = vmatpush1.msra.mxu0 %v5724_v16  ;;  %4406 = vmatprep.subr.mxu1 %v6546_v0 }
0x15cc   :  { %2399 = vmatprep.subr.mxu0 %v6546_v0  ;;  %4407 = vmatpush3.msra.mxu1 %v5867_v39 }
0x15cd   :  { %2400 = vmatpush1.msra.mxu0 %v5728_v17  ;;  %4408 = vmatprep.subr.mxu1 %v6546_v0 }
0x15ce   :  { %2401 = vmatprep.subr.mxu0 %v6546_v0  ;;  %4409 = vmatpush3.msra.mxu1 %v5872_v40 }
0x15cf   :  { %2402 = vmatpush1.msra.mxu0 %v5732_v18  ;;  %4410 = vmatprep.subr.mxu1 %v6546_v0 }
0x15d0   :  { %2403 = vmatprep.subr.mxu0 %v6546_v0  ;;  %4411 = vmatpush3.msra.mxu1 %v5876_v44 }
0x15d1   :  { %2404 = vmatpush1.msra.mxu0 %v5736_v19  ;;  %4412 = vmatprep.subr.mxu1 %v6546_v0 }
0x15d2   :  { %2405 = vmatprep.subr.mxu0 %v6546_v0  ;;  %4413 = vmatpush3.msra.mxu1 %v5880_v46 }
0x15d3   :  { %2406 = vmatpush1.msra.mxu0 %v5740_v5  ;;  %4414 = vmatprep.subr.mxu1 %v6546_v0 }
0x15d4   :  { %2407 = vmatprep.subr.mxu0 %v6546_v0  ;;  %4415 = vmatpush3.msra.mxu1 %v5887_v6 }
0x15d5   :  { %2408 = vmatpush1.msra.mxu0 %v5744_v20  ;;  %4419 = vmatprep.subr.mxu1 %v6546_v0 }
0x15d6   :  { %2409 = vmatprep.subr.mxu0 %v6546_v0 }
0x15d7   :  { %2410 = vmatpush1.msra.mxu0 %v5748_v21 }
0x15d8   :  { %2411 = vmatprep.subr.mxu0 %v6546_v0 }
0x15d9   :  { %2412 = vmatpush1.msra.mxu0 %v5752_v22 }
0x15da   :  { %2413 = vmatprep.subr.mxu0 %v6546_v0 }
0x15db   :  { %2414 = vmatpush1.msra.mxu0 %v5756_v7 }
0x15dc   :  { %2415 = vmatprep.subr.mxu0 %v6546_v0 }
0x15dd   :  { %2416 = vmatpush1.msra.mxu0 %v5760_v23 }
0x15de   :  { %2441 = vmatprep.subr.mxu0 %v6546_v0 }
0x15df   :  { %2442 = vmatpush2.msra.mxu0 %v5764_v25 }
0x15e0   :  { %2443 = vmatprep.subr.mxu0 %v6546_v0 }
0x15e1   :  { %2444 = vmatpush2.msra.mxu0 %v5768_v31 }
0x15e2   :  { %2445 = vmatprep.subr.mxu0 %v6546_v0 }
0x15e3   :  { %2446 = vmatpush2.msra.mxu0 %v5772_v35 }
0x15e4   :  { %2447 = vmatprep.subr.mxu0 %v6546_v0 }
0x15e5   :  { %2448 = vmatpush2.msra.mxu0 %v5778_v36 }
0x15e6   :  { %4484 = vmatprep.subr.mxu0 %v6546_v0 }
0x167e   :  { %v2104_v33 = vpop.f32.mrf.mxu0 }
0x167f   :  { %v2105_v24 = vadd.f32 %v5847_v48, %v2104_v33 }
0x1680   :  { %v2106_v49 = vpop.f32.mrf.mxu0 }
0x1681   :  { %2115 = vrot.lane.b32.xlu1 %v2105_v24, %s5144_s18  ;;  %v3860_v55 = vmul.f32 -1.442695, %v2105_v24 }
0x1683   :  { %4831 = vpow2.f32 %v3860_v55 }
0x1684   :  { %v2003_v34 = vpop.f32.mrf.mxu1 }
0x1685   :  { %v2004_v51 = vadd.f32 %v4910_v50, %v2003_v34 }
0x1686   :  { %v4399_v52 = vpop.f32.mrf.mxu1 }
0x1687   :  { %2014 = vrot.lane.b32.xlu0 %v2004_v51, %s5144_s18  ;;  %v3858_v56 = vmul.f32 -1.442695, %v2004_v51 }
0x1689   :  { %4833 = vpow2.f32 %v3858_v56 }
0x1690   :  { %v4832_v57 = vpop.eup %4831 }
0x1691   :  { %v2111_v10 = vadd.f32 1.0, %v4832_v57 }
0x1693   :  { %4835 = vrcp.f32 %v2111_v10 }
0x1696   :  { %v4834_v58 = vpop.eup %4833 }
0x1697   :  { %v2010_v53 = vadd.f32 1.0, %v4834_v58 }
0x1699   :  { %4837 = vrcp.f32 %v2010_v53 }
0x16a0   :  { %v4836_v54 = vpop.eup %4835 }
0x16a1   :  { %v2125_v27 = vsub.f32 1.0, %v4836_v54  ;;  %v2132_v29 = vmul.f32 %v4836_v54, %v2033_v43 }
0x16a6   :  { %v4838_v60 = vpop.eup %4837 }
0x16a7   :  { %v2024_v33 = vsub.f32 1.0, %v4838_v60  ;;  %v2030_v49 = vmul.f32 %v4838_v60, %v5796_v26 }
0x16f3   :  { %v2116_v59 = vpop.permute.xlu1 %2115 }
0x16f4   :  { %v2118_v42 = vmul.f32 %v4836_v54, %v2116_v59 }
0x16f6   :  { %2120 = vrot.lane.b32.xlu1 %v2118_v42, %s5145_s4  ;;  %v5911_v42 = vld [vmem:[%s6535_s12 + $0x18] sm:$0xff] }
0x16f9   :  { %v2015_v61 = vpop.permute.xlu0 %2014 }
0x16fa   :  { %v2017_v62 = vmul.f32 %v4838_v60, %v2015_v61  ;;  %v5916_v60 = vld [vmem:[%s6535_s12 + $0x10] sm:$0xff]  ;;  %v5923_v61 = vld [vmem:[%s6535_s12 + $0x8] sm:$0xff] }
0x16fb   :  { %6559 = vst [vmem:[#allocation22_spill] sm:$0xff] %v5916_v60  ;;  %6560 = vst [vmem:[#allocation23_spill] sm:$0xff] %v5923_v61 }
0x16fc   :  { %2019 = vrot.lane.b32.xlu0 %v2017_v62, %s5145_s4  ;;  %v5930_v62 = vld [vmem:[%s6535_s12] sm:$0xff] }
0x16fd   :  { %6561 = vst [vmem:[#allocation24_spill] sm:$0xff] %v5930_v62 }
0x1768   :  { %v2121_v63 = vpop.permute.xlu1 %2120 }
0x1769   :  { %v2123_v1 = vadd.f32 %v2121_v63, %v2105_v24 }
0x176b   :  { %4839 = vtanh.f32 %v2123_v1 }
0x176e   :  { %v2020_v3 = vpop.permute.xlu0 %2019 }
0x176f   :  { %v2022_v4 = vadd.f32 %v2020_v3, %v2004_v51 }
0x1771   :  { %4841 = vtanh.f32 %v2022_v4 }
0x1778   :  { %v4840_v12 = vpop.eup %4839 }
0x1779   :  { %2127 = vrot.lane.b32.xlu1 %v4840_v12, %s5146_s11 }
0x177e   :  { %v4842_v45 = vpop.eup %4841 }
0x177f   :  { %2026 = vrot.lane.b32.xlu0 %v4842_v45, %s5146_s11 }
0x17eb   :  { %v2128_v28 = vpop.permute.xlu1 %2127 }
0x17ec   :  { %v2130_v30 = vmul.f32 %v2128_v28, %v2125_v27  ;;  %v5941_v27 = vld [vmem:[#allocation13 + $0x78] sm:$0xff] }
0x17ee   :  { %v5893_v32 = vadd.f32 %v2132_v29, %v2130_v30  ;;  %v5944_v29 = vld [vmem:[#allocation13 + $0x70] sm:$0xff]  ;;  %v5950_v30 = vld [vmem:[#allocation13 + $0x68] sm:$0xff] }
0x17f0   :  { %2135 = vrot.lane.b32.xlu1 %v5893_v32, %s5146_s11 }
0x17f1   :  { %v2027_v47 = vpop.permute.xlu0 %2026 }
0x17f2   :  { %v2029_v24 = vmul.f32 %v2027_v47, %v2024_v33  ;;  %v5954_v47 = vld [vmem:[#allocation13 + $0x60] sm:$0xff]  ;;  %v5958_v33 = vld [vmem:[#allocation13 + $0x58] sm:$0xff] }
0x17f4   :  { %v2031_v34 = vadd.f32 %v2030_v49, %v2029_v24  ;;  %v5962_v24 = vld [vmem:[#allocation13 + $0x50] sm:$0xff]  ;;  %v5966_v49 = vld [vmem:[#allocation13 + $0x48] sm:$0xff] }
0x1862   :  { %v2136_v50 = vpop.permute.xlu1 %2135 }
0x1863   :  { %v2138_v51 = vsel %vm343_vm3, %v2136_v50, %v2031_v34  ;;  %3864 = vmatprep.mubr.msk.f32.mxu0 %vm343_vm3, %v2136_v50  ;;  %v5974_v50 = vld [vmem:[#allocation13 + $0x38] sm:$0xff] }
0x1864   :  { %4417 = vmatmul.mubr.msk.f32.vlgmr.msra.gmra.mxu1 %vm449_vm4, %v2138_v51  ;;  %v5978_v51 = vld [vmem:[#allocation13 + $0x30] sm:$0xff] }
0x1865   :  { %4427 = vmatprep.mubr.msk.f32.mxu1 %vm5143_vm0, %v6546_v0  ;;  %4420 = vmatpush3.msra.mxu1 %v5911_v42 }
0x1866   :  { %4421 = vmatprep.subr.mxu1 %v6546_v0 }
0x1867   :  { %4422 = vmatpush3.msra.mxu1 %v5916_v60 }
0x1868   :  { %4423 = vmatprep.subr.mxu1 %v6546_v0 }
0x1869   :  { %4424 = vmatpush3.msra.mxu1 %v5923_v61 }
0x186a   :  { %4425 = vmatprep.subr.mxu1 %v6546_v0 }
0x186b   :  { %4426 = vmatpush3.msra.mxu1 %v5930_v62 }
0x186c   :  { %4430 = vmatprep.subr.mxu1 %v6546_v0 }
0x1924   :  { %v2208_v43 = vpop.f32.mrf.mxu1 }
0x1925   :  { %v2209_v52 = vadd.f32 %v5903_v41, %v2208_v43  ;;  %v5982_v43 = vld [vmem:[#allocation13 + $0x28] sm:$0xff] }
0x1926   :  { %v4418_v55 = vpop.f32.mrf.mxu1 }
0x1927   :  { %2219 = vrot.lane.b32.xlu0 %v2209_v52, %s5144_s18  ;;  %v3862_v26 = vmul.f32 -1.442695, %v2209_v52  ;;  %v5990_v55 = vld [vmem:[#allocation13 + $0x18] sm:$0xff] }
0x1929   :  { %4843 = vpow2.f32 %v3862_v26  ;;  %v5996_v26 = vld [vmem:[#allocation13 + $0x10] sm:$0xff] }
0x1936   :  { %v4844_v56 = vpop.eup %4843 }
0x1937   :  { %v2215_v57 = vadd.f32 1.0, %v4844_v56  ;;  %v6000_v56 = vld [vmem:[#allocation13 + $0x8] sm:$0xff] }
0x1939   :  { %4845 = vrcp.f32 %v2215_v57  ;;  %v6004_v57 = vld [vmem:[#allocation13] sm:$0xff] }
0x193a   :  { %6562 = vst [vmem:[#allocation25_spill] sm:$0xff] %v6004_v57 }
0x1946   :  { %v4846_v10 = vpop.eup %4845 }
0x1947   :  { %v2229_v1 = vsub.f32 1.0, %v4846_v10  ;;  %v2235_v4 = vmul.f32 %v4846_v10, %v2031_v34  ;;  %v5970_v34 = vld [vmem:[#allocation13 + $0x40] sm:$0xff] }
0x1999   :  { %v2220_v58 = vpop.permute.xlu0 %2219 }
0x199a   :  { %v2222_v53 = vmul.f32 %v4846_v10, %v2220_v58  ;;  %v6011_v10 = vld [vmem:[%s6536_s13] ss:$0 sm:$0xff] }
0x199c   :  { %2224 = vrot.lane.b32.xlu1 %v2222_v53, %s5145_s4 }
0x1a0e   :  { %v2225_v54 = vpop.permute.xlu1 %2224 }
0x1a0f   :  { %v2227_v59 = vadd.f32 %v2225_v54, %v2209_v52  ;;  %v5986_v52 = vld [vmem:[#allocation13 + $0x20] sm:$0xff] }
0x1a11   :  { %4847 = vtanh.f32 %v2227_v59 }
0x1a1e   :  { %v4848_v63 = vpop.eup %4847 }
0x1a1f   :  { %2231 = vrot.lane.b32.xlu0 %v4848_v63, %s5146_s11  ;;  %v6035_v63 = vld [vmem:[%s6538_s15] ss:$0 sm:$0xff] }
0x1a91   :  { %v2232_v3 = vpop.permute.xlu0 %2231 }
0x1a92   :  { %v2234_v12 = vmul.f32 %v2232_v3, %v2229_v1 }
0x1a94   :  { %v5937_v45 = vadd.f32 %v2235_v4, %v2234_v12 }
0x1a96   :  { %2238 = vrot.lane.b32.xlu1 %v5937_v45, %s5146_s11 }
0x1b08   :  { %v2239_v28 = vpop.permute.xlu1 %2238 }
0x1b09   :  { %4428 = vmatmul.mubr.msk.f32.vlgmr.msra.gmra.mxu1 %vm343_vm3, %v2239_v28 }
0x1b0a   :  { %4431 = vmatpush3.msra.mxu1 %v5941_v27  ;;  %4462 = vmatprep.mubr.msk.f32.mxu1 %vm5143_vm0, %v6546_v0 }
0x1b0b   :  { %4432 = vmatprep.subr.mxu1 %v6546_v0 }
0x1b0c   :  { %4433 = vmatpush3.msra.mxu1 %v5944_v29 }
0x1b0d   :  { %4434 = vmatprep.subr.mxu1 %v6546_v0 }
0x1b0e   :  { %4435 = vmatpush3.msra.mxu1 %v5950_v30 }
0x1b0f   :  { %4436 = vmatprep.subr.mxu1 %v6546_v0 }
0x1b10   :  { %4437 = vmatpush3.msra.mxu1 %v5954_v47 }
0x1b11   :  { %4438 = vmatprep.subr.mxu1 %v6546_v0 }
0x1b12   :  { %4439 = vmatpush3.msra.mxu1 %v5958_v33 }
0x1b13   :  { %4440 = vmatprep.subr.mxu1 %v6546_v0 }
0x1b14   :  { %4441 = vmatpush3.msra.mxu1 %v5962_v24 }
0x1b15   :  { %4442 = vmatprep.subr.mxu1 %v6546_v0 }
0x1b16   :  { %4443 = vmatpush3.msra.mxu1 %v5966_v49 }
0x1b17   :  { %4444 = vmatprep.subr.mxu1 %v6546_v0 }
0x1b18   :  { %4445 = vmatpush3.msra.mxu1 %v5970_v34 }
0x1b19   :  { %4446 = vmatprep.subr.mxu1 %v6546_v0 }
0x1b1a   :  { %4447 = vmatpush3.msra.mxu1 %v5974_v50 }
0x1b1b   :  { %4448 = vmatprep.subr.mxu1 %v6546_v0 }
0x1b1c   :  { %4449 = vmatpush3.msra.mxu1 %v5978_v51 }
0x1b1d   :  { %4450 = vmatprep.subr.mxu1 %v6546_v0 }
0x1b1e   :  { %4451 = vmatpush3.msra.mxu1 %v5982_v43 }
0x1b1f   :  { %4452 = vmatprep.subr.mxu1 %v6546_v0 }
0x1b20   :  { %4453 = vmatpush3.msra.mxu1 %v5986_v52 }
0x1b21   :  { %4454 = vmatprep.subr.mxu1 %v6546_v0 }
0x1b22   :  { %4455 = vmatpush3.msra.mxu1 %v5990_v55 }
0x1b23   :  { %4456 = vmatprep.subr.mxu1 %v6546_v0 }
0x1b24   :  { %4457 = vmatpush3.msra.mxu1 %v5996_v26 }
0x1b25   :  { %4458 = vmatprep.subr.mxu1 %v6546_v0 }
0x1b26   :  { %4459 = vmatpush3.msra.mxu1 %v6000_v56 }
0x1b27   :  { %4460 = vmatprep.subr.mxu1 %v6546_v0 }
0x1b28   :  { %4461 = vmatpush3.msra.mxu1 %v6004_v57 }
0x1b29   :  { %4465 = vmatprep.subr.mxu1 %v6546_v0 }
0x1bc9   :  { %v2308_v58 = vpop.f32.mrf.mxu1 }
0x1bca   :  { %v2309_v53 = vadd.f32 %v6011_v10, %v2308_v58 }
0x1bcb   :  { %v4429_v54 = vpop.f32.mrf.mxu1 }
0x1bcc   :  { %v2312_v59 = vmax.f32 %v2309_v53, 0.0 }
0x1bce   :  { %4463 = vmatmul.mubr.f32.vlgmr.msra.gmra.mxu1 %v2312_v59 }
0x1bcf   :  { %4466 = vmatpush3.msra.mxu1 %v5857_v15  ;;  %4481 = vmatprep.mubr.msk.f32.mxu1 %vm5143_vm0, %v6546_v0 }
0x1bd0   :  { %4467 = vmatprep.subr.mxu1 %v6546_v0 }
0x1bd1   :  { %4468 = vmatpush3.msra.mxu1 %v5859_v37 }
0x1bd2   :  { %4469 = vmatprep.subr.mxu1 %v6546_v0 }
0x1bd3   :  { %4470 = vmatpush3.msra.mxu1 %v5863_v38 }
0x1bd4   :  { %4471 = vmatprep.subr.mxu1 %v6546_v0 }
0x1bd5   :  { %4472 = vmatpush3.msra.mxu1 %v5867_v39 }
0x1bd6   :  { %4473 = vmatprep.subr.mxu1 %v6546_v0 }
0x1bd7   :  { %4474 = vmatpush3.msra.mxu1 %v5872_v40 }
0x1bd8   :  { %4475 = vmatprep.subr.mxu1 %v6546_v0 }
0x1bd9   :  { %4476 = vmatpush3.msra.mxu1 %v5876_v44 }
0x1bda   :  { %4477 = vmatprep.subr.mxu1 %v6546_v0 }
0x1bdb   :  { %4478 = vmatpush3.msra.mxu1 %v5880_v46 }
0x1bdc   :  { %4479 = vmatprep.subr.mxu1 %v6546_v0 }
0x1bdd   :  { %4480 = vmatpush3.msra.mxu1 %v5887_v6 }
0x1bde   :  { %4495 = vmatprep.subr.mxu1 %v6546_v0 }
0x1c8e   :  { %v2379_v1 = vpop.f32.mrf.mxu1 }
0x1c8f   :  { %v6038_v3 = vadd.f32 %v6035_v63, %v2379_v1 }
0x1c90   :  { %v4464_v4 = vpop.f32.mrf.mxu1 }
0x1c91   :  { %6563 = vst [vmem:[#allocation26_spill] sm:$0xff] %v6038_v3  ;;  %2450 = vmatmul.mubr.f32.vlgmr.msra.gmra.mxu0 %v6038_v3 }
0x1c92   :  { %4485 = vmatpush3.msra.mxu0 %v5911_v42  ;;  %4492 = vmatprep.mubr.msk.f32.mxu0 %vm5143_vm0, %v6546_v0 }
0x1c93   :  { %4486 = vmatprep.subr.mxu0 %v6546_v0 }
0x1c94   :  { %4487 = vmatpush3.msra.mxu0 %v5916_v60 }
0x1c95   :  { %4488 = vmatprep.subr.mxu0 %v6546_v0 }
0x1c96   :  { %4489 = vmatpush3.msra.mxu0 %v5923_v61 }
0x1c97   :  { %4490 = vmatprep.subr.mxu0 %v6546_v0 }
0x1c98   :  { %4491 = vmatpush3.msra.mxu0 %v5930_v62 }
0x1c99   :  { %2731 = vmatprep.subr.mxu0 %v6546_v0 }
0x1d51   :  { %v2451_v12 = vpop.f32.mrf.mxu0 }
0x1d52   :  { %v2452_v28 = vadd.f32 %v5847_v48, %v2451_v12 }
0x1d53   :  { %v2453_v58 = vpop.f32.mrf.mxu0 }
0x1d54   :  { %2462 = vrot.lane.b32.xlu0 %v2452_v28, %s5144_s18  ;;  %v3865_v53 = vmul.f32 -1.442695, %v2452_v28 }
0x1d56   :  { %4849 = vpow2.f32 %v3865_v53 }
0x1d63   :  { %v4850_v54 = vpop.eup %4849 }
0x1d64   :  { %v2458_v59 = vadd.f32 1.0, %v4850_v54 }
0x1d66   :  { %4851 = vrcp.f32 %v2458_v59 }
0x1d73   :  { %v4852_v1 = vpop.eup %4851 }
0x1d74   :  { %v2472_v12 = vsub.f32 1.0, %v4852_v1  ;;  %v2478_v48 = vmul.f32 %v4852_v1, %v5893_v32 }
0x1dc6   :  { %v2463_v4 = vpop.permute.xlu0 %2462 }
0x1dc7   :  { %v2465_v3 = vmul.f32 %v4852_v1, %v2463_v4 }
0x1dc9   :  { %2467 = vrot.lane.b32.xlu1 %v2465_v3, %s5145_s4 }
0x1e3b   :  { %v2468_v61 = vpop.permute.xlu1 %2467 }
0x1e3c   :  { %v2470_v62 = vadd.f32 %v2468_v61, %v2452_v28  ;;  %v6564_v61 = vmov 0.0  }
0x1e3e   :  { %4853 = vtanh.f32 %v2470_v62 }
0x1e4b   :  { %v4854_v0 = vpop.eup %4853 }
0x1e4c   :  { %2474 = vrot.lane.b32.xlu0 %v4854_v0, %s5146_s11 }
0x1ebe   :  { %v2475_v58 = vpop.permute.xlu0 %2474 }
0x1ebf   :  { %v2477_v60 = vmul.f32 %v2475_v58, %v2472_v12 }
0x1ec1   :  { %v6056_v53 = vadd.f32 %v2478_v48, %v2477_v60 }
0x1ec3   :  { %2481 = vrot.lane.b32.xlu1 %v6056_v53, %s5146_s11 }
0x1f35   :  { %v2482_v54 = vpop.permute.xlu1 %2481 }
0x1f36   :  { %v2484_v3 = vsel %vm343_vm3, %v2482_v54, %v5937_v45 }
0x1f37   :  { %4482 = vmatmul.mubr.msk.f32.vlgmr.msra.gmra.mxu1 %vm449_vm4, %v2484_v3 }
0x1f38   :  { %4496 = vmatpush3.msra.mxu1 %v5941_v27  ;;  %4527 = vmatprep.mubr.msk.f32.mxu1 %vm5143_vm0, %v6564_v61 }
0x1f39   :  { %4497 = vmatprep.subr.mxu1 %v6564_v61 }
0x1f3a   :  { %4498 = vmatpush3.msra.mxu1 %v5944_v29 }
0x1f3b   :  { %4499 = vmatprep.subr.mxu1 %v6564_v61 }
0x1f3c   :  { %4500 = vmatpush3.msra.mxu1 %v5950_v30 }
0x1f3d   :  { %4501 = vmatprep.subr.mxu1 %v6564_v61 }
0x1f3e   :  { %4502 = vmatpush3.msra.mxu1 %v5954_v47 }
0x1f3f   :  { %4503 = vmatprep.subr.mxu1 %v6564_v61 }
0x1f40   :  { %4504 = vmatpush3.msra.mxu1 %v5958_v33 }
0x1f41   :  { %4505 = vmatprep.subr.mxu1 %v6564_v61 }
0x1f42   :  { %4506 = vmatpush3.msra.mxu1 %v5962_v24 }
0x1f43   :  { %4507 = vmatprep.subr.mxu1 %v6564_v61 }
0x1f44   :  { %4508 = vmatpush3.msra.mxu1 %v5966_v49 }
0x1f45   :  { %4509 = vmatprep.subr.mxu1 %v6564_v61 }
0x1f46   :  { %4510 = vmatpush3.msra.mxu1 %v5970_v34 }
0x1f47   :  { %4511 = vmatprep.subr.mxu1 %v6564_v61 }
0x1f48   :  { %4512 = vmatpush3.msra.mxu1 %v5974_v50 }
0x1f49   :  { %4513 = vmatprep.subr.mxu1 %v6564_v61 }
0x1f4a   :  { %4514 = vmatpush3.msra.mxu1 %v5978_v51 }
0x1f4b   :  { %4515 = vmatprep.subr.mxu1 %v6564_v61 }
0x1f4c   :  { %4516 = vmatpush3.msra.mxu1 %v5982_v43 }
0x1f4d   :  { %4517 = vmatprep.subr.mxu1 %v6564_v61 }
0x1f4e   :  { %4518 = vmatpush3.msra.mxu1 %v5986_v52 }
0x1f4f   :  { %4519 = vmatprep.subr.mxu1 %v6564_v61 }
0x1f50   :  { %4520 = vmatpush3.msra.mxu1 %v5990_v55 }
0x1f51   :  { %4521 = vmatprep.subr.mxu1 %v6564_v61 }
0x1f52   :  { %4522 = vmatpush3.msra.mxu1 %v5996_v26 }
0x1f53   :  { %4523 = vmatprep.subr.mxu1 %v6564_v61 }
0x1f54   :  { %4524 = vmatpush3.msra.mxu1 %v6000_v56 }
0x1f55   :  { %4525 = vmatprep.subr.mxu1 %v6564_v61 }
0x1f56   :  { %4526 = vmatpush3.msra.mxu1 %v6004_v57 }
0x1f57   :  { %4530 = vmatprep.subr.mxu1 %v6564_v61 }
0x1ff7   :  { %v2554_v0 = vpop.f32.mrf.mxu1 }
0x1ff8   :  { %v2555_v48 = vadd.f32 %v5903_v41, %v2554_v0 }
0x1ff9   :  { %v4483_v32 = vpop.f32.mrf.mxu1 }
0x1ffa   :  { %2565 = vrot.lane.b32.xlu0 %v2555_v48, %s5144_s18  ;;  %v3867_v60 = vmul.f32 -1.442695, %v2555_v48 }
0x1ffc   :  { %4855 = vpow2.f32 %v3867_v60 }
0x2009   :  { %v4856_v62 = vpop.eup %4855 }
0x200a   :  { %v2561_v28 = vadd.f32 1.0, %v4856_v62 }
0x200c   :  { %4857 = vrcp.f32 %v2561_v28 }
0x2019   :  { %v4858_v59 = vpop.eup %4857 }
0x201a   :  { %v2575_v0 = vsub.f32 1.0, %v4858_v59  ;;  %v2581_v41 = vmul.f32 %v4858_v59, %v5937_v45 }
0x206c   :  { %v2566_v1 = vpop.permute.xlu0 %2565 }
0x206d   :  { %v2568_v4 = vmul.f32 %v4858_v59, %v2566_v1 }
0x206f   :  { %2570 = vrot.lane.b32.xlu1 %v2568_v4, %s5145_s4 }
0x20e1   :  { %v2571_v12 = vpop.permute.xlu1 %2570 }
0x20e2   :  { %v2573_v58 = vadd.f32 %v2571_v12, %v2555_v48 }
0x20e4   :  { %4859 = vtanh.f32 %v2573_v58 }
0x20f1   :  { %v4860_v3 = vpop.eup %4859 }
0x20f2   :  { %2577 = vrot.lane.b32.xlu0 %v4860_v3, %s5146_s11  ;;  %v6570_v3 = vld [vmem:[#allocation21_spill] sm:$0xff] }
0x2164   :  { %v2578_v32 = vpop.permute.xlu0 %2577 }
0x2165   :  { %v2580_v57 = vmul.f32 %v2578_v32, %v2575_v0 }
0x2167   :  { %v6102_v60 = vadd.f32 %v2581_v41, %v2580_v57 }
0x2169   :  { %2584 = vrot.lane.b32.xlu1 %v6102_v60, %s5146_s11 }
0x21db   :  { %v2585_v62 = vpop.permute.xlu1 %2584 }
0x21dc   :  { %4493 = vmatmul.mubr.msk.f32.vlgmr.msra.gmra.mxu0 %vm343_vm3, %v2585_v62 }
0x21dd   :  { %3869 = vmatprep.mubr.msk.f32.mxu0 %vm343_vm3, %v2482_v54  ;;  %2732 = vmatpush1.msra.mxu0 %v5701_v8 }
0x21de   :  { %2733 = vmatprep.subr.mxu0 %v6564_v61 }
0x21df   :  { %2734 = vmatpush1.msra.mxu0 %v5703_v13 }
0x21e0   :  { %2735 = vmatprep.subr.mxu0 %v6564_v61 }
0x21e1   :  { %2736 = vmatpush1.msra.mxu0 %v5707_v9 }
0x21e2   :  { %2737 = vmatprep.subr.mxu0 %v6564_v61 }
0x21e3   :  { %2738 = vmatpush1.msra.mxu0 %v5711_v11 }
0x21e4   :  { %2739 = vmatprep.subr.mxu0 %v6564_v61 }
0x21e5   :  { %2740 = vmatpush1.msra.mxu0 %v5715_v14 }
0x21e6   :  { %2741 = vmatprep.subr.mxu0 %v6564_v61 }
0x21e7   :  { %2742 = vmatpush1.msra.mxu0 %v5719_v2 }
0x21e8   :  { %2743 = vmatprep.subr.mxu0 %v6564_v61 }
0x21e9   :  { %2744 = vmatpush1.msra.mxu0 %v5724_v16 }
0x21ea   :  { %2745 = vmatprep.subr.mxu0 %v6564_v61 }
0x21eb   :  { %2746 = vmatpush1.msra.mxu0 %v5728_v17  ;;  %v6565_v17 = vld [vmem:[#allocation22_spill] sm:$0xff] }
0x21ec   :  { %2747 = vmatprep.subr.mxu0 %v6564_v61 }
0x21ed   :  { %2748 = vmatpush1.msra.mxu0 %v5732_v18  ;;  %v6566_v18 = vld [vmem:[#allocation23_spill] sm:$0xff] }
0x21ee   :  { %2749 = vmatprep.subr.mxu0 %v6564_v61 }
0x21ef   :  { %2750 = vmatpush1.msra.mxu0 %v5736_v19  ;;  %v6567_v19 = vld [vmem:[#allocation24_spill] sm:$0xff] }
0x21f0   :  { %2751 = vmatprep.subr.mxu0 %v6564_v61 }
0x21f1   :  { %2752 = vmatpush1.msra.mxu0 %v5740_v5 }
0x21f2   :  { %2753 = vmatprep.subr.mxu0 %v6564_v61 }
0x21f3   :  { %2754 = vmatpush1.msra.mxu0 %v5744_v20  ;;  %v6568_v20 = vld [vmem:[#allocation20_spill] sm:$0xff] }
0x21f4   :  { %2755 = vmatprep.subr.mxu0 %v6564_v61 }
0x21f5   :  { %2756 = vmatpush1.msra.mxu0 %v5748_v21 }
0x21f6   :  { %2757 = vmatprep.subr.mxu0 %v6564_v61 }
0x21f7   :  { %2758 = vmatpush1.msra.mxu0 %v5752_v22 }
0x21f8   :  { %2759 = vmatprep.subr.mxu0 %v6564_v61 }
0x21f9   :  { %2760 = vmatpush1.msra.mxu0 %v5756_v7 }
0x21fa   :  { %2761 = vmatprep.subr.mxu0 %v6564_v61 }
0x21fb   :  { %2762 = vmatpush1.msra.mxu0 %v5760_v23 }
0x21fc   :  { %2787 = vmatprep.subr.mxu0 %v6564_v61 }
0x21fd   :  { %2788 = vmatpush2.msra.mxu0 %v5764_v25 }
0x21fe   :  { %2789 = vmatprep.subr.mxu0 %v6564_v61 }
0x21ff   :  { %2790 = vmatpush2.msra.mxu0 %v5768_v31 }
0x2200   :  { %2791 = vmatprep.subr.mxu0 %v6564_v61 }
0x2201   :  { %2792 = vmatpush2.msra.mxu0 %v5772_v35 }
0x2202   :  { %2793 = vmatprep.subr.mxu0 %v6564_v61 }
0x2203   :  { %2794 = vmatpush2.msra.mxu0 %v5778_v36 }
0x2204   :  { %4549 = vmatprep.subr.mxu0 %v6564_v61 }
0x229c   :  { %v2654_v8 = vpop.f32.mrf.mxu0 }
0x229d   :  { %v2655_v13 = vadd.f32 %v6011_v10, %v2654_v8 }
0x229e   :  { %v4494_v9 = vpop.f32.mrf.mxu0 }
0x229f   :  { %v2658_v11 = vmax.f32 %v2655_v13, 0.0 }
0x22a1   :  { %4528 = vmatmul.mubr.f32.vlgmr.msra.gmra.mxu1 %v2658_v11 }
0x22a2   :  { %4531 = vmatpush3.msra.mxu1 %v5857_v15  ;;  %4546 = vmatprep.mubr.msk.f32.mxu1 %vm5143_vm0, %v6564_v61 }
0x22a3   :  { %4532 = vmatprep.subr.mxu1 %v6564_v61 }
0x22a4   :  { %4533 = vmatpush3.msra.mxu1 %v5859_v37 }
0x22a5   :  { %4534 = vmatprep.subr.mxu1 %v6564_v61 }
0x22a6   :  { %4535 = vmatpush3.msra.mxu1 %v5863_v38 }
0x22a7   :  { %4536 = vmatprep.subr.mxu1 %v6564_v61 }
0x22a8   :  { %4537 = vmatpush3.msra.mxu1 %v5867_v39 }
0x22a9   :  { %4538 = vmatprep.subr.mxu1 %v6564_v61 }
0x22aa   :  { %4539 = vmatpush3.msra.mxu1 %v5872_v40 }
0x22ab   :  { %4540 = vmatprep.subr.mxu1 %v6564_v61 }
0x22ac   :  { %4541 = vmatpush3.msra.mxu1 %v5876_v44 }
0x22ad   :  { %4542 = vmatprep.subr.mxu1 %v6564_v61 }
0x22ae   :  { %4543 = vmatpush3.msra.mxu1 %v5880_v46 }
0x22af   :  { %4544 = vmatprep.subr.mxu1 %v6564_v61 }
0x22b0   :  { %4545 = vmatpush3.msra.mxu1 %v5887_v6 }
0x22b1   :  { %4560 = vmatprep.subr.mxu1 %v6564_v61 }
0x2361   :  { %v2725_v14 = vpop.f32.mrf.mxu1 }
0x2362   :  { %v6168_v2 = vadd.f32 %v6035_v63, %v2725_v14 }
0x2363   :  { %v4529_v16 = vpop.f32.mrf.mxu1 }
0x2364   :  { %2796 = vmatmul.mubr.f32.vlgmr.msra.gmra.mxu0 %v6168_v2 }
0x2365   :  { %4550 = vmatpush3.msra.mxu0 %v5911_v42  ;;  %4557 = vmatprep.mubr.msk.f32.mxu0 %vm5143_vm0, %v6564_v61 }
0x2366   :  { %4551 = vmatprep.subr.mxu0 %v6564_v61 }
0x2367   :  { %4552 = vmatpush3.msra.mxu0 %v6565_v17 }
0x2368   :  { %4553 = vmatprep.subr.mxu0 %v6564_v61 }
0x2369   :  { %4554 = vmatpush3.msra.mxu0 %v6566_v18 }
0x236a   :  { %4555 = vmatprep.subr.mxu0 %v6564_v61 }
0x236b   :  { %4556 = vmatpush3.msra.mxu0 %v6567_v19 }
0x236c   :  { %3077 = vmatprep.subr.mxu0 %v6564_v61 }
0x2424   :  { %v2797_v5 = vpop.f32.mrf.mxu0 }
0x2425   :  { %v2798_v21 = vadd.f32 %v6568_v20, %v2797_v5 }
0x2426   :  { %v2799_v22 = vpop.f32.mrf.mxu0 }
0x2427   :  { %2808 = vrot.lane.b32.xlu0 %v2798_v21, %s5144_s18  ;;  %v3870_v7 = vmul.f32 -1.442695, %v2798_v21 }
0x2429   :  { %4861 = vpow2.f32 %v3870_v7 }
0x2436   :  { %v4862_v23 = vpop.eup %4861 }
0x2437   :  { %v2804_v25 = vadd.f32 1.0, %v4862_v23 }
0x2439   :  { %4863 = vrcp.f32 %v2804_v25 }
0x2446   :  { %v4864_v31 = vpop.eup %4863 }
0x2447   :  { %v2818_v54 = vsub.f32 1.0, %v4864_v31  ;;  %v2824_v28 = vmul.f32 %v4864_v31, %v6056_v53  ;;  %v6569_v53 = vld [vmem:[#allocation25_spill] sm:$0xff] }
0x2499   :  { %v2809_v35 = vpop.permute.xlu0 %2808 }
0x249a   :  { %v2811_v36 = vmul.f32 %v4864_v31, %v2809_v35  ;;  %v6238_v35 = vld [vmem:[#allocation7 + $0x78] sm:$0xff] }
0x249c   :  { %2813 = vrot.lane.b32.xlu1 %v2811_v36, %s5145_s4  ;;  %v6242_v36 = vld [vmem:[#allocation7 + $0x70] sm:$0xff] }
0x250e   :  { %v2814_v41 = vpop.permute.xlu1 %2813 }
0x250f   :  { %v2816_v45 = vadd.f32 %v2814_v41, %v2798_v21  ;;  %v6250_v41 = vld [vmem:[#allocation7 + $0x60] sm:$0xff] }
0x2511   :  { %4865 = vtanh.f32 %v2816_v45  ;;  %v6254_v45 = vld [vmem:[#allocation7 + $0x58] sm:$0xff] }
0x251e   :  { %v4866_v57 = vpop.eup %4865 }
0x251f   :  { %2820 = vrot.lane.b32.xlu0 %v4866_v57, %s5146_s11  ;;  %v6258_v57 = vld [vmem:[#allocation7 + $0x50] sm:$0xff] }
0x2591   :  { %v2821_v48 = vpop.permute.xlu0 %2820 }
0x2592   :  { %v2823_v59 = vmul.f32 %v2821_v48, %v2818_v54  ;;  %v6262_v54 = vld [vmem:[#allocation7 + $0x48] sm:$0xff]  ;;  %v6266_v48 = vld [vmem:[#allocation7 + $0x40] sm:$0xff] }
0x2594   :  { %v6186_v1 = vadd.f32 %v2824_v28, %v2823_v59  ;;  %v6270_v28 = vld [vmem:[#allocation7 + $0x38] sm:$0xff]  ;;  %v6274_v59 = vld [vmem:[#allocation7 + $0x30] sm:$0xff] }
0x2596   :  { %2827 = vrot.lane.b32.xlu1 %v6186_v1, %s5146_s11 }
0x2608   :  { %v2828_v4 = vpop.permute.xlu1 %2827 }
0x2609   :  { %v2830_v12 = vsel %vm343_vm3, %v2828_v4, %v6102_v60 }
0x260a   :  { %4547 = vmatmul.mubr.msk.f32.vlgmr.msra.gmra.mxu1 %vm449_vm4, %v2830_v12  ;;  %v6282_v12 = vld [vmem:[#allocation7 + $0x20] sm:$0xff] }
0x260b   :  { %4561 = vmatpush3.msra.mxu1 %v5941_v27  ;;  %4592 = vmatprep.mubr.msk.f32.mxu1 %vm5143_vm0, %v6564_v61 }
0x260c   :  { %4562 = vmatprep.subr.mxu1 %v6564_v61 }
0x260d   :  { %4563 = vmatpush3.msra.mxu1 %v5944_v29 }
0x260e   :  { %4564 = vmatprep.subr.mxu1 %v6564_v61 }
0x260f   :  { %4565 = vmatpush3.msra.mxu1 %v5950_v30 }
0x2610   :  { %4566 = vmatprep.subr.mxu1 %v6564_v61 }
0x2611   :  { %4567 = vmatpush3.msra.mxu1 %v5954_v47 }
0x2612   :  { %4568 = vmatprep.subr.mxu1 %v6564_v61 }
0x2613   :  { %4569 = vmatpush3.msra.mxu1 %v5958_v33 }
0x2614   :  { %4570 = vmatprep.subr.mxu1 %v6564_v61 }
0x2615   :  { %4571 = vmatpush3.msra.mxu1 %v5962_v24 }
0x2616   :  { %4572 = vmatprep.subr.mxu1 %v6564_v61 }
0x2617   :  { %4573 = vmatpush3.msra.mxu1 %v5966_v49 }
0x2618   :  { %4574 = vmatprep.subr.mxu1 %v6564_v61 }
0x2619   :  { %4575 = vmatpush3.msra.mxu1 %v5970_v34 }
0x261a   :  { %4576 = vmatprep.subr.mxu1 %v6564_v61 }
0x261b   :  { %4577 = vmatpush3.msra.mxu1 %v5974_v50 }
0x261c   :  { %4578 = vmatprep.subr.mxu1 %v6564_v61 }
0x261d   :  { %4579 = vmatpush3.msra.mxu1 %v5978_v51 }
0x261e   :  { %4580 = vmatprep.subr.mxu1 %v6564_v61 }
0x261f   :  { %4581 = vmatpush3.msra.mxu1 %v5982_v43 }
0x2620   :  { %4582 = vmatprep.subr.mxu1 %v6564_v61 }
0x2621   :  { %4583 = vmatpush3.msra.mxu1 %v5986_v52 }
0x2622   :  { %4584 = vmatprep.subr.mxu1 %v6564_v61 }
0x2623   :  { %4585 = vmatpush3.msra.mxu1 %v5990_v55 }
0x2624   :  { %4586 = vmatprep.subr.mxu1 %v6564_v61 }
0x2625   :  { %4587 = vmatpush3.msra.mxu1 %v5996_v26 }
0x2626   :  { %4588 = vmatprep.subr.mxu1 %v6564_v61 }
0x2627   :  { %4589 = vmatpush3.msra.mxu1 %v6000_v56 }
0x2628   :  { %4590 = vmatprep.subr.mxu1 %v6564_v61 }
0x2629   :  { %4591 = vmatpush3.msra.mxu1 %v6569_v53 }
0x262a   :  { %4595 = vmatprep.subr.mxu1 %v6564_v61 }
0x26ca   :  { %v2900_v58 = vpop.f32.mrf.mxu1 }
0x26cb   :  { %v2901_v0 = vadd.f32 %v6570_v3, %v2900_v58  ;;  %v6286_v58 = vld [vmem:[#allocation7 + $0x18] sm:$0xff] }
0x26cc   :  { %v4548_v32 = vpop.f32.mrf.mxu1 }
0x26cd   :  { %2911 = vrot.lane.b32.xlu0 %v2901_v0, %s5144_s18  ;;  %v3872_v62 = vmul.f32 -1.442695, %v2901_v0  ;;  %v6294_v32 = vld [vmem:[#allocation7 + $0x8] sm:$0xff] }
0x26cf   :  { %4867 = vpow2.f32 %v3872_v62  ;;  %v6298_v62 = vld [vmem:[#allocation7] sm:$0xff] }
0x26dc   :  { %v4868_v8 = vpop.eup %4867 }
0x26dd   :  { %v2907_v13 = vadd.f32 1.0, %v4868_v8  ;;  %v6302_v8 = vld [vmem:[#allocation7 + $0x98] sm:$0xff] }
0x26df   :  { %4869 = vrcp.f32 %v2907_v13  ;;  %v6306_v13 = vld [vmem:[#allocation7 + $0x90] sm:$0xff] }
0x26ec   :  { %v4870_v9 = vpop.eup %4869 }
0x26ed   :  { %v2921_v21 = vsub.f32 1.0, %v4870_v9  ;;  %v2927_v7 = vmul.f32 %v4870_v9, %v6102_v60  ;;  %v6246_v60 = vld [vmem:[#allocation7 + $0x68] sm:$0xff] }
0x273f   :  { %v2912_v11 = vpop.permute.xlu0 %2911 }
0x2740   :  { %v2914_v14 = vmul.f32 %v4870_v9, %v2912_v11  ;;  %v6310_v9 = vld [vmem:[#allocation7 + $0x88] sm:$0xff]  ;;  %v6314_v11 = vld [vmem:[#allocation7 + $0x80] sm:$0xff] }
0x2742   :  { %2916 = vrot.lane.b32.xlu1 %v2914_v14, %s5145_s4 }
0x27b4   :  { %v2917_v16 = vpop.permute.xlu1 %2916 }
0x27b5   :  { %v2919_v5 = vadd.f32 %v2917_v16, %v2901_v0  ;;  %v6290_v0 = vld [vmem:[#allocation7 + $0x10] sm:$0xff] }
0x27b7   :  { %4871 = vtanh.f32 %v2919_v5 }
0x27c4   :  { %v4872_v20 = vpop.eup %4871 }
0x27c5   :  { %2923 = vrot.lane.b32.xlu0 %v4872_v20, %s5146_s11 }
0x2837   :  { %v2924_v22 = vpop.permute.xlu0 %2923 }
0x2838   :  { %v2926_v23 = vmul.f32 %v2924_v22, %v2921_v21 }
0x283a   :  { %v6232_v25 = vadd.f32 %v2927_v7, %v2926_v23 }
0x283c   :  { %2930 = vrot.lane.b32.xlu1 %v6232_v25, %s5146_s11 }
0x28ae   :  { %v2931_v31 = vpop.permute.xlu1 %2930 }
0x28af   :  { %4558 = vmatmul.mubr.msk.f32.vlgmr.msra.gmra.mxu0 %vm343_vm3, %v2931_v31 }
0x28b0   :  { %3874 = vmatprep.mubr.msk.f32.mxu0 %vm343_vm3, %v2828_v4  ;;  %3078 = vmatpush1.msra.mxu0 %v6238_v35  ;;  %v6278_v4 = vld [vmem:[#allocation7 + $0x28] sm:$0xff] }
0x28b1   :  { %3079 = vmatprep.subr.mxu0 %v6564_v61 }
0x28b2   :  { %3080 = vmatpush1.msra.mxu0 %v6242_v36 }
0x28b3   :  { %3081 = vmatprep.subr.mxu0 %v6564_v61 }
0x28b4   :  { %3082 = vmatpush1.msra.mxu0 %v6246_v60 }
0x28b5   :  { %3083 = vmatprep.subr.mxu0 %v6564_v61 }
0x28b6   :  { %3084 = vmatpush1.msra.mxu0 %v6250_v41 }
0x28b7   :  { %3085 = vmatprep.subr.mxu0 %v6564_v61 }
0x28b8   :  { %3086 = vmatpush1.msra.mxu0 %v6254_v45 }
0x28b9   :  { %3087 = vmatprep.subr.mxu0 %v6564_v61 }
0x28ba   :  { %3088 = vmatpush1.msra.mxu0 %v6258_v57 }
0x28bb   :  { %3089 = vmatprep.subr.mxu0 %v6564_v61 }
0x28bc   :  { %3090 = vmatpush1.msra.mxu0 %v6262_v54 }
0x28bd   :  { %3091 = vmatprep.subr.mxu0 %v6564_v61 }
0x28be   :  { %3092 = vmatpush1.msra.mxu0 %v6266_v48 }
0x28bf   :  { %3093 = vmatprep.subr.mxu0 %v6564_v61 }
0x28c0   :  { %3094 = vmatpush1.msra.mxu0 %v6270_v28 }
0x28c1   :  { %3095 = vmatprep.subr.mxu0 %v6564_v61 }
0x28c2   :  { %3096 = vmatpush1.msra.mxu0 %v6274_v59 }
0x28c3   :  { %3097 = vmatprep.subr.mxu0 %v6564_v61 }
0x28c4   :  { %3098 = vmatpush1.msra.mxu0 %v6278_v4 }
0x28c5   :  { %3099 = vmatprep.subr.mxu0 %v6564_v61 }
0x28c6   :  { %3100 = vmatpush1.msra.mxu0 %v6282_v12 }
0x28c7   :  { %3101 = vmatprep.subr.mxu0 %v6564_v61 }
0x28c8   :  { %3102 = vmatpush1.msra.mxu0 %v6286_v58 }
0x28c9   :  { %3103 = vmatprep.subr.mxu0 %v6564_v61 }
0x28ca   :  { %3104 = vmatpush1.msra.mxu0 %v6290_v0 }
0x28cb   :  { %3105 = vmatprep.subr.mxu0 %v6564_v61 }
0x28cc   :  { %3106 = vmatpush1.msra.mxu0 %v6294_v32 }
0x28cd   :  { %3107 = vmatprep.subr.mxu0 %v6564_v61 }
0x28ce   :  { %3108 = vmatpush1.msra.mxu0 %v6298_v62 }
0x28cf   :  { %3133 = vmatprep.subr.mxu0 %v6564_v61 }
0x28d0   :  { %3134 = vmatpush2.msra.mxu0 %v6302_v8 }
0x28d1   :  { %3135 = vmatprep.subr.mxu0 %v6564_v61 }
0x28d2   :  { %3136 = vmatpush2.msra.mxu0 %v6306_v13 }
0x28d3   :  { %3137 = vmatprep.subr.mxu0 %v6564_v61 }
0x28d4   :  { %3138 = vmatpush2.msra.mxu0 %v6310_v9 }
0x28d5   :  { %3139 = vmatprep.subr.mxu0 %v6564_v61 }
0x28d6   :  { %3140 = vmatpush2.msra.mxu0 %v6314_v11 }
0x28d7   :  { %4614 = vmatprep.subr.mxu0 %v6564_v61 }
0x296f   :  { %v3000_v14 = vpop.f32.mrf.mxu0 }
0x2970   :  { %v3001_v16 = vadd.f32 %v6011_v10, %v3000_v14 }
0x2971   :  { %v4559_v5 = vpop.f32.mrf.mxu0 }
0x2972   :  { %v3004_v20 = vmax.f32 %v3001_v16, 0.0 }
0x2974   :  { %4593 = vmatmul.mubr.f32.vlgmr.msra.gmra.mxu1 %v3004_v20 }
0x2975   :  { %4596 = vmatpush3.msra.mxu1 %v5857_v15  ;;  %4611 = vmatprep.mubr.msk.f32.mxu1 %vm5143_vm0, %v6564_v61 }
0x2976   :  { %4597 = vmatprep.subr.mxu1 %v6564_v61 }
0x2977   :  { %4598 = vmatpush3.msra.mxu1 %v5859_v37 }
0x2978   :  { %4599 = vmatprep.subr.mxu1 %v6564_v61 }
0x2979   :  { %4600 = vmatpush3.msra.mxu1 %v5863_v38 }
0x297a   :  { %4601 = vmatprep.subr.mxu1 %v6564_v61 }
0x297b   :  { %4602 = vmatpush3.msra.mxu1 %v5867_v39 }
0x297c   :  { %4603 = vmatprep.subr.mxu1 %v6564_v61 }
0x297d   :  { %4604 = vmatpush3.msra.mxu1 %v5872_v40  ;;  %v6351_v40 = vld [vmem:[#allocation8] ss:$0 sm:$0xff] }
0x297e   :  { %4605 = vmatprep.subr.mxu1 %v6564_v61 }
0x297f   :  { %4606 = vmatpush3.msra.mxu1 %v5876_v44 }
0x2980   :  { %4607 = vmatprep.subr.mxu1 %v6564_v61 }
0x2981   :  { %4608 = vmatpush3.msra.mxu1 %v5880_v46 }
0x2982   :  { %4609 = vmatprep.subr.mxu1 %v6564_v61 }
0x2983   :  { %4610 = vmatpush3.msra.mxu1 %v5887_v6 }
0x2984   :  { %4625 = vmatprep.subr.mxu1 %v6564_v61 }
0x2a34   :  { %v3071_v15 = vpop.f32.mrf.mxu1 }
0x2a35   :  { %v6338_v37 = vadd.f32 %v6035_v63, %v3071_v15 }
0x2a36   :  { %v4594_v38 = vpop.f32.mrf.mxu1 }
0x2a37   :  { %3142 = vmatmul.mubr.f32.vlgmr.msra.gmra.mxu0 %v6338_v37 }
0x2a38   :  { %4615 = vmatpush3.msra.mxu0 %v5911_v42  ;;  %4622 = vmatprep.mubr.msk.f32.mxu0 %vm5143_vm0, %v6564_v61 }
0x2a39   :  { %4616 = vmatprep.subr.mxu0 %v6564_v61 }
0x2a3a   :  { %4617 = vmatpush3.msra.mxu0 %v6565_v17 }
0x2a3b   :  { %4618 = vmatprep.subr.mxu0 %v6564_v61 }
0x2a3c   :  { %4619 = vmatpush3.msra.mxu0 %v6566_v18 }
0x2a3d   :  { %4620 = vmatprep.subr.mxu0 %v6564_v61 }
0x2a3e   :  { %4621 = vmatpush3.msra.mxu0 %v6567_v19 }
0x2a3f   :  { %3423 = vmatprep.subr.mxu0 %v6564_v61 }
0x2af7   :  { %v3143_v39 = vpop.f32.mrf.mxu0 }
0x2af8   :  { %v3144_v44 = vadd.f32 %v6351_v40, %v3143_v39 }
0x2af9   :  { %v3145_v46 = vpop.f32.mrf.mxu0 }
0x2afa   :  { %3154 = vrot.lane.b32.xlu0 %v3144_v44, %s5144_s18  ;;  %v3875_v6 = vmul.f32 -1.442695, %v3144_v44  ;;  %v4940_v46 = vld [vmem:[%s6535_s12 + $0x18] sm:$0xff] }
0x2afc   :  { %4873 = vpow2.f32 %v3875_v6 }
0x2b09   :  { %v4874_v42 = vpop.eup %4873 }
0x2b0a   :  { %v3150_v17 = vadd.f32 1.0, %v4874_v42 }
0x2b0c   :  { %4875 = vrcp.f32 %v3150_v17  ;;  %v4943_v17 = vld [vmem:[%s6535_s12] sm:$0xff] }
0x2b19   :  { %v4876_v18 = vpop.eup %4875 }
0x2b1a   :  { %v3164_v31 = vsub.f32 1.0, %v4876_v18  ;;  %v3170_v16 = vmul.f32 %v4876_v18, %v6186_v1 }
0x2b6c   :  { %v3155_v21 = vpop.permute.xlu0 %3154 }
0x2b6d   :  { %v3157_v22 = vmul.f32 %v4876_v18, %v3155_v21 }
0x2b6f   :  { %3159 = vrot.lane.b32.xlu1 %v3157_v22, %s5145_s4 }
0x2be1   :  { %v3160_v19 = vpop.permute.xlu1 %3159 }
0x2be2   :  { %v3162_v7 = vadd.f32 %v3160_v19, %v3144_v44 }
0x2be4   :  { %4877 = vtanh.f32 %v3162_v7 }
0x2bf1   :  { %v4878_v23 = vpop.eup %4877 }
0x2bf2   :  { %3166 = vrot.lane.b32.xlu0 %v4878_v23, %s5146_s11 }
0x2c64   :  { %v3167_v14 = vpop.permute.xlu0 %3166 }
0x2c65   :  { %v3169_v5 = vmul.f32 %v3167_v14, %v3164_v31 }
0x2c67   :  { %v6358_v20 = vadd.f32 %v3170_v16, %v3169_v5 }
0x2c69   :  { %3173 = vrot.lane.b32.xlu1 %v6358_v20, %s5146_s11 }
0x2cdb   :  { %v3174_v15 = vpop.permute.xlu1 %3173 }
0x2cdc   :  { %v3176_v38 = vsel %vm343_vm3, %v3174_v15, %v6232_v25 }
0x2cdd   :  { %4612 = vmatmul.mubr.msk.f32.vlgmr.msra.gmra.mxu1 %vm449_vm4, %v3176_v38 }
0x2cde   :  { %4626 = vmatpush3.msra.mxu1 %v5941_v27  ;;  %4657 = vmatprep.mubr.msk.f32.mxu1 %vm5143_vm0, %v6564_v61 }
0x2cdf   :  { %4627 = vmatprep.subr.mxu1 %v6564_v61 }
0x2ce0   :  { %4628 = vmatpush3.msra.mxu1 %v5944_v29 }
0x2ce1   :  { %4629 = vmatprep.subr.mxu1 %v6564_v61 }
0x2ce2   :  { %4630 = vmatpush3.msra.mxu1 %v5950_v30 }
0x2ce3   :  { %4631 = vmatprep.subr.mxu1 %v6564_v61 }
0x2ce4   :  { %4632 = vmatpush3.msra.mxu1 %v5954_v47 }
0x2ce5   :  { %4633 = vmatprep.subr.mxu1 %v6564_v61 }
0x2ce6   :  { %4634 = vmatpush3.msra.mxu1 %v5958_v33 }
0x2ce7   :  { %4635 = vmatprep.subr.mxu1 %v6564_v61 }
0x2ce8   :  { %4636 = vmatpush3.msra.mxu1 %v5962_v24 }
0x2ce9   :  { %4637 = vmatprep.subr.mxu1 %v6564_v61 }
0x2cea   :  { %4638 = vmatpush3.msra.mxu1 %v5966_v49 }
0x2ceb   :  { %4639 = vmatprep.subr.mxu1 %v6564_v61 }
0x2cec   :  { %4640 = vmatpush3.msra.mxu1 %v5970_v34 }
0x2ced   :  { %4641 = vmatprep.subr.mxu1 %v6564_v61 }
0x2cee   :  { %4642 = vmatpush3.msra.mxu1 %v5974_v50 }
0x2cef   :  { %4643 = vmatprep.subr.mxu1 %v6564_v61 }
0x2cf0   :  { %4644 = vmatpush3.msra.mxu1 %v5978_v51 }
0x2cf1   :  { %4645 = vmatprep.subr.mxu1 %v6564_v61 }
0x2cf2   :  { %4646 = vmatpush3.msra.mxu1 %v5982_v43 }
0x2cf3   :  { %4647 = vmatprep.subr.mxu1 %v6564_v61 }
0x2cf4   :  { %4648 = vmatpush3.msra.mxu1 %v5986_v52 }
0x2cf5   :  { %4649 = vmatprep.subr.mxu1 %v6564_v61 }
0x2cf6   :  { %4650 = vmatpush3.msra.mxu1 %v5990_v55 }
0x2cf7   :  { %4651 = vmatprep.subr.mxu1 %v6564_v61 }
0x2cf8   :  { %4652 = vmatpush3.msra.mxu1 %v5996_v26 }
0x2cf9   :  { %4653 = vmatprep.subr.mxu1 %v6564_v61 }
0x2cfa   :  { %4654 = vmatpush3.msra.mxu1 %v6000_v56 }
0x2cfb   :  { %4655 = vmatprep.subr.mxu1 %v6564_v61 }
0x2cfc   :  { %4656 = vmatpush3.msra.mxu1 %v6569_v53 }
0x2cfd   :  { %4660 = vmatprep.subr.mxu1 %v6564_v61 }
0x2d9d   :  { %v3246_v27 = vpop.f32.mrf.mxu1 }
0x2d9e   :  { %v3247_v29 = vadd.f32 %v6570_v3, %v3246_v27 }
0x2d9f   :  { %v4613_v30 = vpop.f32.mrf.mxu1 }
0x2da0   :  { %3257 = vrot.lane.b32.xlu0 %v3247_v29, %s5144_s18  ;;  %v3877_v47 = vmul.f32 -1.442695, %v3247_v29 }
0x2da2   :  { %4879 = vpow2.f32 %v3877_v47 }
0x2daf   :  { %v4880_v33 = vpop.eup %4879 }
0x2db0   :  { %v3253_v24 = vadd.f32 1.0, %v4880_v33 }
0x2db2   :  { %4881 = vrcp.f32 %v3253_v24 }
0x2dbf   :  { %v4882_v49 = vpop.eup %4881 }
0x2dc0   :  { %v3267_v55 = vsub.f32 1.0, %v4882_v49  ;;  %v3273_v56 = vmul.f32 %v4882_v49, %v6232_v25 }
0x2e12   :  { %v3258_v34 = vpop.permute.xlu0 %3257 }
0x2e13   :  { %v3260_v50 = vmul.f32 %v4882_v49, %v3258_v34  ;;  %v4944_v49 = vld [vmem:[#allocation13 + $0x78] sm:$0xff]  ;;  %v4945_v34 = vld [vmem:[#allocation13 + $0x70] sm:$0xff] }
0x2e15   :  { %3262 = vrot.lane.b32.xlu1 %v3260_v50, %s5145_s4  ;;  %v4947_v50 = vld [vmem:[#allocation13 + $0x60] sm:$0xff] }
0x2e87   :  { %v3263_v51 = vpop.permute.xlu1 %3262 }
0x2e88   :  { %v3265_v43 = vadd.f32 %v3263_v51, %v3247_v29  ;;  %v4948_v51 = vld [vmem:[#allocation13 + $0x58] sm:$0xff] }
0x2e8a   :  { %4883 = vtanh.f32 %v3265_v43  ;;  %v4949_v43 = vld [vmem:[#allocation13 + $0x50] sm:$0xff] }
0x2e97   :  { %v4884_v52 = vpop.eup %4883 }
0x2e98   :  { %3269 = vrot.lane.b32.xlu0 %v4884_v52, %s5146_s11  ;;  %v4950_v52 = vld [vmem:[#allocation13 + $0x48] sm:$0xff] }
0x2f0a   :  { %v3270_v26 = vpop.permute.xlu0 %3269 }
0x2f0b   :  { %v3272_v1 = vmul.f32 %v3270_v26, %v3267_v55  ;;  %v4951_v55 = vld [vmem:[#allocation13 + $0x40] sm:$0xff]  ;;  %v4952_v26 = vld [vmem:[#allocation13 + $0x38] sm:$0xff] }
0x2f0d   :  { %v6404_v53 = vadd.f32 %v3273_v56, %v3272_v1  ;;  %v4953_v56 = vld [vmem:[#allocation13 + $0x30] sm:$0xff]  ;;  %v4954_v1 = vld [vmem:[#allocation13 + $0x28] sm:$0xff] }
0x2f0f   :  { %3276 = vrot.lane.b32.xlu1 %v6404_v53, %s5146_s11 }
0x2f81   :  { %v3277_v3 = vpop.permute.xlu1 %3276 }
0x2f82   :  { %4623 = vmatmul.mubr.msk.f32.vlgmr.msra.gmra.mxu0 %vm343_vm3, %v3277_v3  ;;  %v4955_v3 = vld [vmem:[#allocation13 + $0x20] sm:$0xff] }
0x2f83   :  { %3879 = vmatprep.mubr.msk.f32.mxu0 %vm343_vm3, %v3174_v15  ;;  %3424 = vmatpush1.msra.mxu0 %v6238_v35 }
0x2f84   :  { %3425 = vmatprep.subr.mxu0 %v6564_v61 }
0x2f85   :  { %3426 = vmatpush1.msra.mxu0 %v6242_v36 }
0x2f86   :  { %3427 = vmatprep.subr.mxu0 %v6564_v61 }
0x2f87   :  { %3428 = vmatpush1.msra.mxu0 %v6246_v60 }
0x2f88   :  { %3429 = vmatprep.subr.mxu0 %v6564_v61 }
0x2f89   :  { %3430 = vmatpush1.msra.mxu0 %v6250_v41  ;;  %v4932_v41 = vld [vmem:[#allocation10 + $0x38] sm:$0xff] }
0x2f8a   :  { %3431 = vmatprep.subr.mxu0 %v6564_v61 }
0x2f8b   :  { %3432 = vmatpush1.msra.mxu0 %v6254_v45  ;;  %v4933_v45 = vld [vmem:[#allocation10 + $0x30] sm:$0xff] }
0x2f8c   :  { %3433 = vmatprep.subr.mxu0 %v6564_v61 }
0x2f8d   :  { %3434 = vmatpush1.msra.mxu0 %v6258_v57  ;;  %v4934_v57 = vld [vmem:[#allocation10 + $0x28] sm:$0xff] }
0x2f8e   :  { %3435 = vmatprep.subr.mxu0 %v6564_v61 }
0x2f8f   :  { %3436 = vmatpush1.msra.mxu0 %v6262_v54  ;;  %v4935_v54 = vld [vmem:[#allocation10 + $0x20] sm:$0xff] }
0x2f90   :  { %3437 = vmatprep.subr.mxu0 %v6564_v61 }
0x2f91   :  { %3438 = vmatpush1.msra.mxu0 %v6266_v48  ;;  %v4937_v48 = vld [vmem:[#allocation10 + $0x10] sm:$0xff] }
0x2f92   :  { %3439 = vmatprep.subr.mxu0 %v6564_v61 }
0x2f93   :  { %3440 = vmatpush1.msra.mxu0 %v6270_v28  ;;  %v4938_v28 = vld [vmem:[#allocation10 + $0x8] sm:$0xff] }
0x2f94   :  { %3441 = vmatprep.subr.mxu0 %v6564_v61 }
0x2f95   :  { %3442 = vmatpush1.msra.mxu0 %v6274_v59  ;;  %v4939_v59 = vld [vmem:[#allocation10] sm:$0xff] }
0x2f96   :  { %3443 = vmatprep.subr.mxu0 %v6564_v61 }
0x2f97   :  { %3444 = vmatpush1.msra.mxu0 %v6278_v4  ;;  %v5147_v4 = vmov 1983009808  }
0x2f98   :  { %3445 = vmatprep.subr.mxu0 %v6564_v61 }
0x2f99   :  { %3446 = vmatpush1.msra.mxu0 %v6282_v12  ;;  %v3775_v12 = vunpack.c.l.s4 %v5147_v4 }
0x2f9a   :  { %3447 = vmatprep.subr.mxu0 %v6564_v61 }
0x2f9b   :  { %3448 = vmatpush1.msra.mxu0 %v6286_v58  ;;  %v3777_v58 = vlaneseq }
0x2f9c   :  { %3449 = vmatprep.subr.mxu0 %v6564_v61 }
0x2f9d   :  { %3450 = vmatpush1.msra.mxu0 %v6290_v0  ;;  %v3776_v0 = vunpack.c.0.s8 %v3775_v12 }
0x2f9e   :  { %3451 = vmatprep.subr.mxu0 %v6564_v61 }
0x2f9f   :  { %3452 = vmatpush1.msra.mxu0 %v6294_v32  ;;  %v3778_v32 = vshrl.u32 %v3777_v58, 7 }
0x2fa0   :  { %3453 = vmatprep.subr.mxu0 %v6564_v61 }
0x2fa1   :  { %3454 = vmatpush1.msra.mxu0 %v6298_v62 }
0x2fa2   :  { %3479 = vmatprep.subr.mxu0 %v6564_v61 }
0x2fa3   :  { %3480 = vmatpush2.msra.mxu0 %v6302_v8  ;;  %v6571_v8 = vld [vmem:[#allocation26_spill] sm:$0xff] }
0x2fa4   :  { %3481 = vmatprep.subr.mxu0 %v6564_v61 }
0x2fa5   :  { %3482 = vmatpush2.msra.mxu0 %v6306_v13  ;;  %v3772_v13 = vcombine.low %v6571_v8, %v6168_v2 }
0x2fa6   :  { %3483 = vmatprep.subr.mxu0 %v6564_v61 }
0x2fa7   :  { %3484 = vmatpush2.msra.mxu0 %v6310_v9  ;;  %v3779_v9 = vsub.s32 %v3776_v0, %v3778_v32 }
0x2fa8   :  { %3485 = vmatprep.subr.mxu0 %v6564_v61 }
0x2fa9   :  { %3486 = vmatpush2.msra.mxu0 %v6314_v11  ;;  %v3780_v6 = vrot.slane %v3772_v13, %v3779_v9 }
0x2faa   :  { %4679 = vmatprep.subr.mxu0 %v6564_v61 }
0x3042   :  { %v3346_v25 = vpop.f32.mrf.mxu0 }
0x3043   :  { %v3347_v35 = vadd.f32 %v6011_v10, %v3346_v25  ;;  %v4936_v10 = vld [vmem:[#allocation10 + $0x18] sm:$0xff] }
0x3044   :  { %v4624_v36 = vpop.f32.mrf.mxu0  ;;  %v4956_v25 = vld [vmem:[#allocation13 + $0x18] sm:$0xff] }
0x3045   :  { %v3350_v60 = vmax.f32 %v3347_v35, 0.0  ;;  %v4957_v35 = vld [vmem:[#allocation13 + $0x10] sm:$0xff]  ;;  %v4958_v36 = vld [vmem:[#allocation13 + $0x8] sm:$0xff] }
0x3047   :  { %4658 = vmatmul.mubr.f32.vlgmr.msra.gmra.mxu1 %v3350_v60  ;;  %v4959_v60 = vld [vmem:[#allocation13] sm:$0xff] }
0x3048   :  { %4661 = vmatpush3.msra.mxu1 %v4932_v41  ;;  %4676 = vmatprep.mubr.msk.f32.mxu1 %vm5143_vm0, %v6564_v61 }
0x3049   :  { %4662 = vmatprep.subr.mxu1 %v6564_v61 }
0x304a   :  { %4663 = vmatpush3.msra.mxu1 %v4933_v45  ;;  %v4960_v45 = vld [vmem:[#allocation11] ss:$0 sm:$0xff] }
0x304b   :  { %4664 = vmatprep.subr.mxu1 %v6564_v61 }
0x304c   :  { %4665 = vmatpush3.msra.mxu1 %v4934_v57 }
0x304d   :  { %4666 = vmatprep.subr.mxu1 %v6564_v61 }
0x304e   :  { %4667 = vmatpush3.msra.mxu1 %v4935_v54 }
0x304f   :  { %4668 = vmatprep.subr.mxu1 %v6564_v61 }
0x3050   :  { %4669 = vmatpush3.msra.mxu1 %v4936_v10 }
0x3051   :  { %4670 = vmatprep.subr.mxu1 %v6564_v61 }
0x3052   :  { %4671 = vmatpush3.msra.mxu1 %v4937_v48 }
0x3053   :  { %4672 = vmatprep.subr.mxu1 %v6564_v61 }
0x3054   :  { %4673 = vmatpush3.msra.mxu1 %v4938_v28 }
0x3055   :  { %4674 = vmatprep.subr.mxu1 %v6564_v61 }
0x3056   :  { %4675 = vmatpush3.msra.mxu1 %v4939_v59 }
0x3057   :  { %4690 = vmatprep.subr.mxu1 %v6564_v61 }
0x3107   :  { %v3417_v62 = vpop.f32.mrf.mxu1 }
0x3108   :  { %v3418_v11 = vadd.f32 %v6035_v63, %v3417_v62  ;;  %v4941_v63 = vld [vmem:[%s6535_s12 + $0x10] sm:$0xff] }
0x3109   :  { %v4659_v39 = vpop.f32.mrf.mxu1 }
0x310a   :  { %v3773_v44 = vcombine.low %v6338_v37, %v3418_v11  ;;  %3488 = vmatmul.mubr.f32.vlgmr.msra.gmra.mxu0 %v3418_v11  ;;  %v4942_v37 = vld [vmem:[%s6535_s12 + $0x8] sm:$0xff] }
0x310b   :  { %4680 = vmatpush3.msra.mxu0 %v4940_v46  ;;  %4687 = vmatprep.mubr.msk.f32.mxu0 %vm5143_vm0, %v6564_v61 }
0x310c   :  { %v3787_v42 = vrot.slane %v3773_v44, %v3779_v9  ;;  %4681 = vmatprep.subr.mxu0 %v6564_v61  ;;  %v4961_v44 = vld [vmem:[%s6536_s13] ss:$0 sm:$0xff] }
0x310d   :  { %4682 = vmatpush3.msra.mxu0 %v4941_v63 }
0x310e   :  { %4683 = vmatprep.subr.mxu0 %v6564_v61  ;;  %v3788_v2 = vcombine.low %v3780_v6, %v3787_v42 }
0x310f   :  { %4684 = vmatpush3.msra.mxu0 %v4942_v37 }
0x3110   :  { %4685 = vmatprep.subr.mxu0 %v6564_v61  ;;  %3798 = vst [vmem:[#allocation14] sm:$0xff] %v3788_v2 }
0x3111   :  { %4686 = vmatpush3.msra.mxu0 %v4943_v17 }
0x31ca   :  { %v3489_v18 = vpop.f32.mrf.mxu0 }
0x31cb   :  { %v3490_v21 = vadd.f32 %v6351_v40, %v3489_v18 }
0x31cc   :  { %v3491_v22 = vpop.f32.mrf.mxu0 }
0x31cd   :  { %3500 = vrot.lane.b32.xlu0 %v3490_v21, %s5144_s18  ;;  %v3880_v19 = vmul.f32 -1.442695, %v3490_v21 }
0x31cf   :  { %4885 = vpow2.f32 %v3880_v19 }
0x31dc   :  { %v4886_v7 = vpop.eup %4885 }
0x31dd   :  { %v3496_v23 = vadd.f32 1.0, %v4886_v7 }
0x31df   :  { %4887 = vrcp.f32 %v3496_v23 }
0x31ec   :  { %v4888_v31 = vpop.eup %4887 }
0x31ed   :  { %v3510_v40 = vsub.f32 1.0, %v4888_v31  ;;  %v3516_v29 = vmul.f32 %v4888_v31, %v6358_v20  ;;  %v4946_v20 = vld [vmem:[#allocation13 + $0x68] sm:$0xff] }
0x323f   :  { %v3501_v14 = vpop.permute.xlu0 %3500 }
0x3240   :  { %v3503_v16 = vmul.f32 %v4888_v31, %v3501_v14 }
0x3242   :  { %3505 = vrot.lane.b32.xlu1 %v3503_v16, %s5145_s4 }
0x32b4   :  { %v3506_v5 = vpop.permute.xlu1 %3505 }
0x32b5   :  { %v3508_v15 = vadd.f32 %v3506_v5, %v3490_v21 }
0x32b7   :  { %4889 = vtanh.f32 %v3508_v15 }
0x32c4   :  { %v4890_v38 = vpop.eup %4889 }
0x32c5   :  { %3512 = vrot.lane.b32.xlu0 %v4890_v38, %s5146_s11 }
0x3337   :  { %v3513_v27 = vpop.permute.xlu0 %3512 }
0x3338   :  { %v3515_v30 = vmul.f32 %v3513_v27, %v3510_v40 }
0x333a   :  { %v3517_v47 = vadd.f32 %v3516_v29, %v3515_v30 }
0x333c   :  { %3519 = vrot.lane.b32.xlu1 %v3517_v47, %s5146_s11 }
0x33ae   :  { %v3520_v33 = vpop.permute.xlu1 %3519 }
0x33af   :  { %v3522_v24 = vsel %vm343_vm3, %v3520_v33, %v6404_v53 }
0x33b0   :  { %4677 = vmatmul.mubr.msk.f32.vlgmr.msra.gmra.mxu1 %vm449_vm4, %v3522_v24 }
0x33b1   :  { %4691 = vmatpush3.msra.mxu1 %v4944_v49  ;;  %4722 = vmatprep.mubr.msk.f32.mxu1 %vm5143_vm0, %v6564_v61 }
0x33b2   :  { %4692 = vmatprep.subr.mxu1 %v6564_v61 }
0x33b3   :  { %4693 = vmatpush3.msra.mxu1 %v4945_v34 }
0x33b4   :  { %4694 = vmatprep.subr.mxu1 %v6564_v61 }
0x33b5   :  { %4695 = vmatpush3.msra.mxu1 %v4946_v20 }
0x33b6   :  { %4696 = vmatprep.subr.mxu1 %v6564_v61 }
0x33b7   :  { %4697 = vmatpush3.msra.mxu1 %v4947_v50 }
0x33b8   :  { %4698 = vmatprep.subr.mxu1 %v6564_v61 }
0x33b9   :  { %4699 = vmatpush3.msra.mxu1 %v4948_v51 }
0x33ba   :  { %4700 = vmatprep.subr.mxu1 %v6564_v61 }
0x33bb   :  { %4701 = vmatpush3.msra.mxu1 %v4949_v43 }
0x33bc   :  { %4702 = vmatprep.subr.mxu1 %v6564_v61 }
0x33bd   :  { %4703 = vmatpush3.msra.mxu1 %v4950_v52 }
0x33be   :  { %4704 = vmatprep.subr.mxu1 %v6564_v61 }
0x33bf   :  { %4705 = vmatpush3.msra.mxu1 %v4951_v55 }
0x33c0   :  { %4706 = vmatprep.subr.mxu1 %v6564_v61 }
0x33c1   :  { %4707 = vmatpush3.msra.mxu1 %v4952_v26 }
0x33c2   :  { %4708 = vmatprep.subr.mxu1 %v6564_v61 }
0x33c3   :  { %4709 = vmatpush3.msra.mxu1 %v4953_v56 }
0x33c4   :  { %4710 = vmatprep.subr.mxu1 %v6564_v61 }
0x33c5   :  { %4711 = vmatpush3.msra.mxu1 %v4954_v1 }
0x33c6   :  { %4712 = vmatprep.subr.mxu1 %v6564_v61 }
0x33c7   :  { %4713 = vmatpush3.msra.mxu1 %v4955_v3 }
0x33c8   :  { %4714 = vmatprep.subr.mxu1 %v6564_v61 }
0x33c9   :  { %4715 = vmatpush3.msra.mxu1 %v4956_v25 }
0x33ca   :  { %4716 = vmatprep.subr.mxu1 %v6564_v61 }
0x33cb   :  { %4717 = vmatpush3.msra.mxu1 %v4957_v35 }
0x33cc   :  { %4718 = vmatprep.subr.mxu1 %v6564_v61 }
0x33cd   :  { %4719 = vmatpush3.msra.mxu1 %v4958_v36 }
0x33ce   :  { %4720 = vmatprep.subr.mxu1 %v6564_v61 }
0x33cf   :  { %4721 = vmatpush3.msra.mxu1 %v4959_v60 }
0x3470   :  { %v3592_v41 = vpop.f32.mrf.mxu1 }
0x3471   :  { %v3593_v57 = vadd.f32 %v4960_v45, %v3592_v41 }
0x3472   :  { %v4678_v54 = vpop.f32.mrf.mxu1 }
0x3473   :  { %3603 = vrot.lane.b32.xlu0 %v3593_v57, %s5144_s18  ;;  %v3882_v10 = vmul.f32 -1.442695, %v3593_v57 }
0x3475   :  { %4891 = vpow2.f32 %v3882_v10 }
0x3482   :  { %v4892_v48 = vpop.eup %4891 }
0x3483   :  { %v3599_v28 = vadd.f32 1.0, %v4892_v48 }
0x3485   :  { %4893 = vrcp.f32 %v3599_v28 }
0x3492   :  { %v4894_v59 = vpop.eup %4893 }
0x3493   :  { %v3613_v32 = vsub.f32 1.0, %v4894_v59  ;;  %v3619_v8 = vmul.f32 %v4894_v59, %v6404_v53  ;;  %v4962_v53 = vld [vmem:[%s6538_s15] ss:$0 sm:$0xff] }
0x34e5   :  { %v3604_v4 = vpop.permute.xlu0 %3603 }
0x34e6   :  { %v3606_v12 = vmul.f32 %v4894_v59, %v3604_v4 }
0x34e8   :  { %3608 = vrot.lane.b32.xlu1 %v3606_v12, %s5145_s4  ;;  %s5148_s4 = smov [#allocation14]  }
0x34e9   :  { %s3806_s5 = sshll.u32 %s5148_s4, 4  ;;  %s3807_s5 = int_to_ptr.vmem [resolvable:$true] %s3806_s5 }
0x34ea   :  { %p5108_p8 = scmp.lt.s32.totalorder %s3807_s5, %s3807_s5 }
0x355a   :  { %v3609_v58 = vpop.permute.xlu1 %3608 }
0x355b   :  { %v3611_v61 = vadd.f32 %v3609_v58, %v3593_v57 }
0x355d   :  { %4895 = vtanh.f32 %v3611_v61 }
0x356a   :  { %v4896_v0 = vpop.eup %4895 }
0x356b   :  { %3615 = vrot.lane.b32.xlu0 %v4896_v0, %s5146_s11 }
0x35dd   :  { %v3616_v62 = vpop.permute.xlu0 %3615 }
0x35de   :  { %v3618_v13 = vmul.f32 %v3616_v62, %v3613_v32 }
0x35e0   :  { %v3620_v9 = vadd.f32 %v3619_v8, %v3618_v13 }
0x35e2   :  { %3622 = vrot.lane.b32.xlu1 %v3620_v9, %s5146_s11  ;;  %s5103_s11 = scalar_lea.vmem %s3807_s5, 160 }
0x35e3   :  { %p5104_p7 = scmp.ne.s32.totalorder %s3807_s5, %s5103_s11  ;;  %p5109_p9 = scmp.lt.s32.totalorder %s5103_s11, %s5103_s11 }
0x35e5   :  { %p5110_p10 = por %p5109_p9, %p5108_p8 }
0x35e7   :  { %p5111_p11 = pnand %p5110_p10, %p5104_p7 }
0x3654   :  { %v3623_v11 = vpop.permute.xlu1 %3622 }
0x3655   :  { %4688 = vmatmul.mubr.msk.f32.vlgmr.msra.gmra.mxu0 %vm343_vm3, %v3623_v11 }
0x3715   :  { %v3692_v39 = vpop.f32.mrf.mxu0 }
0x3716   :  { %v3693_v46 = vadd.f32 %v4961_v44, %v3692_v39 }
0x3717   :  { %v4689_v6 = vpop.f32.mrf.mxu0 }
0x3718   :  { %v3696_v42 = vmax.f32 %v3693_v46, 0.0 }
0x371a   :  { %4723 = vmatmul.mubr.f32.vlgmr.msra.gmra.mxu1 %v3696_v42 }
0x37da   :  { %v3763_v63 = vpop.f32.mrf.mxu1 }
0x37db   :  { %v3764_v2 = vadd.f32 %v4962_v53, %v3763_v63 }
0x37dc   :  { %v4724_v37 = vpop.f32.mrf.mxu1 }
0x37dd   :  { %3884 = vst.sshfl [vmem:[#allocation14 + $0x8] sm:$0x3 pattern:$0x76325410] %v3764_v2 }
0x37de   :  { %5114 = shalt.err (!%p5111_p11)
}
0x37df   :  { %3809 = dma.vmem_to_hbm [thread:$0]  %s3807_s5, 160, %s6539_s16, [#allocation4]  }
0x37e0   :  { %5131 = dma.done.wait [#allocation4], 160  }
0x37e1   :  { %5132 = vsyncadd [#allocation4], 4294967136 }
0x37e2   :  { %3813 = vsyncpa [#allocation3], 1 }
0x37e3   :  { %3814 = vsyncpa [#allocation6], 1 }
0x37e4   :  { %3815 = vsyncpa [#allocation9], 1 }
0x37e5   :  { %3816 = vsyncpa [#allocation12], 1 }
0x37e6   :  { %3817 = vsyncpa [#allocation4], 1 }

</bundles_post_ra>
